<compile_context>
chip_gen: v5e
topology: v5e:2x2
jax: 0.10.0
libtpu: 0.0.40
codegen_flags: <defaults>
</compile_context>

<pallas_src>
import functools

import jax
import jax.numpy as jnp
from jax import lax
from jax.experimental import pallas as pl
from jax.experimental.pallas import tpu as pltpu

EPS = 1e-5
BF16 = jnp.bfloat16
F32 = jnp.float32

_VMEM_CAP_CACHE = [None]


def _vmem_capacity():
    if _VMEM_CAP_CACHE[0] is None:
        try:
            _VMEM_CAP_CACHE[0] = int(pltpu.get_tpu_info().vmem_capacity_bytes)
        except Exception:
            _VMEM_CAP_CACHE[0] = 64 << 20  # conservative (v7x-sized) fallback
    return _VMEM_CAP_CACHE[0]


def _cp(dims, vmem_limit):
    return pltpu.CompilerParams(dimension_semantics=dims,
                                vmem_limit_bytes=int(vmem_limit))


def _pick_tile(total, row_bytes, budget, multiple=8):
    """Largest divisor of `total` within `budget` that is a multiple of
    `multiple` (or the full axis).  Falls back to the full axis."""
    cap = max(1, int(budget) // max(int(row_bytes), 1))
    t = min(total, cap)
    while t > 0:
        if total % t == 0 and (t % multiple == 0 or t == total):
            return t
        t -= 1
    return total


# ---------------------------------------------------------------------------
# Pallas kernels
# ---------------------------------------------------------------------------

def _dw_kernel(pee_ref, peo_ref, poe_ref, poo_ref, w_ref, s_ref, o_ref, *, Ho, Wo):
    """Depthwise 3x3 stride-2 conv + folded BN from 4 phase-split images."""
    refs = ((pee_ref, peo_ref), (poe_ref, poo_ref))
    acc = None
    for dh in range(3):
        for dw in range(3):
            r = refs[dh % 2][dw % 2]
            tap = r[0, pl.ds(dh // 2, Ho), pl.ds(dw // 2, Wo), :].astype(F32)
            term = tap * w_ref[dh * 3 + dw]            # (Ho, Wo, tc) * (1, tc)
            acc = term if acc is None else acc + term
    o_ref[0] = (acc + s_ref[...]).astype(o_ref.dtype)


def _sgcn_kernel(x_ref, wqvk_ref, bqvk_ref, wwg_ref, bwg_ref, wout_ref,
                 bout_ref, o_ref, *, cI):
    """Fully fused SpatialGCN (per batch): fused q/v/k proj + attention + wg + out."""
    x = x_ref[0]                                                  # (P, C) bf16
    qvk = (jnp.dot(x, wqvk_ref[...], preferred_element_type=F32)
           + bqvk_ref[...]).astype(BF16)                          # (P, 3*cI)
    q = qvk[:, :cI]
    v = qvk[:, cI:2 * cI]
    k = qvk[:, 2 * cI:]
    # A = softmax(node_q @ node_v): node_q = q^T (cI,P), node_v = v (P,cI)
    s = lax.dot_general(q, v, (((0,), (0,)), ((), ())),
                        preferred_element_type=F32)               # (cI, cI)
    s = s - jnp.max(s, axis=-1, keepdims=True)
    e = jnp.exp(s)
    a = (e * pl.reciprocal(jnp.sum(e, axis=-1, keepdims=True),
                           approx=True)).astype(BF16)
    av = jnp.dot(k, a, preferred_element_type=F32)                # (P, cI)
    avw = (jnp.dot(av.astype(BF16), wwg_ref[...],
                   preferred_element_type=F32) + bwg_ref[...]).astype(BF16)
    y = jnp.dot(avw, wout_ref[...], preferred_element_type=F32) + bout_ref[...]
    o_ref[0] = jnp.maximum(y + x.astype(F32), 0.0).astype(o_ref.dtype)


def _up_fuse_kernel(mh_ref, la_ref, x_ref, o_ref):
    """Height-stage bilinear upsample matmul fused with x*up + x (per H-row tile)."""
    up = jnp.dot(mh_ref[...], la_ref[0], preferred_element_type=F32)  # (th, W*C)
    xv = x_ref[0].astype(F32)
    o_ref[0] = (xv * up + xv).astype(o_ref.dtype)


def _fgcn_reduce_kernel(x_ref, wpt_ref, bpt_ref, wadj_ref, badj_ref,
                        wwg_ref, bwg_ref, z5_ref, acc_ref, *, c2):
    """Feature-GCN pass 1: fused phi/theta proj + z_idt accumulation + adj/wg."""
    @pl.when(pl.program_id(1) == 0)
    def _():
        acc_ref[...] = jnp.zeros_like(acc_ref)

    x = x_ref[0]                                                  # (tp, C) bf16
    xb = (jnp.dot(x, wpt_ref[...], preferred_element_type=F32)
          + bpt_ref[...]).astype(BF16)                            # (tp, c2+c4)
    xs = xb[:, :c2]
    bm = xb[:, c2:]
    # z_idt += x_sqz @ b^T  (contraction over pixels)
    acc_ref[...] += lax.dot_general(xs, bm, (((0,), (0,)), ((), ())),
                                    preferred_element_type=F32)   # (c2, c4)

    @pl.when(pl.program_id(1) == pl.num_programs(1) - 1)
    def _():
        z_idt = acc_ref[...]                                      # (c2, c4) f32
        z3 = jnp.dot(z_idt.astype(BF16), wadj_ref[...],
                     preferred_element_type=F32) + badj_ref[...]
        z4 = z3 + z_idt
        # store z5^T = z4^T @ W_wg^T + b_wg  -> (c4, c2); pass 2 is then a plain matmul
        z5t = lax.dot_general(z4.astype(BF16), wwg_ref[...],
                              (((0,), (0,)), ((), ())),
                              preferred_element_type=F32) + bwg_ref[...]
        z5_ref[0] = z5t.astype(z5_ref.dtype)


def _fgcn_map_kernel(x_ref, slf_ref, z5_ref, wth_ref, bth_ref, w3_ref, b3_ref,
                     wfa_ref, wfb_ref, bf_ref, o_ref):
    """Feature-GCN pass 2: y = z@b, conv3+relu residual, split final conv, NCHW store."""
    x = x_ref[0]                                                  # (tp, C) bf16
    bm = (jnp.dot(x, wth_ref[...], preferred_element_type=F32)
          + bth_ref[...]).astype(BF16)                            # (tp, c4)
    y = jnp.dot(bm, z5_ref[0].astype(BF16),
                preferred_element_type=F32)                       # (tp, c2)
    y3 = jnp.dot(y.astype(BF16), w3_ref[...],
                 preferred_element_type=F32) + b3_ref[...]        # (tp, C)
    g = jnp.maximum(x.astype(F32) + y3, 0.0)                      # g_out
    out = (jnp.dot(slf_ref[0], wfa_ref[...], preferred_element_type=F32)
           + jnp.dot(g.astype(BF16), wfb_ref[...], preferred_element_type=F32)
           + bf_ref[...])                                         # (tp, C)
    o_ref[0] = out.T.astype(o_ref.dtype)                          # (C, tp): NCHW-direct


# ---------------------------------------------------------------------------
# Helpers / wrappers
# ---------------------------------------------------------------------------

def fold_bn(w, b, bn, eps=EPS):
    """Fold eval-mode BatchNorm into a conv weight (Cout, Cin) and bias."""
    s = bn["gamma"] / jnp.sqrt(bn["var"] + eps)
    w_eff = w * s[:, None]
    b0 = b if b is not None else 0.0
    b_eff = s * (b0 - bn["mean"]) + bn["beta"]
    return w_eff, b_eff


def interp_matrix(out_size, in_size):
    """1-D bilinear interpolation matrix, align_corners=True (matches F.interpolate)."""
    if in_size == 1:
        return jnp.ones((out_size, 1), F32)
    src = jnp.arange(out_size, dtype=F32) * (in_size - 1) / (out_size - 1)
    lo = jnp.clip(jnp.floor(src).astype(jnp.int32), 0, in_size - 2)
    frac = src - lo.astype(F32)
    Wm = jnp.zeros((out_size, in_size), F32)
    Wm = Wm.at[jnp.arange(out_size), lo].add(1.0 - frac)
    Wm = Wm.at[jnp.arange(out_size), lo + 1].add(frac)
    return Wm


def depthwise_s2(x_nhwc, w_taps, shift, vmem_limit):
    """Depthwise 3x3 / stride 2 / pad 1 conv with folded BN (4-way phase split)."""
    N, H, W, C = x_nhwc.shape
    Ho, Wo = (H + 1) // 2, (W + 1) // 2
    Hp, Wp = 2 * Ho + 2, 2 * Wo + 2
    xp = jnp.pad(x_nhwc, ((0, 0), (1, Hp - H - 1), (1, Wp - W - 1), (0, 0)))
    pee = xp[:, 0::2, 0::2, :]
    peo = xp[:, 0::2, 1::2, :]
    poe = xp[:, 1::2, 0::2, :]
    poo = xp[:, 1::2, 1::2, :]
    tc = 128 if (C % 128 == 0) else C
    phase_spec = pl.BlockSpec((1, Ho + 1, Wo + 1, tc), lambda n, c: (n, 0, 0, c))
    return pl.pallas_call(
        functools.partial(_dw_kernel, Ho=Ho, Wo=Wo),
        out_shape=jax.ShapeDtypeStruct((N, Ho, Wo, C), BF16),
        grid=(N, C // tc),
        in_specs=[phase_spec, phase_spec, phase_spec, phase_spec,
                  pl.BlockSpec((9, 1, tc), lambda n, c: (0, 0, c)),
                  pl.BlockSpec((1, tc), lambda n, c: (0, c))],
        out_specs=pl.BlockSpec((1, Ho, Wo, tc), lambda n, c: (n, 0, 0, c)),
        compiler_params=_cp(("parallel", "parallel"), vmem_limit),
    )(pee, peo, poe, poo, w_taps, shift)


def spatial_gcn(x_nhwc, sp, eps, vmem_limit):
    """Fused SpatialGCN on channels-last (N, h, w, C) -> (N, h*w, C) bf16."""
    N, h, w, C = x_nhwc.shape
    cI = C // 2
    P = h * w
    w_wg, b_wg = fold_bn(sp["wg_w"], None, sp["bn_wg"], eps)
    w_out, b_out = fold_bn(sp["out_w"], sp["out_b"], sp["bn_out"], eps)
    wqvk = jnp.concatenate([sp["q_w"].T, sp["v_w"].T, sp["k_w"].T], axis=1)
    bqvk = jnp.concatenate([sp["q_b"], sp["v_b"], sp["k_b"]]).reshape(1, 3 * cI)
    const2 = lambda n: (0, 0)
    return pl.pallas_call(
        functools.partial(_sgcn_kernel, cI=cI),
        out_shape=jax.ShapeDtypeStruct((N, P, C), BF16),
        grid=(N,),
        in_specs=[
            pl.BlockSpec((1, P, C), lambda n: (n, 0, 0)),
            pl.BlockSpec((C, 3 * cI), const2), pl.BlockSpec((1, 3 * cI), const2),
            pl.BlockSpec((cI, cI), const2), pl.BlockSpec((1, cI), const2),
            pl.BlockSpec((cI, C), const2), pl.BlockSpec((1, C), const2),
        ],
        out_specs=pl.BlockSpec((1, P, C), lambda n: (n, 0, 0)),
        compiler_params=_cp(("parallel",), vmem_limit),
    )(x_nhwc.reshape(N, P, C),
      wqvk.astype(BF16), bqvk,
      w_wg.T.astype(BF16), b_wg.reshape(1, cI),
      w_out.T.astype(BF16), b_out.reshape(1, C))


def dual_gcn_forward(feat_nchw, params, ratio=4, eps=EPS):
    N, C, H, W = feat_nchw.shape
    x_nhwc = jnp.transpose(feat_nchw, (0, 2, 3, 1)).astype(BF16)    # (N,H,W,C)

    vmem_cap = _vmem_capacity()
    vmem_limit = min(vmem_cap * 3 // 4, 96 << 20)       # 96MiB (v5e/v6e), 48MiB (v7x)
    tile_budget = max(vmem_cap // 16, 2 << 20)          # per-array VMEM budget

    # ---- local branch: 3 x (depthwise 3x3 stride-2 conv + folded BN) ----
    cur = x_nhwc
    for lp in params["local"]:
        s = lp["bn"]["gamma"] / jnp.sqrt(lp["bn"]["var"] + eps)
        w_taps = (lp["w"][:, 0] * s[:, None, None]).transpose(1, 2, 0).reshape(9, 1, C)
        shift = (lp["bn"]["beta"] - s * lp["bn"]["mean"]).reshape(1, C)
        cur = depthwise_s2(cur, w_taps, shift, vmem_limit)
    hl, wl = cur.shape[1], cur.shape[2]

    # ---- SpatialGCN attention on the downsampled local features ----
    local_att = spatial_gcn(cur, params["sgcn"], eps, vmem_limit)   # (N, hl*wl, C)

    # ---- separable bilinear upsample (align_corners=True) fused with x*up + x ----
    Mh = interp_matrix(H, hl)                                       # (H, hl)
    Mw = interp_matrix(W, wl)                                       # (W, wl)
    # width stage runs in XLA on the tiny (64x-downsampled) tensor, height stage
    # + elementwise fuse runs in Pallas over the full-resolution x.
    la4 = local_att.reshape(N, hl, wl, C).astype(F32)
    la_w = jnp.einsum('wj,nhjc->nhwc', Mw, la4).astype(BF16).reshape(N, hl, W * C)
    th = _pick_tile(H, W * C * 16, tile_budget, multiple=8)
    x_rows = x_nhwc.reshape(N, H, W * C)
    slf = pl.pallas_call(
        _up_fuse_kernel,
        out_shape=jax.ShapeDtypeStruct((N, H, W * C), BF16),
        grid=(N, H // th),
        in_specs=[pl.BlockSpec((th, hl), lambda n, h: (h, 0)),
                  pl.BlockSpec((1, hl, W * C), lambda n, h: (n, 0, 0)),
                  pl.BlockSpec((1, th, W * C), lambda n, h: (n, h, 0))],
        out_specs=pl.BlockSpec((1, th, W * C), lambda n, h: (n, h, 0)),
        compiler_params=_cp(("parallel", "parallel"), vmem_limit),
    )(Mh.astype(BF16), la_w, x_rows)
    slf = slf.reshape(N, H * W, C)                                  # free view

    # ---- feature (coordinate) GCN: two pixel-tiled passes ----
    c4 = C // ratio
    c2 = 2 * c4
    HW = H * W
    x_pix = x_nhwc.reshape(N, HW, C)
    w_phi, b_phi = fold_bn(params["phi_w"], None, params["bn_phi"], eps)
    w_th, b_th = fold_bn(params["theta_w"], None, params["bn_theta"], eps)
    w_adj, b_adj = fold_bn(params["adj_w"], None, params["bn_adj"], eps)
    w_wg, b_wg = fold_bn(params["wg_w"], None, params["bn_wg"], eps)
    w3, b3 = fold_bn(params["conv3_w"], None, params["bn3"], eps)
    wf, bf_ = fold_bn(params["final_w"], None, params["bn_final"], eps)

    wpt = jnp.concatenate([w_phi.T, w_th.T], axis=1).astype(BF16)   # (C, c2+c4)
    bpt = jnp.concatenate([b_phi, b_th]).reshape(1, c2 + c4)

    # tp must be a 128-multiple (lane-dense NCHW store in pass 2) or the full axis.
    tp = _pick_tile(HW, C * 32, tile_budget, multiple=128)
    npt = HW // tp
    const2 = lambda n, p: (0, 0)

    # pass 1: z5^T (N, c4, c2), f32 between passes for accuracy
    z5t = pl.pallas_call(
        functools.partial(_fgcn_reduce_kernel, c2=c2),
        out_shape=jax.ShapeDtypeStruct((N, c4, c2), F32),
        grid=(N, npt),
        in_specs=[pl.BlockSpec((1, tp, C), lambda n, p: (n, p, 0)),
                  pl.BlockSpec((C, c2 + c4), const2), pl.BlockSpec((1, c2 + c4), const2),
                  pl.BlockSpec((c4, c4), const2), pl.BlockSpec((1, c4), const2),
                  pl.BlockSpec((c2, c2), const2), pl.BlockSpec((1, c2), const2)],
        out_specs=pl.BlockSpec((1, c4, c2), lambda n, p: (n, 0, 0)),
        scratch_shapes=[pltpu.VMEM((c2, c4), F32)],
        compiler_params=_cp(("parallel", "arbitrary"), vmem_limit),
    )(x_pix, wpt, bpt,
      w_adj.T.astype(BF16), b_adj.reshape(1, c4),
      w_wg.T.astype(BF16), b_wg.reshape(1, c2))

    # pass 2: y = z@b, conv3 + residual relu, split-weight final conv, NCHW store.
    wfT = wf.T                                                      # (2C, C)
    out_nc = pl.pallas_call(
        _fgcn_map_kernel,
        out_shape=jax.ShapeDtypeStruct((N, C, HW), F32),
        grid=(N, npt),
        in_specs=[pl.BlockSpec((1, tp, C), lambda n, p: (n, p, 0)),
                  pl.BlockSpec((1, tp, C), lambda n, p: (n, p, 0)),
                  pl.BlockSpec((1, c4, c2), lambda n, p: (n, 0, 0)),
                  pl.BlockSpec((C, c4), const2), pl.BlockSpec((1, c4), const2),
                  pl.BlockSpec((c2, C), const2), pl.BlockSpec((1, C), const2),
                  pl.BlockSpec((C, C), const2), pl.BlockSpec((C, C), const2),
                  pl.BlockSpec((1, C), const2)],
        out_specs=pl.BlockSpec((1, C, tp), lambda n, p: (n, 0, p)),
        compiler_params=_cp(("parallel", "parallel"), vmem_limit),
    )(x_pix, slf, z5t,
      w_th.T.astype(BF16), b_th.reshape(1, c4),
      w3.T.astype(BF16), b3.reshape(1, C),
      wfT[:C].astype(BF16), wfT[C:].astype(BF16), bf_.reshape(1, C))

    return out_nc.reshape(N, C, H, W)                               # free reshape


# ---------------------------------------------------------------------------
# Deterministic parameter initialization (synthetic — no checkpoint load)
# ---------------------------------------------------------------------------

def init_params(key, planes, ratio=4):
    C = planes
    cI = C // 2
    c4 = C // ratio
    c2 = 2 * c4
    keys = iter(jax.random.split(key, 128))

    def nrm(shape, scale=0.1):
        return scale * jax.random.normal(next(keys), shape, F32)

    def bn(n):
        return dict(
            gamma=1.0 + nrm((n,)),
            beta=nrm((n,)),
            mean=nrm((n,)),
            var=0.5 + jax.random.uniform(next(keys), (n,), F32),
        )

    p = {}
    p["phi_w"] = nrm((c2, C));   p["bn_phi"] = bn(c2)
    p["theta_w"] = nrm((c4, C)); p["bn_theta"] = bn(c4)
    p["adj_w"] = nrm((c4, c4));  p["bn_adj"] = bn(c4)
    p["wg_w"] = nrm((c2, c2));   p["bn_wg"] = bn(c2)
    p["conv3_w"] = nrm((C, c2)); p["bn3"] = bn(C)
    p["local"] = [dict(w=nrm((C, 1, 3, 3)), bn=bn(C)) for _ in range(3)]
    sg = {}
    sg["k_w"] = nrm((cI, C)); sg["k_b"] = nrm((cI,))
    sg["v_w"] = nrm((cI, C)); sg["v_b"] = nrm((cI,))
    sg["q_w"] = nrm((cI, C)); sg["q_b"] = nrm((cI,))
    sg["wg_w"] = nrm((cI, cI)); sg["bn_wg"] = bn(cI)
    sg["out_w"] = nrm((C, cI)); sg["out_b"] = nrm((C,)); sg["bn_out"] = bn(C)
    p["sgcn"] = sg
    p["final_w"] = nrm((C, 2 * C)); p["bn_final"] = bn(C)
    return p


if __name__ == "__main__":
    planes, N, H, W = 32, 2, 16, 16
    key = jax.random.PRNGKey(0)
    kp, kx = jax.random.split(key)
    params = init_params(kp, planes, ratio=4)
    feat = jax.random.normal(kx, (N, planes, H, W), jnp.float32)

    fwd = jax.jit(dual_gcn_forward)
    out = fwd(feat, params)
    out = jax.block_until_ready(out)
    assert out.shape == (N, planes, H, W), out.shape
    assert bool(jnp.all(jnp.isfinite(out)))
    print("KERNEL_OK")
</pallas_src>

<mosaic_0001>
module attributes {stable_mosaic.version = 11 : i64} {
  func.func @_dw_kernel(%arg0: i32, %arg1: i32, %arg2: memref<1x5x5x32xbf16, #tpu.memory_space<vmem>>, %arg3: memref<1x5x5x32xbf16, #tpu.memory_space<vmem>>, %arg4: memref<1x5x5x32xbf16, #tpu.memory_space<vmem>>, %arg5: memref<1x5x5x32xbf16, #tpu.memory_space<vmem>>, %arg6: memref<9x1x32xf32, #tpu.memory_space<vmem>>, %arg7: memref<1x32xf32, #tpu.memory_space<vmem>>, %arg8: memref<1x4x4x32xbf16, #tpu.memory_space<vmem>>) attributes {dimension_semantics = [#tpu.dimension_semantics<parallel>, #tpu.dimension_semantics<parallel>], iteration_bounds = array<i64: 2, 1>, scalar_prefetch = 0 : i64, scratch_operands = 0 : i64, tpu.core_type = #tpu.core_type<tc>, window_params = [{transform_indices = @transform_0, window_bounds = array<i64: 1, 5, 5, 32>}, {transform_indices = @transform_1, window_bounds = array<i64: 1, 5, 5, 32>}, {transform_indices = @transform_2, window_bounds = array<i64: 1, 5, 5, 32>}, {transform_indices = @transform_3, window_bounds = array<i64: 1, 5, 5, 32>}, {transform_indices = @transform_4, window_bounds = array<i64: 9, 1, 32>}, {transform_indices = @transform_5, window_bounds = array<i64: 1, 32>}, {transform_indices = @transform_6, window_bounds = array<i64: 1, 4, 4, 32>}]} {
    %c0 = arith.constant 0 : index
    %c0_0 = arith.constant 0 : index
    %c0_1 = arith.constant 0 : index
    %c0_2 = arith.constant 0 : index
    %0 = vector.load %arg2[%c0, %c0_0, %c0_1, %c0_2] : memref<1x5x5x32xbf16, #tpu.memory_space<vmem>>, vector<1x4x4x32xbf16>
    %1 = vector.shape_cast %0 : vector<1x4x4x32xbf16> to vector<4x4x32xbf16>
    %2 = arith.extf %1 : vector<4x4x32xbf16> to vector<4x4x32xf32>
    %c0_3 = arith.constant 0 : index
    %c0_4 = arith.constant 0 : index
    %c0_5 = arith.constant 0 : index
    %3 = vector.load %arg6[%c0_3, %c0_4, %c0_5] : memref<9x1x32xf32, #tpu.memory_space<vmem>>, vector<1x1x32xf32>
    %4 = vector.shape_cast %3 : vector<1x1x32xf32> to vector<1x32xf32>
    %5 = vector.shape_cast %4 : vector<1x32xf32> to vector<1x1x32xf32>
    %6 = vector.broadcast %5 : vector<1x1x32xf32> to vector<4x4x32xf32>
    %7 = arith.mulf %2, %6 : vector<4x4x32xf32>
    %c0_6 = arith.constant 0 : index
    %c0_7 = arith.constant 0 : index
    %c0_8 = arith.constant 0 : index
    %c0_9 = arith.constant 0 : index
    %8 = vector.load %arg3[%c0_6, %c0_7, %c0_8, %c0_9] : memref<1x5x5x32xbf16, #tpu.memory_space<vmem>>, vector<1x4x4x32xbf16>
    %9 = vector.shape_cast %8 : vector<1x4x4x32xbf16> to vector<4x4x32xbf16>
    %10 = arith.extf %9 : vector<4x4x32xbf16> to vector<4x4x32xf32>
    %c1 = arith.constant 1 : index
    %c0_10 = arith.constant 0 : index
    %c0_11 = arith.constant 0 : index
    %11 = vector.load %arg6[%c1, %c0_10, %c0_11] : memref<9x1x32xf32, #tpu.memory_space<vmem>>, vector<1x1x32xf32>
    %12 = vector.shape_cast %11 : vector<1x1x32xf32> to vector<1x32xf32>
    %13 = vector.shape_cast %12 : vector<1x32xf32> to vector<1x1x32xf32>
    %14 = vector.broadcast %13 : vector<1x1x32xf32> to vector<4x4x32xf32>
    %15 = arith.mulf %10, %14 : vector<4x4x32xf32>
    %16 = arith.addf %7, %15 : vector<4x4x32xf32>
    %c0_12 = arith.constant 0 : index
    %c0_13 = arith.constant 0 : index
    %c1_14 = arith.constant 1 : index
    %c0_15 = arith.constant 0 : index
    %17 = vector.load %arg2[%c0_12, %c0_13, %c1_14, %c0_15] : memref<1x5x5x32xbf16, #tpu.memory_space<vmem>>, vector<1x4x4x32xbf16>
    %18 = vector.shape_cast %17 : vector<1x4x4x32xbf16> to vector<4x4x32xbf16>
    %19 = arith.extf %18 : vector<4x4x32xbf16> to vector<4x4x32xf32>
    %c2 = arith.constant 2 : index
    %c0_16 = arith.constant 0 : index
    %c0_17 = arith.constant 0 : index
    %20 = vector.load %arg6[%c2, %c0_16, %c0_17] : memref<9x1x32xf32, #tpu.memory_space<vmem>>, vector<1x1x32xf32>
    %21 = vector.shape_cast %20 : vector<1x1x32xf32> to vector<1x32xf32>
    %22 = vector.shape_cast %21 : vector<1x32xf32> to vector<1x1x32xf32>
    %23 = vector.broadcast %22 : vector<1x1x32xf32> to vector<4x4x32xf32>
    %24 = arith.mulf %19, %23 : vector<4x4x32xf32>
    %25 = arith.addf %16, %24 : vector<4x4x32xf32>
    %c0_18 = arith.constant 0 : index
    %c0_19 = arith.constant 0 : index
    %c0_20 = arith.constant 0 : index
    %c0_21 = arith.constant 0 : index
    %26 = vector.load %arg4[%c0_18, %c0_19, %c0_20, %c0_21] : memref<1x5x5x32xbf16, #tpu.memory_space<vmem>>, vector<1x4x4x32xbf16>
    %27 = vector.shape_cast %26 : vector<1x4x4x32xbf16> to vector<4x4x32xbf16>
    %28 = arith.extf %27 : vector<4x4x32xbf16> to vector<4x4x32xf32>
    %c3 = arith.constant 3 : index
    %c0_22 = arith.constant 0 : index
    %c0_23 = arith.constant 0 : index
    %29 = vector.load %arg6[%c3, %c0_22, %c0_23] : memref<9x1x32xf32, #tpu.memory_space<vmem>>, vector<1x1x32xf32>
    %30 = vector.shape_cast %29 : vector<1x1x32xf32> to vector<1x32xf32>
    %31 = vector.shape_cast %30 : vector<1x32xf32> to vector<1x1x32xf32>
    %32 = vector.broadcast %31 : vector<1x1x32xf32> to vector<4x4x32xf32>
    %33 = arith.mulf %28, %32 : vector<4x4x32xf32>
    %34 = arith.addf %25, %33 : vector<4x4x32xf32>
    %c0_24 = arith.constant 0 : index
    %c0_25 = arith.constant 0 : index
    %c0_26 = arith.constant 0 : index
    %c0_27 = arith.constant 0 : index
    %35 = vector.load %arg5[%c0_24, %c0_25, %c0_26, %c0_27] : memref<1x5x5x32xbf16, #tpu.memory_space<vmem>>, vector<1x4x4x32xbf16>
    %36 = vector.shape_cast %35 : vector<1x4x4x32xbf16> to vector<4x4x32xbf16>
    %37 = arith.extf %36 : vector<4x4x32xbf16> to vector<4x4x32xf32>
    %c4 = arith.constant 4 : index
    %c0_28 = arith.constant 0 : index
    %c0_29 = arith.constant 0 : index
    %38 = vector.load %arg6[%c4, %c0_28, %c0_29] : memref<9x1x32xf32, #tpu.memory_space<vmem>>, vector<1x1x32xf32>
    %39 = vector.shape_cast %38 : vector<1x1x32xf32> to vector<1x32xf32>
    %40 = vector.shape_cast %39 : vector<1x32xf32> to vector<1x1x32xf32>
    %41 = vector.broadcast %40 : vector<1x1x32xf32> to vector<4x4x32xf32>
    %42 = arith.mulf %37, %41 : vector<4x4x32xf32>
    %43 = arith.addf %34, %42 : vector<4x4x32xf32>
    %c0_30 = arith.constant 0 : index
    %c0_31 = arith.constant 0 : index
    %c1_32 = arith.constant 1 : index
    %c0_33 = arith.constant 0 : index
    %44 = vector.load %arg4[%c0_30, %c0_31, %c1_32, %c0_33] : memref<1x5x5x32xbf16, #tpu.memory_space<vmem>>, vector<1x4x4x32xbf16>
    %45 = vector.shape_cast %44 : vector<1x4x4x32xbf16> to vector<4x4x32xbf16>
    %46 = arith.extf %45 : vector<4x4x32xbf16> to vector<4x4x32xf32>
    %c5 = arith.constant 5 : index
    %c0_34 = arith.constant 0 : index
    %c0_35 = arith.constant 0 : index
    %47 = vector.load %arg6[%c5, %c0_34, %c0_35] : memref<9x1x32xf32, #tpu.memory_space<vmem>>, vector<1x1x32xf32>
    %48 = vector.shape_cast %47 : vector<1x1x32xf32> to vector<1x32xf32>
    %49 = vector.shape_cast %48 : vector<1x32xf32> to vector<1x1x32xf32>
    %50 = vector.broadcast %49 : vector<1x1x32xf32> to vector<4x4x32xf32>
    %51 = arith.mulf %46, %50 : vector<4x4x32xf32>
    %52 = arith.addf %43, %51 : vector<4x4x32xf32>
    %c0_36 = arith.constant 0 : index
    %c1_37 = arith.constant 1 : index
    %c0_38 = arith.constant 0 : index
    %c0_39 = arith.constant 0 : index
    %53 = vector.load %arg2[%c0_36, %c1_37, %c0_38, %c0_39] : memref<1x5x5x32xbf16, #tpu.memory_space<vmem>>, vector<1x4x4x32xbf16>
    %54 = vector.shape_cast %53 : vector<1x4x4x32xbf16> to vector<4x4x32xbf16>
    %55 = arith.extf %54 : vector<4x4x32xbf16> to vector<4x4x32xf32>
    %c6 = arith.constant 6 : index
    %c0_40 = arith.constant 0 : index
    %c0_41 = arith.constant 0 : index
    %56 = vector.load %arg6[%c6, %c0_40, %c0_41] : memref<9x1x32xf32, #tpu.memory_space<vmem>>, vector<1x1x32xf32>
    %57 = vector.shape_cast %56 : vector<1x1x32xf32> to vector<1x32xf32>
    %58 = vector.shape_cast %57 : vector<1x32xf32> to vector<1x1x32xf32>
    %59 = vector.broadcast %58 : vector<1x1x32xf32> to vector<4x4x32xf32>
    %60 = arith.mulf %55, %59 : vector<4x4x32xf32>
    %61 = arith.addf %52, %60 : vector<4x4x32xf32>
    %c0_42 = arith.constant 0 : index
    %c1_43 = arith.constant 1 : index
    %c0_44 = arith.constant 0 : index
    %c0_45 = arith.constant 0 : index
    %62 = vector.load %arg3[%c0_42, %c1_43, %c0_44, %c0_45] : memref<1x5x5x32xbf16, #tpu.memory_space<vmem>>, vector<1x4x4x32xbf16>
    %63 = vector.shape_cast %62 : vector<1x4x4x32xbf16> to vector<4x4x32xbf16>
    %64 = arith.extf %63 : vector<4x4x32xbf16> to vector<4x4x32xf32>
    %c7 = arith.constant 7 : index
    %c0_46 = arith.constant 0 : index
    %c0_47 = arith.constant 0 : index
    %65 = vector.load %arg6[%c7, %c0_46, %c0_47] : memref<9x1x32xf32, #tpu.memory_space<vmem>>, vector<1x1x32xf32>
    %66 = vector.shape_cast %65 : vector<1x1x32xf32> to vector<1x32xf32>
    %67 = vector.shape_cast %66 : vector<1x32xf32> to vector<1x1x32xf32>
    %68 = vector.broadcast %67 : vector<1x1x32xf32> to vector<4x4x32xf32>
    %69 = arith.mulf %64, %68 : vector<4x4x32xf32>
    %70 = arith.addf %61, %69 : vector<4x4x32xf32>
    %c0_48 = arith.constant 0 : index
    %c1_49 = arith.constant 1 : index
    %c1_50 = arith.constant 1 : index
    %c0_51 = arith.constant 0 : index
    %71 = vector.load %arg2[%c0_48, %c1_49, %c1_50, %c0_51] : memref<1x5x5x32xbf16, #tpu.memory_space<vmem>>, vector<1x4x4x32xbf16>
    %72 = vector.shape_cast %71 : vector<1x4x4x32xbf16> to vector<4x4x32xbf16>
    %73 = arith.extf %72 : vector<4x4x32xbf16> to vector<4x4x32xf32>
    %c8 = arith.constant 8 : index
    %c0_52 = arith.constant 0 : index
    %c0_53 = arith.constant 0 : index
    %74 = vector.load %arg6[%c8, %c0_52, %c0_53] : memref<9x1x32xf32, #tpu.memory_space<vmem>>, vector<1x1x32xf32>
    %75 = vector.shape_cast %74 : vector<1x1x32xf32> to vector<1x32xf32>
    %76 = vector.shape_cast %75 : vector<1x32xf32> to vector<1x1x32xf32>
    %77 = vector.broadcast %76 : vector<1x1x32xf32> to vector<4x4x32xf32>
    %78 = arith.mulf %73, %77 : vector<4x4x32xf32>
    %79 = arith.addf %70, %78 : vector<4x4x32xf32>
    %c0_54 = arith.constant 0 : index
    %c0_55 = arith.constant 0 : index
    %80 = vector.load %arg7[%c0_54, %c0_55] : memref<1x32xf32, #tpu.memory_space<vmem>>, vector<1x32xf32>
    %81 = vector.shape_cast %80 : vector<1x32xf32> to vector<1x1x32xf32>
    %82 = vector.broadcast %81 : vector<1x1x32xf32> to vector<4x4x32xf32>
    %83 = arith.addf %79, %82 : vector<4x4x32xf32>
    %84 = arith.truncf %83 : vector<4x4x32xf32> to vector<4x4x32xbf16>
    %c0_56 = arith.constant 0 : index
    %c0_57 = arith.constant 0 : index
    %c0_58 = arith.constant 0 : index
    %c0_59 = arith.constant 0 : index
    %85 = vector.load %arg8[%c0_56, %c0_57, %c0_58, %c0_59] : memref<1x4x4x32xbf16, #tpu.memory_space<vmem>>, vector<1x4x4x32xbf16>
    %86 = vector.shape_cast %85 : vector<1x4x4x32xbf16> to vector<4x4x32xbf16>
    %87 = vector.shape_cast %84 : vector<4x4x32xbf16> to vector<1x4x4x32xbf16>
    tpu.vector_store %arg8[%c0_56, %c0_57, %c0_58, %c0_59], %87 {strides = array<i32>} : memref<1x4x4x32xbf16, #tpu.memory_space<vmem>>, vector<1x4x4x32xbf16>,
    return
  }
  func.func @transform_0(%arg0: i32, %arg1: i32) -> (i32, i32, i32, i32) {
    %c0_i32 = arith.constant 0 : i32
    %c0_i32_0 = arith.constant 0 : i32
    %c0_i32_1 = arith.constant 0 : i32
    return %arg0, %c0_i32, %c0_i32_0, %arg1 : i32, i32, i32, i32
  }
  func.func @transform_1(%arg0: i32, %arg1: i32) -> (i32, i32, i32, i32) {
    %c0_i32 = arith.constant 0 : i32
    %c0_i32_0 = arith.constant 0 : i32
    %c0_i32_1 = arith.constant 0 : i32
    return %arg0, %c0_i32, %c0_i32_0, %arg1 : i32, i32, i32, i32
  }
  func.func @transform_2(%arg0: i32, %arg1: i32) -> (i32, i32, i32, i32) {
    %c0_i32 = arith.constant 0 : i32
    %c0_i32_0 = arith.constant 0 : i32
    %c0_i32_1 = arith.constant 0 : i32
    return %arg0, %c0_i32, %c0_i32_0, %arg1 : i32, i32, i32, i32
  }
  func.func @transform_3(%arg0: i32, %arg1: i32) -> (i32, i32, i32, i32) {
    %c0_i32 = arith.constant 0 : i32
    %c0_i32_0 = arith.constant 0 : i32
    %c0_i32_1 = arith.constant 0 : i32
    return %arg0, %c0_i32, %c0_i32_0, %arg1 : i32, i32, i32, i32
  }
  func.func @transform_4(%arg0: i32, %arg1: i32) -> (i32, i32, i32) {
    %c0_i32 = arith.constant 0 : i32
    %c0_i32_0 = arith.constant 0 : i32
    %c0_i32_1 = arith.constant 0 : i32
    return %c0_i32, %c0_i32_0, %arg1 : i32, i32, i32
  }
  func.func @transform_5(%arg0: i32, %arg1: i32) -> (i32, i32) {
    %c0_i32 = arith.constant 0 : i32
    %c0_i32_0 = arith.constant 0 : i32
    return %c0_i32, %arg1 : i32, i32
  }
  func.func @transform_6(%arg0: i32, %arg1: i32) -> (i32, i32, i32, i32) {
    %c0_i32 = arith.constant 0 : i32
    %c0_i32_0 = arith.constant 0 : i32
    %c0_i32_1 = arith.constant 0 : i32
    return %arg0, %c0_i32, %c0_i32_0, %arg1 : i32, i32, i32, i32
  }
}

module attributes {stable_mosaic.version = 11 : i64} {
  func.func @_dw_kernel(%arg0: i32, %arg1: i32, %arg2: memref<1x9x9x32xbf16, #tpu.memory_space<vmem>>, %arg3: memref<1x9x9x32xbf16, #tpu.memory_space<vmem>>, %arg4: memref<1x9x9x32xbf16, #tpu.memory_space<vmem>>, %arg5: memref<1x9x9x32xbf16, #tpu.memory_space<vmem>>, %arg6: memref<9x1x32xf32, #tpu.memory_space<vmem>>, %arg7: memref<1x32xf32, #tpu.memory_space<vmem>>, %arg8: memref<1x8x8x32xbf16, #tpu.memory_space<vmem>>) attributes {dimension_semantics = [#tpu.dimension_semantics<parallel>, #tpu.dimension_semantics<parallel>], iteration_bounds = array<i64: 2, 1>, scalar_prefetch = 0 : i64, scratch_operands = 0 : i64, tpu.core_type = #tpu.core_type<tc>, window_params = [{transform_indices = @transform_0, window_bounds = array<i64: 1, 9, 9, 32>}, {transform_indices = @transform_1, window_bounds = array<i64: 1, 9, 9, 32>}, {transform_indices = @transform_2, window_bounds = array<i64: 1, 9, 9, 32>}, {transform_indices = @transform_3, window_bounds = array<i64: 1, 9, 9, 32>}, {transform_indices = @transform_4, window_bounds = array<i64: 9, 1, 32>}, {transform_indices = @transform_5, window_bounds = array<i64: 1, 32>}, {transform_indices = @transform_6, window_bounds = array<i64: 1, 8, 8, 32>}]} {
    %c0 = arith.constant 0 : index
    %c0_0 = arith.constant 0 : index
    %c0_1 = arith.constant 0 : index
    %c0_2 = arith.constant 0 : index
    %0 = vector.load %arg2[%c0, %c0_0, %c0_1, %c0_2] : memref<1x9x9x32xbf16, #tpu.memory_space<vmem>>, vector<1x8x8x32xbf16>
    %1 = vector.shape_cast %0 : vector<1x8x8x32xbf16> to vector<8x8x32xbf16>
    %2 = arith.extf %1 : vector<8x8x32xbf16> to vector<8x8x32xf32>
    %c0_3 = arith.constant 0 : index
    %c0_4 = arith.constant 0 : index
    %c0_5 = arith.constant 0 : index
    %3 = vector.load %arg6[%c0_3, %c0_4, %c0_5] : memref<9x1x32xf32, #tpu.memory_space<vmem>>, vector<1x1x32xf32>
    %4 = vector.shape_cast %3 : vector<1x1x32xf32> to vector<1x32xf32>
    %5 = vector.shape_cast %4 : vector<1x32xf32> to vector<1x1x32xf32>
    %6 = vector.broadcast %5 : vector<1x1x32xf32> to vector<8x8x32xf32>
    %7 = arith.mulf %2, %6 : vector<8x8x32xf32>
    %c0_6 = arith.constant 0 : index
    %c0_7 = arith.constant 0 : index
    %c0_8 = arith.constant 0 : index
    %c0_9 = arith.constant 0 : index
    %8 = vector.load %arg3[%c0_6, %c0_7, %c0_8, %c0_9] : memref<1x9x9x32xbf16, #tpu.memory_space<vmem>>, vector<1x8x8x32xbf16>
    %9 = vector.shape_cast %8 : vector<1x8x8x32xbf16> to vector<8x8x32xbf16>
    %10 = arith.extf %9 : vector<8x8x32xbf16> to vector<8x8x32xf32>
    %c1 = arith.constant 1 : index
    %c0_10 = arith.constant 0 : index
    %c0_11 = arith.constant 0 : index
    %11 = vector.load %arg6[%c1, %c0_10, %c0_11] : memref<9x1x32xf32, #tpu.memory_space<vmem>>, vector<1x1x32xf32>
    %12 = vector.shape_cast %11 : vector<1x1x32xf32> to vector<1x32xf32>
    %13 = vector.shape_cast %12 : vector<1x32xf32> to vector<1x1x32xf32>
    %14 = vector.broadcast %13 : vector<1x1x32xf32> to vector<8x8x32xf32>
    %15 = arith.mulf %10, %14 : vector<8x8x32xf32>
    %16 = arith.addf %7, %15 : vector<8x8x32xf32>
    %c0_12 = arith.constant 0 : index
    %c0_13 = arith.constant 0 : index
    %c1_14 = arith.constant 1 : index
    %c0_15 = arith.constant 0 : index
    %17 = vector.load %arg2[%c0_12, %c0_13, %c1_14, %c0_15] : memref<1x9x9x32xbf16, #tpu.memory_space<vmem>>, vector<1x8x8x32xbf16>
    %18 = vector.shape_cast %17 : vector<1x8x8x32xbf16> to vector<8x8x32xbf16>
    %19 = arith.extf %18 : vector<8x8x32xbf16> to vector<8x8x32xf32>
    %c2 = arith.constant 2 : index
    %c0_16 = arith.constant 0 : index
    %c0_17 = arith.constant 0 : index
    %20 = vector.load %arg6[%c2, %c0_16, %c0_17] : memref<9x1x32xf32, #tpu.memory_space<vmem>>, vector<1x1x32xf32>
    %21 = vector.shape_cast %20 : vector<1x1x32xf32> to vector<1x32xf32>
    %22 = vector.shape_cast %21 : vector<1x32xf32> to vector<1x1x32xf32>
    %23 = vector.broadcast %22 : vector<1x1x32xf32> to vector<8x8x32xf32>
    %24 = arith.mulf %19, %23 : vector<8x8x32xf32>
    %25 = arith.addf %16, %24 : vector<8x8x32xf32>
    %c0_18 = arith.constant 0 : index
    %c0_19 = arith.constant 0 : index
    %c0_20 = arith.constant 0 : index
    %c0_21 = arith.constant 0 : index
    %26 = vector.load %arg4[%c0_18, %c0_19, %c0_20, %c0_21] : memref<1x9x9x32xbf16, #tpu.memory_space<vmem>>, vector<1x8x8x32xbf16>
    %27 = vector.shape_cast %26 : vector<1x8x8x32xbf16> to vector<8x8x32xbf16>
    %28 = arith.extf %27 : vector<8x8x32xbf16> to vector<8x8x32xf32>
    %c3 = arith.constant 3 : index
    %c0_22 = arith.constant 0 : index
    %c0_23 = arith.constant 0 : index
    %29 = vector.load %arg6[%c3, %c0_22, %c0_23] : memref<9x1x32xf32, #tpu.memory_space<vmem>>, vector<1x1x32xf32>
    %30 = vector.shape_cast %29 : vector<1x1x32xf32> to vector<1x32xf32>
    %31 = vector.shape_cast %30 : vector<1x32xf32> to vector<1x1x32xf32>
    %32 = vector.broadcast %31 : vector<1x1x32xf32> to vector<8x8x32xf32>
    %33 = arith.mulf %28, %32 : vector<8x8x32xf32>
    %34 = arith.addf %25, %33 : vector<8x8x32xf32>
    %c0_24 = arith.constant 0 : index
    %c0_25 = arith.constant 0 : index
    %c0_26 = arith.constant 0 : index
    %c0_27 = arith.constant 0 : index
    %35 = vector.load %arg5[%c0_24, %c0_25, %c0_26, %c0_27] : memref<1x9x9x32xbf16, #tpu.memory_space<vmem>>, vector<1x8x8x32xbf16>
    %36 = vector.shape_cast %35 : vector<1x8x8x32xbf16> to vector<8x8x32xbf16>
    %37 = arith.extf %36 : vector<8x8x32xbf16> to vector<8x8x32xf32>
    %c4 = arith.constant 4 : index
    %c0_28 = arith.constant 0 : index
    %c0_29 = arith.constant 0 : index
    %38 = vector.load %arg6[%c4, %c0_28, %c0_29] : memref<9x1x32xf32, #tpu.memory_space<vmem>>, vector<1x1x32xf32>
    %39 = vector.shape_cast %38 : vector<1x1x32xf32> to vector<1x32xf32>
    %40 = vector.shape_cast %39 : vector<1x32xf32> to vector<1x1x32xf32>
    %41 = vector.broadcast %40 : vector<1x1x32xf32> to vector<8x8x32xf32>
    %42 = arith.mulf %37, %41 : vector<8x8x32xf32>
    %43 = arith.addf %34, %42 : vector<8x8x32xf32>
    %c0_30 = arith.constant 0 : index
    %c0_31 = arith.constant 0 : index
    %c1_32 = arith.constant 1 : index
    %c0_33 = arith.constant 0 : index
    %44 = vector.load %arg4[%c0_30, %c0_31, %c1_32, %c0_33] : memref<1x9x9x32xbf16, #tpu.memory_space<vmem>>, vector<1x8x8x32xbf16>
    %45 = vector.shape_cast %44 : vector<1x8x8x32xbf16> to vector<8x8x32xbf16>
    %46 = arith.extf %45 : vector<8x8x32xbf16> to vector<8x8x32xf32>
    %c5 = arith.constant 5 : index
    %c0_34 = arith.constant 0 : index
    %c0_35 = arith.constant 0 : index
    %47 = vector.load %arg6[%c5, %c0_34, %c0_35] : memref<9x1x32xf32, #tpu.memory_space<vmem>>, vector<1x1x32xf32>
    %48 = vector.shape_cast %47 : vector<1x1x32xf32> to vector<1x32xf32>
    %49 = vector.shape_cast %48 : vector<1x32xf32> to vector<1x1x32xf32>
    %50 = vector.broadcast %49 : vector<1x1x32xf32> to vector<8x8x32xf32>
    %51 = arith.mulf %46, %50 : vector<8x8x32xf32>
    %52 = arith.addf %43, %51 : vector<8x8x32xf32>
    %c0_36 = arith.constant 0 : index
    %c1_37 = arith.constant 1 : index
    %c0_38 = arith.constant 0 : index
    %c0_39 = arith.constant 0 : index
    %53 = vector.load %arg2[%c0_36, %c1_37, %c0_38, %c0_39] : memref<1x9x9x32xbf16, #tpu.memory_space<vmem>>, vector<1x8x8x32xbf16>
    %54 = vector.shape_cast %53 : vector<1x8x8x32xbf16> to vector<8x8x32xbf16>
    %55 = arith.extf %54 : vector<8x8x32xbf16> to vector<8x8x32xf32>
    %c6 = arith.constant 6 : index
    %c0_40 = arith.constant 0 : index
    %c0_41 = arith.constant 0 : index
    %56 = vector.load %arg6[%c6, %c0_40, %c0_41] : memref<9x1x32xf32, #tpu.memory_space<vmem>>, vector<1x1x32xf32>
    %57 = vector.shape_cast %56 : vector<1x1x32xf32> to vector<1x32xf32>
    %58 = vector.shape_cast %57 : vector<1x32xf32> to vector<1x1x32xf32>
    %59 = vector.broadcast %58 : vector<1x1x32xf32> to vector<8x8x32xf32>
    %60 = arith.mulf %55, %59 : vector<8x8x32xf32>
    %61 = arith.addf %52, %60 : vector<8x8x32xf32>
    %c0_42 = arith.constant 0 : index
    %c1_43 = arith.constant 1 : index
    %c0_44 = arith.constant 0 : index
    %c0_45 = arith.constant 0 : index
    %62 = vector.load %arg3[%c0_42, %c1_43, %c0_44, %c0_45] : memref<1x9x9x32xbf16, #tpu.memory_space<vmem>>, vector<1x8x8x32xbf16>
    %63 = vector.shape_cast %62 : vector<1x8x8x32xbf16> to vector<8x8x32xbf16>
    %64 = arith.extf %63 : vector<8x8x32xbf16> to vector<8x8x32xf32>
    %c7 = arith.constant 7 : index
    %c0_46 = arith.constant 0 : index
    %c0_47 = arith.constant 0 : index
    %65 = vector.load %arg6[%c7, %c0_46, %c0_47] : memref<9x1x32xf32, #tpu.memory_space<vmem>>, vector<1x1x32xf32>
    %66 = vector.shape_cast %65 : vector<1x1x32xf32> to vector<1x32xf32>
    %67 = vector.shape_cast %66 : vector<1x32xf32> to vector<1x1x32xf32>
    %68 = vector.broadcast %67 : vector<1x1x32xf32> to vector<8x8x32xf32>
    %69 = arith.mulf %64, %68 : vector<8x8x32xf32>
    %70 = arith.addf %61, %69 : vector<8x8x32xf32>
    %c0_48 = arith.constant 0 : index
    %c1_49 = arith.constant 1 : index
    %c1_50 = arith.constant 1 : index
    %c0_51 = arith.constant 0 : index
    %71 = vector.load %arg2[%c0_48, %c1_49, %c1_50, %c0_51] : memref<1x9x9x32xbf16, #tpu.memory_space<vmem>>, vector<1x8x8x32xbf16>
    %72 = vector.shape_cast %71 : vector<1x8x8x32xbf16> to vector<8x8x32xbf16>
    %73 = arith.extf %72 : vector<8x8x32xbf16> to vector<8x8x32xf32>
    %c8 = arith.constant 8 : index
    %c0_52 = arith.constant 0 : index
    %c0_53 = arith.constant 0 : index
    %74 = vector.load %arg6[%c8, %c0_52, %c0_53] : memref<9x1x32xf32, #tpu.memory_space<vmem>>, vector<1x1x32xf32>
    %75 = vector.shape_cast %74 : vector<1x1x32xf32> to vector<1x32xf32>
    %76 = vector.shape_cast %75 : vector<1x32xf32> to vector<1x1x32xf32>
    %77 = vector.broadcast %76 : vector<1x1x32xf32> to vector<8x8x32xf32>
    %78 = arith.mulf %73, %77 : vector<8x8x32xf32>
    %79 = arith.addf %70, %78 : vector<8x8x32xf32>
    %c0_54 = arith.constant 0 : index
    %c0_55 = arith.constant 0 : index
    %80 = vector.load %arg7[%c0_54, %c0_55] : memref<1x32xf32, #tpu.memory_space<vmem>>, vector<1x32xf32>
    %81 = vector.shape_cast %80 : vector<1x32xf32> to vector<1x1x32xf32>
    %82 = vector.broadcast %81 : vector<1x1x32xf32> to vector<8x8x32xf32>
    %83 = arith.addf %79, %82 : vector<8x8x32xf32>
    %84 = arith.truncf %83 : vector<8x8x32xf32> to vector<8x8x32xbf16>
    %c0_56 = arith.constant 0 : index
    %c0_57 = arith.constant 0 : index
    %c0_58 = arith.constant 0 : index
    %c0_59 = arith.constant 0 : index
    %85 = vector.load %arg8[%c0_56, %c0_57, %c0_58, %c0_59] : memref<1x8x8x32xbf16, #tpu.memory_space<vmem>>, vector<1x8x8x32xbf16>
    %86 = vector.shape_cast %85 : vector<1x8x8x32xbf16> to vector<8x8x32xbf16>
    %87 = vector.shape_cast %84 : vector<8x8x32xbf16> to vector<1x8x8x32xbf16>
    tpu.vector_store %arg8[%c0_56, %c0_57, %c0_58, %c0_59], %87 {strides = array<i32>} : memref<1x8x8x32xbf16, #tpu.memory_space<vmem>>, vector<1x8x8x32xbf16>,
    return
  }
  func.func @transform_0(%arg0: i32, %arg1: i32) -> (i32, i32, i32, i32) {
    %c0_i32 = arith.constant 0 : i32
    %c0_i32_0 = arith.constant 0 : i32
    %c0_i32_1 = arith.constant 0 : i32
    return %arg0, %c0_i32, %c0_i32_0, %arg1 : i32, i32, i32, i32
  }
  func.func @transform_1(%arg0: i32, %arg1: i32) -> (i32, i32, i32, i32) {
    %c0_i32 = arith.constant 0 : i32
    %c0_i32_0 = arith.constant 0 : i32
    %c0_i32_1 = arith.constant 0 : i32
    return %arg0, %c0_i32, %c0_i32_0, %arg1 : i32, i32, i32, i32
  }
  func.func @transform_2(%arg0: i32, %arg1: i32) -> (i32, i32, i32, i32) {
    %c0_i32 = arith.constant 0 : i32
    %c0_i32_0 = arith.constant 0 : i32
    %c0_i32_1 = arith.constant 0 : i32
    return %arg0, %c0_i32, %c0_i32_0, %arg1 : i32, i32, i32, i32
  }
  func.func @transform_3(%arg0: i32, %arg1: i32) -> (i32, i32, i32, i32) {
    %c0_i32 = arith.constant 0 : i32
    %c0_i32_0 = arith.constant 0 : i32
    %c0_i32_1 = arith.constant 0 : i32
    return %arg0, %c0_i32, %c0_i32_0, %arg1 : i32, i32, i32, i32
  }
  func.func @transform_4(%arg0: i32, %arg1: i32) -> (i32, i32, i32) {
    %c0_i32 = arith.constant 0 : i32
    %c0_i32_0 = arith.constant 0 : i32
    %c0_i32_1 = arith.constant 0 : i32
    return %c0_i32, %c0_i32_0, %arg1 : i32, i32, i32
  }
  func.func @transform_5(%arg0: i32, %arg1: i32) -> (i32, i32) {
    %c0_i32 = arith.constant 0 : i32
    %c0_i32_0 = arith.constant 0 : i32
    return %c0_i32, %arg1 : i32, i32
  }
  func.func @transform_6(%arg0: i32, %arg1: i32) -> (i32, i32, i32, i32) {
    %c0_i32 = arith.constant 0 : i32
    %c0_i32_0 = arith.constant 0 : i32
    %c0_i32_1 = arith.constant 0 : i32
    return %arg0, %c0_i32, %c0_i32_0, %arg1 : i32, i32, i32, i32
  }
}

module attributes {stable_mosaic.version = 11 : i64} {
  func.func @_sgcn_kernel(%arg0: i32, %arg1: memref<1x4x32xbf16, #tpu.memory_space<vmem>>, %arg2: memref<32x48xbf16, #tpu.memory_space<vmem>>, %arg3: memref<1x48xf32, #tpu.memory_space<vmem>>, %arg4: memref<16x16xbf16, #tpu.memory_space<vmem>>, %arg5: memref<1x16xf32, #tpu.memory_space<vmem>>, %arg6: memref<16x32xbf16, #tpu.memory_space<vmem>>, %arg7: memref<1x32xf32, #tpu.memory_space<vmem>>, %arg8: memref<1x4x32xbf16, #tpu.memory_space<vmem>>) attributes {dimension_semantics = [#tpu.dimension_semantics<parallel>], iteration_bounds = array<i64: 2>, scalar_prefetch = 0 : i64, scratch_operands = 0 : i64, tpu.core_type = #tpu.core_type<tc>, window_params = [{transform_indices = @transform_0, window_bounds = array<i64: 1, 4, 32>}, {pipeline_mode = #tpu.pipeline_mode<synchronous>, transform_indices = @transform_1, window_bounds = array<i64: 32, 48>}, {pipeline_mode = #tpu.pipeline_mode<synchronous>, transform_indices = @transform_2, window_bounds = array<i64: 1, 48>}, {pipeline_mode = #tpu.pipeline_mode<synchronous>, transform_indices = @transform_3, window_bounds = array<i64: 16, 16>}, {pipeline_mode = #tpu.pipeline_mode<synchronous>, transform_indices = @transform_4, window_bounds = array<i64: 1, 16>}, {pipeline_mode = #tpu.pipeline_mode<synchronous>, transform_indices = @transform_5, window_bounds = array<i64: 16, 32>}, {pipeline_mode = #tpu.pipeline_mode<synchronous>, transform_indices = @transform_6, window_bounds = array<i64: 1, 32>}, {transform_indices = @transform_7, window_bounds = array<i64: 1, 4, 32>}]} {
    %c0 = arith.constant 0 : index
    %c0_0 = arith.constant 0 : index
    %c0_1 = arith.constant 0 : index
    %0 = vector.load %arg1[%c0, %c0_0, %c0_1] : memref<1x4x32xbf16, #tpu.memory_space<vmem>>, vector<1x4x32xbf16>
    %1 = vector.shape_cast %0 : vector<1x4x32xbf16> to vector<4x32xbf16>
    %c0_2 = arith.constant 0 : index
    %c0_3 = arith.constant 0 : index
    %2 = vector.load %arg2[%c0_2, %c0_3] : memref<32x48xbf16, #tpu.memory_space<vmem>>, vector<32x48xbf16>
    %cst = arith.constant dense<0.000000e+00> : vector<4x48xf32>
    %3 = tpu.matmul %1, %2, %cst {dimension_numbers = #tpu.dot_dimension_numbers<[1], [0], [0], [1], [0, 0, 1, 1], [], []>} : vector<4x32xbf16>, vector<32x48xbf16>, vector<4x48xf32> -> vector<4x48xf32>
    %c0_4 = arith.constant 0 : index
    %c0_5 = arith.constant 0 : index
    %4 = vector.load %arg3[%c0_4, %c0_5] : memref<1x48xf32, #tpu.memory_space<vmem>>, vector<1x48xf32>
    %5 = vector.broadcast %4 : vector<1x48xf32> to vector<4x48xf32>
    %6 = arith.addf %3, %5 : vector<4x48xf32>
    %7 = arith.truncf %6 : vector<4x48xf32> to vector<4x48xbf16>
    %8 = vector.extract_strided_slice %7 {offsets = [0, 0], sizes = [4, 16], strides = [1, 1]} : vector<4x48xbf16> to vector<4x16xbf16>
    %9 = vector.extract_strided_slice %7 {offsets = [0, 16], sizes = [4, 16], strides = [1, 1]} : vector<4x48xbf16> to vector<4x16xbf16>
    %10 = vector.extract_strided_slice %7 {offsets = [0, 32], sizes = [4, 16], strides = [1, 1]} : vector<4x48xbf16> to vector<4x16xbf16>
    %cst_6 = arith.constant dense<0.000000e+00> : vector<16x16xf32>
    %11 = tpu.matmul %8, %9, %cst_6 {dimension_numbers = #tpu.dot_dimension_numbers<[0], [0], [1], [1], [0, 1, 1, 1], [], []>} : vector<4x16xbf16>, vector<4x16xbf16>, vector<16x16xf32> -> vector<16x16xf32>
    %cst_7 = arith.constant dense<0xFF800000> : vector<16xf32>
    %12 = vector.multi_reduction <maximumf>, %11, %cst_7 [1] : vector<16x16xf32> to vector<16xf32>
    %13 = vector.shape_cast %12 : vector<16xf32> to vector<16x1xf32>
    %14 = vector.broadcast %13 : vector<16x1xf32> to vector<16x16xf32>
    %15 = arith.subf %11, %14 : vector<16x16xf32>
    %16 = math.exp %15 : vector<16x16xf32>
    %cst_8 = arith.constant dense<0.000000e+00> : vector<16xf32>
    %17 = vector.multi_reduction <add>, %16, %cst_8 [1] : vector<16x16xf32> to vector<16xf32>
    %18 = vector.shape_cast %17 : vector<16xf32> to vector<16x1xf32>
    %19 = tpu.reciprocal %18 {approx = true} : vector<16x1xf32> -> vector<16x1xf32>
    %20 = vector.broadcast %19 : vector<16x1xf32> to vector<16x16xf32>
    %21 = arith.mulf %16, %20 : vector<16x16xf32>
    %22 = arith.truncf %21 : vector<16x16xf32> to vector<16x16xbf16>
    %cst_9 = arith.constant dense<0.000000e+00> : vector<4x16xf32>
    %23 = tpu.matmul %10, %22, %cst_9 {dimension_numbers = #tpu.dot_dimension_numbers<[1], [0], [0], [1], [0, 0, 1, 1], [], []>} : vector<4x16xbf16>, vector<16x16xbf16>, vector<4x16xf32> -> vector<4x16xf32>
    %24 = arith.truncf %23 : vector<4x16xf32> to vector<4x16xbf16>
    %c0_10 = arith.constant 0 : index
    %c0_11 = arith.constant 0 : index
    %25 = vector.load %arg4[%c0_10, %c0_11] : memref<16x16xbf16, #tpu.memory_space<vmem>>, vector<16x16xbf16>
    %cst_12 = arith.constant dense<0.000000e+00> : vector<4x16xf32>
    %26 = tpu.matmul %24, %25, %cst_12 {dimension_numbers = #tpu.dot_dimension_numbers<[1], [0], [0], [1], [0, 0, 1, 1], [], []>} : vector<4x16xbf16>, vector<16x16xbf16>, vector<4x16xf32> -> vector<4x16xf32>
    %c0_13 = arith.constant 0 : index
    %c0_14 = arith.constant 0 : index
    %27 = vector.load %arg5[%c0_13, %c0_14] : memref<1x16xf32, #tpu.memory_space<vmem>>, vector<1x16xf32>
    %28 = vector.broadcast %27 : vector<1x16xf32> to vector<4x16xf32>
    %29 = arith.addf %26, %28 : vector<4x16xf32>
    %30 = arith.truncf %29 : vector<4x16xf32> to vector<4x16xbf16>
    %c0_15 = arith.constant 0 : index
    %c0_16 = arith.constant 0 : index
    %31 = vector.load %arg6[%c0_15, %c0_16] : memref<16x32xbf16, #tpu.memory_space<vmem>>, vector<16x32xbf16>
    %cst_17 = arith.constant dense<0.000000e+00> : vector<4x32xf32>
    %32 = tpu.matmul %30, %31, %cst_17 {dimension_numbers = #tpu.dot_dimension_numbers<[1], [0], [0], [1], [0, 0, 1, 1], [], []>} : vector<4x16xbf16>, vector<16x32xbf16>, vector<4x32xf32> -> vector<4x32xf32>
    %c0_18 = arith.constant 0 : index
    %c0_19 = arith.constant 0 : index
    %33 = vector.load %arg7[%c0_18, %c0_19] : memref<1x32xf32, #tpu.memory_space<vmem>>, vector<1x32xf32>
    %34 = vector.broadcast %33 : vector<1x32xf32> to vector<4x32xf32>
    %35 = arith.addf %32, %34 : vector<4x32xf32>
    %36 = arith.extf %1 : vector<4x32xbf16> to vector<4x32xf32>
    %37 = arith.addf %35, %36 : vector<4x32xf32>
    %cst_20 = arith.constant 0.000000e+00 : f32
    %38 = vector.broadcast %cst_20 : f32 to vector<4x32xf32>
    %39 = arith.maximumf %37, %38 : vector<4x32xf32>
    %40 = arith.truncf %39 : vector<4x32xf32> to vector<4x32xbf16>
    %c0_21 = arith.constant 0 : index
    %c0_22 = arith.constant 0 : index
    %c0_23 = arith.constant 0 : index
    %41 = vector.load %arg8[%c0_21, %c0_22, %c0_23] : memref<1x4x32xbf16, #tpu.memory_space<vmem>>, vector<1x4x32xbf16>
    %42 = vector.shape_cast %41 : vector<1x4x32xbf16> to vector<4x32xbf16>
    %43 = vector.shape_cast %40 : vector<4x32xbf16> to vector<1x4x32xbf16>
    tpu.vector_store %arg8[%c0_21, %c0_22, %c0_23], %43 {strides = array<i32>} : memref<1x4x32xbf16, #tpu.memory_space<vmem>>, vector<1x4x32xbf16>,
    return
  }
  func.func @transform_0(%arg0: i32) -> (i32, i32, i32) {
    %c0_i32 = arith.constant 0 : i32
    %c0_i32_0 = arith.constant 0 : i32
    %c0_i32_1 = arith.constant 0 : i32
    return %arg0, %c0_i32, %c0_i32_0 : i32, i32, i32
  }
  func.func @transform_1(%arg0: i32) -> (i32, i32) {
    %c0_i32 = arith.constant 0 : i32
    %c0_i32_0 = arith.constant 0 : i32
    %c0_i32_1 = arith.constant 0 : i32
    return %c0_i32, %c0_i32_0 : i32, i32
  }
  func.func @transform_2(%arg0: i32) -> (i32, i32) {
    %c0_i32 = arith.constant 0 : i32
    %c0_i32_0 = arith.constant 0 : i32
    %c0_i32_1 = arith.constant 0 : i32
    return %c0_i32, %c0_i32_0 : i32, i32
  }
  func.func @transform_3(%arg0: i32) -> (i32, i32) {
    %c0_i32 = arith.constant 0 : i32
    %c0_i32_0 = arith.constant 0 : i32
    %c0_i32_1 = arith.constant 0 : i32
    return %c0_i32, %c0_i32_0 : i32, i32
  }
  func.func @transform_4(%arg0: i32) -> (i32, i32) {
    %c0_i32 = arith.constant 0 : i32
    %c0_i32_0 = arith.constant 0 : i32
    %c0_i32_1 = arith.constant 0 : i32
    return %c0_i32, %c0_i32_0 : i32, i32
  }
  func.func @transform_5(%arg0: i32) -> (i32, i32) {
    %c0_i32 = arith.constant 0 : i32
    %c0_i32_0 = arith.constant 0 : i32
    %c0_i32_1 = arith.constant 0 : i32
    return %c0_i32, %c0_i32_0 : i32, i32
  }
  func.func @transform_6(%arg0: i32) -> (i32, i32) {
    %c0_i32 = arith.constant 0 : i32
    %c0_i32_0 = arith.constant 0 : i32
    %c0_i32_1 = arith.constant 0 : i32
    return %c0_i32, %c0_i32_0 : i32, i32
  }
  func.func @transform_7(%arg0: i32) -> (i32, i32, i32) {
    %c0_i32 = arith.constant 0 : i32
    %c0_i32_0 = arith.constant 0 : i32
    %c0_i32_1 = arith.constant 0 : i32
    return %arg0, %c0_i32, %c0_i32_0 : i32, i32, i32
  }
}

module attributes {stable_mosaic.version = 11 : i64} {
  func.func @_dw_kernel(%arg0: i32, %arg1: i32, %arg2: memref<1x3x3x32xbf16, #tpu.memory_space<vmem>>, %arg3: memref<1x3x3x32xbf16, #tpu.memory_space<vmem>>, %arg4: memref<1x3x3x32xbf16, #tpu.memory_space<vmem>>, %arg5: memref<1x3x3x32xbf16, #tpu.memory_space<vmem>>, %arg6: memref<9x1x32xf32, #tpu.memory_space<vmem>>, %arg7: memref<1x32xf32, #tpu.memory_space<vmem>>, %arg8: memref<1x2x2x32xbf16, #tpu.memory_space<vmem>>) attributes {dimension_semantics = [#tpu.dimension_semantics<parallel>, #tpu.dimension_semantics<parallel>], iteration_bounds = array<i64: 2, 1>, scalar_prefetch = 0 : i64, scratch_operands = 0 : i64, tpu.core_type = #tpu.core_type<tc>, window_params = [{transform_indices = @transform_0, window_bounds = array<i64: 1, 3, 3, 32>}, {transform_indices = @transform_1, window_bounds = array<i64: 1, 3, 3, 32>}, {transform_indices = @transform_2, window_bounds = array<i64: 1, 3, 3, 32>}, {transform_indices = @transform_3, window_bounds = array<i64: 1, 3, 3, 32>}, {transform_indices = @transform_4, window_bounds = array<i64: 9, 1, 32>}, {transform_indices = @transform_5, window_bounds = array<i64: 1, 32>}, {transform_indices = @transform_6, window_bounds = array<i64: 1, 2, 2, 32>}]} {
    %c0 = arith.constant 0 : index
    %c0_0 = arith.constant 0 : index
    %c0_1 = arith.constant 0 : index
    %c0_2 = arith.constant 0 : index
    %0 = vector.load %arg2[%c0, %c0_0, %c0_1, %c0_2] : memref<1x3x3x32xbf16, #tpu.memory_space<vmem>>, vector<1x2x2x32xbf16>
    %1 = vector.shape_cast %0 : vector<1x2x2x32xbf16> to vector<2x2x32xbf16>
    %2 = arith.extf %1 : vector<2x2x32xbf16> to vector<2x2x32xf32>
    %c0_3 = arith.constant 0 : index
    %c0_4 = arith.constant 0 : index
    %c0_5 = arith.constant 0 : index
    %3 = vector.load %arg6[%c0_3, %c0_4, %c0_5] : memref<9x1x32xf32, #tpu.memory_space<vmem>>, vector<1x1x32xf32>
    %4 = vector.shape_cast %3 : vector<1x1x32xf32> to vector<1x32xf32>
    %5 = vector.shape_cast %4 : vector<1x32xf32> to vector<1x1x32xf32>
    %6 = vector.broadcast %5 : vector<1x1x32xf32> to vector<2x2x32xf32>
    %7 = arith.mulf %2, %6 : vector<2x2x32xf32>
    %c0_6 = arith.constant 0 : index
    %c0_7 = arith.constant 0 : index
    %c0_8 = arith.constant 0 : index
    %c0_9 = arith.constant 0 : index
    %8 = vector.load %arg3[%c0_6, %c0_7, %c0_8, %c0_9] : memref<1x3x3x32xbf16, #tpu.memory_space<vmem>>, vector<1x2x2x32xbf16>
    %9 = vector.shape_cast %8 : vector<1x2x2x32xbf16> to vector<2x2x32xbf16>
    %10 = arith.extf %9 : vector<2x2x32xbf16> to vector<2x2x32xf32>
    %c1 = arith.constant 1 : index
    %c0_10 = arith.constant 0 : index
    %c0_11 = arith.constant 0 : index
    %11 = vector.load %arg6[%c1, %c0_10, %c0_11] : memref<9x1x32xf32, #tpu.memory_space<vmem>>, vector<1x1x32xf32>
    %12 = vector.shape_cast %11 : vector<1x1x32xf32> to vector<1x32xf32>
    %13 = vector.shape_cast %12 : vector<1x32xf32> to vector<1x1x32xf32>
    %14 = vector.broadcast %13 : vector<1x1x32xf32> to vector<2x2x32xf32>
    %15 = arith.mulf %10, %14 : vector<2x2x32xf32>
    %16 = arith.addf %7, %15 : vector<2x2x32xf32>
    %c0_12 = arith.constant 0 : index
    %c0_13 = arith.constant 0 : index
    %c1_14 = arith.constant 1 : index
    %c0_15 = arith.constant 0 : index
    %17 = vector.load %arg2[%c0_12, %c0_13, %c1_14, %c0_15] : memref<1x3x3x32xbf16, #tpu.memory_space<vmem>>, vector<1x2x2x32xbf16>
    %18 = vector.shape_cast %17 : vector<1x2x2x32xbf16> to vector<2x2x32xbf16>
    %19 = arith.extf %18 : vector<2x2x32xbf16> to vector<2x2x32xf32>
    %c2 = arith.constant 2 : index
    %c0_16 = arith.constant 0 : index
    %c0_17 = arith.constant 0 : index
    %20 = vector.load %arg6[%c2, %c0_16, %c0_17] : memref<9x1x32xf32, #tpu.memory_space<vmem>>, vector<1x1x32xf32>
    %21 = vector.shape_cast %20 : vector<1x1x32xf32> to vector<1x32xf32>
    %22 = vector.shape_cast %21 : vector<1x32xf32> to vector<1x1x32xf32>
    %23 = vector.broadcast %22 : vector<1x1x32xf32> to vector<2x2x32xf32>
    %24 = arith.mulf %19, %23 : vector<2x2x32xf32>
    %25 = arith.addf %16, %24 : vector<2x2x32xf32>
    %c0_18 = arith.constant 0 : index
    %c0_19 = arith.constant 0 : index
    %c0_20 = arith.constant 0 : index
    %c0_21 = arith.constant 0 : index
    %26 = vector.load %arg4[%c0_18, %c0_19, %c0_20, %c0_21] : memref<1x3x3x32xbf16, #tpu.memory_space<vmem>>, vector<1x2x2x32xbf16>
    %27 = vector.shape_cast %26 : vector<1x2x2x32xbf16> to vector<2x2x32xbf16>
    %28 = arith.extf %27 : vector<2x2x32xbf16> to vector<2x2x32xf32>
    %c3 = arith.constant 3 : index
    %c0_22 = arith.constant 0 : index
    %c0_23 = arith.constant 0 : index
    %29 = vector.load %arg6[%c3, %c0_22, %c0_23] : memref<9x1x32xf32, #tpu.memory_space<vmem>>, vector<1x1x32xf32>
    %30 = vector.shape_cast %29 : vector<1x1x32xf32> to vector<1x32xf32>
    %31 = vector.shape_cast %30 : vector<1x32xf32> to vector<1x1x32xf32>
    %32 = vector.broadcast %31 : vector<1x1x32xf32> to vector<2x2x32xf32>
    %33 = arith.mulf %28, %32 : vector<2x2x32xf32>
    %34 = arith.addf %25, %33 : vector<2x2x32xf32>
    %c0_24 = arith.constant 0 : index
    %c0_25 = arith.constant 0 : index
    %c0_26 = arith.constant 0 : index
    %c0_27 = arith.constant 0 : index
    %35 = vector.load %arg5[%c0_24, %c0_25, %c0_26, %c0_27] : memref<1x3x3x32xbf16, #tpu.memory_space<vmem>>, vector<1x2x2x32xbf16>
    %36 = vector.shape_cast %35 : vector<1x2x2x32xbf16> to vector<2x2x32xbf16>
    %37 = arith.extf %36 : vector<2x2x32xbf16> to vector<2x2x32xf32>
    %c4 = arith.constant 4 : index
    %c0_28 = arith.constant 0 : index
    %c0_29 = arith.constant 0 : index
    %38 = vector.load %arg6[%c4, %c0_28, %c0_29] : memref<9x1x32xf32, #tpu.memory_space<vmem>>, vector<1x1x32xf32>
    %39 = vector.shape_cast %38 : vector<1x1x32xf32> to vector<1x32xf32>
    %40 = vector.shape_cast %39 : vector<1x32xf32> to vector<1x1x32xf32>
    %41 = vector.broadcast %40 : vector<1x1x32xf32> to vector<2x2x32xf32>
    %42 = arith.mulf %37, %41 : vector<2x2x32xf32>
    %43 = arith.addf %34, %42 : vector<2x2x32xf32>
    %c0_30 = arith.constant 0 : index
    %c0_31 = arith.constant 0 : index
    %c1_32 = arith.constant 1 : index
    %c0_33 = arith.constant 0 : index
    %44 = vector.load %arg4[%c0_30, %c0_31, %c1_32, %c0_33] : memref<1x3x3x32xbf16, #tpu.memory_space<vmem>>, vector<1x2x2x32xbf16>
    %45 = vector.shape_cast %44 : vector<1x2x2x32xbf16> to vector<2x2x32xbf16>
    %46 = arith.extf %45 : vector<2x2x32xbf16> to vector<2x2x32xf32>
    %c5 = arith.constant 5 : index
    %c0_34 = arith.constant 0 : index
    %c0_35 = arith.constant 0 : index
    %47 = vector.load %arg6[%c5, %c0_34, %c0_35] : memref<9x1x32xf32, #tpu.memory_space<vmem>>, vector<1x1x32xf32>
    %48 = vector.shape_cast %47 : vector<1x1x32xf32> to vector<1x32xf32>
    %49 = vector.shape_cast %48 : vector<1x32xf32> to vector<1x1x32xf32>
    %50 = vector.broadcast %49 : vector<1x1x32xf32> to vector<2x2x32xf32>
    %51 = arith.mulf %46, %50 : vector<2x2x32xf32>
    %52 = arith.addf %43, %51 : vector<2x2x32xf32>
    %c0_36 = arith.constant 0 : index
    %c1_37 = arith.constant 1 : index
    %c0_38 = arith.constant 0 : index
    %c0_39 = arith.constant 0 : index
    %53 = vector.load %arg2[%c0_36, %c1_37, %c0_38, %c0_39] : memref<1x3x3x32xbf16, #tpu.memory_space<vmem>>, vector<1x2x2x32xbf16>
    %54 = vector.shape_cast %53 : vector<1x2x2x32xbf16> to vector<2x2x32xbf16>
    %55 = arith.extf %54 : vector<2x2x32xbf16> to vector<2x2x32xf32>
    %c6 = arith.constant 6 : index
    %c0_40 = arith.constant 0 : index
    %c0_41 = arith.constant 0 : index
    %56 = vector.load %arg6[%c6, %c0_40, %c0_41] : memref<9x1x32xf32, #tpu.memory_space<vmem>>, vector<1x1x32xf32>
    %57 = vector.shape_cast %56 : vector<1x1x32xf32> to vector<1x32xf32>
    %58 = vector.shape_cast %57 : vector<1x32xf32> to vector<1x1x32xf32>
    %59 = vector.broadcast %58 : vector<1x1x32xf32> to vector<2x2x32xf32>
    %60 = arith.mulf %55, %59 : vector<2x2x32xf32>
    %61 = arith.addf %52, %60 : vector<2x2x32xf32>
    %c0_42 = arith.constant 0 : index
    %c1_43 = arith.constant 1 : index
    %c0_44 = arith.constant 0 : index
    %c0_45 = arith.constant 0 : index
    %62 = vector.load %arg3[%c0_42, %c1_43, %c0_44, %c0_45] : memref<1x3x3x32xbf16, #tpu.memory_space<vmem>>, vector<1x2x2x32xbf16>
    %63 = vector.shape_cast %62 : vector<1x2x2x32xbf16> to vector<2x2x32xbf16>
    %64 = arith.extf %63 : vector<2x2x32xbf16> to vector<2x2x32xf32>
    %c7 = arith.constant 7 : index
    %c0_46 = arith.constant 0 : index
    %c0_47 = arith.constant 0 : index
    %65 = vector.load %arg6[%c7, %c0_46, %c0_47] : memref<9x1x32xf32, #tpu.memory_space<vmem>>, vector<1x1x32xf32>
    %66 = vector.shape_cast %65 : vector<1x1x32xf32> to vector<1x32xf32>
    %67 = vector.shape_cast %66 : vector<1x32xf32> to vector<1x1x32xf32>
    %68 = vector.broadcast %67 : vector<1x1x32xf32> to vector<2x2x32xf32>
    %69 = arith.mulf %64, %68 : vector<2x2x32xf32>
    %70 = arith.addf %61, %69 : vector<2x2x32xf32>
    %c0_48 = arith.constant 0 : index
    %c1_49 = arith.constant 1 : index
    %c1_50 = arith.constant 1 : index
    %c0_51 = arith.constant 0 : index
    %71 = vector.load %arg2[%c0_48, %c1_49, %c1_50, %c0_51] : memref<1x3x3x32xbf16, #tpu.memory_space<vmem>>, vector<1x2x2x32xbf16>
    %72 = vector.shape_cast %71 : vector<1x2x2x32xbf16> to vector<2x2x32xbf16>
    %73 = arith.extf %72 : vector<2x2x32xbf16> to vector<2x2x32xf32>
    %c8 = arith.constant 8 : index
    %c0_52 = arith.constant 0 : index
    %c0_53 = arith.constant 0 : index
    %74 = vector.load %arg6[%c8, %c0_52, %c0_53] : memref<9x1x32xf32, #tpu.memory_space<vmem>>, vector<1x1x32xf32>
    %75 = vector.shape_cast %74 : vector<1x1x32xf32> to vector<1x32xf32>
    %76 = vector.shape_cast %75 : vector<1x32xf32> to vector<1x1x32xf32>
    %77 = vector.broadcast %76 : vector<1x1x32xf32> to vector<2x2x32xf32>
    %78 = arith.mulf %73, %77 : vector<2x2x32xf32>
    %79 = arith.addf %70, %78 : vector<2x2x32xf32>
    %c0_54 = arith.constant 0 : index
    %c0_55 = arith.constant 0 : index
    %80 = vector.load %arg7[%c0_54, %c0_55] : memref<1x32xf32, #tpu.memory_space<vmem>>, vector<1x32xf32>
    %81 = vector.shape_cast %80 : vector<1x32xf32> to vector<1x1x32xf32>
    %82 = vector.broadcast %81 : vector<1x1x32xf32> to vector<2x2x32xf32>
    %83 = arith.addf %79, %82 : vector<2x2x32xf32>
    %84 = arith.truncf %83 : vector<2x2x32xf32> to vector<2x2x32xbf16>
    %c0_56 = arith.constant 0 : index
    %c0_57 = arith.constant 0 : index
    %c0_58 = arith.constant 0 : index
    %c0_59 = arith.constant 0 : index
    %85 = vector.load %arg8[%c0_56, %c0_57, %c0_58, %c0_59] : memref<1x2x2x32xbf16, #tpu.memory_space<vmem>>, vector<1x2x2x32xbf16>
    %86 = vector.shape_cast %85 : vector<1x2x2x32xbf16> to vector<2x2x32xbf16>
    %87 = vector.shape_cast %84 : vector<2x2x32xbf16> to vector<1x2x2x32xbf16>
    tpu.vector_store %arg8[%c0_56, %c0_57, %c0_58, %c0_59], %87 {strides = array<i32>} : memref<1x2x2x32xbf16, #tpu.memory_space<vmem>>, vector<1x2x2x32xbf16>,
    return
  }
  func.func @transform_0(%arg0: i32, %arg1: i32) -> (i32, i32, i32, i32) {
    %c0_i32 = arith.constant 0 : i32
    %c0_i32_0 = arith.constant 0 : i32
    %c0_i32_1 = arith.constant 0 : i32
    return %arg0, %c0_i32, %c0_i32_0, %arg1 : i32, i32, i32, i32
  }
  func.func @transform_1(%arg0: i32, %arg1: i32) -> (i32, i32, i32, i32) {
    %c0_i32 = arith.constant 0 : i32
    %c0_i32_0 = arith.constant 0 : i32
    %c0_i32_1 = arith.constant 0 : i32
    return %arg0, %c0_i32, %c0_i32_0, %arg1 : i32, i32, i32, i32
  }
  func.func @transform_2(%arg0: i32, %arg1: i32) -> (i32, i32, i32, i32) {
    %c0_i32 = arith.constant 0 : i32
    %c0_i32_0 = arith.constant 0 : i32
    %c0_i32_1 = arith.constant 0 : i32
    return %arg0, %c0_i32, %c0_i32_0, %arg1 : i32, i32, i32, i32
  }
  func.func @transform_3(%arg0: i32, %arg1: i32) -> (i32, i32, i32, i32) {
    %c0_i32 = arith.constant 0 : i32
    %c0_i32_0 = arith.constant 0 : i32
    %c0_i32_1 = arith.constant 0 : i32
    return %arg0, %c0_i32, %c0_i32_0, %arg1 : i32, i32, i32, i32
  }
  func.func @transform_4(%arg0: i32, %arg1: i32) -> (i32, i32, i32) {
    %c0_i32 = arith.constant 0 : i32
    %c0_i32_0 = arith.constant 0 : i32
    %c0_i32_1 = arith.constant 0 : i32
    return %c0_i32, %c0_i32_0, %arg1 : i32, i32, i32
  }
  func.func @transform_5(%arg0: i32, %arg1: i32) -> (i32, i32) {
    %c0_i32 = arith.constant 0 : i32
    %c0_i32_0 = arith.constant 0 : i32
    return %c0_i32, %arg1 : i32, i32
  }
  func.func @transform_6(%arg0: i32, %arg1: i32) -> (i32, i32, i32, i32) {
    %c0_i32 = arith.constant 0 : i32
    %c0_i32_0 = arith.constant 0 : i32
    %c0_i32_1 = arith.constant 0 : i32
    return %arg0, %c0_i32, %c0_i32_0, %arg1 : i32, i32, i32, i32
  }
}

module attributes {stable_mosaic.version = 11 : i64} {
  func.func @_up_fuse_kernel(%arg0: i32, %arg1: i32, %arg2: memref<16x2xbf16, #tpu.memory_space<vmem>>, %arg3: memref<1x2x512xbf16, #tpu.memory_space<vmem>>, %arg4: memref<1x16x512xbf16, #tpu.memory_space<vmem>>, %arg5: memref<1x16x512xbf16, #tpu.memory_space<vmem>>) attributes {dimension_semantics = [#tpu.dimension_semantics<parallel>, #tpu.dimension_semantics<parallel>], iteration_bounds = array<i64: 2, 1>, scalar_prefetch = 0 : i64, scratch_operands = 0 : i64, tpu.core_type = #tpu.core_type<tc>, window_params = [{transform_indices = @transform_0, window_bounds = array<i64: 16, 2>}, {transform_indices = @transform_1, window_bounds = array<i64: 1, 2, 512>}, {transform_indices = @transform_2, window_bounds = array<i64: 1, 16, 512>}, {transform_indices = @transform_3, window_bounds = array<i64: 1, 16, 512>}]} {
    %c0 = arith.constant 0 : index
    %c0_0 = arith.constant 0 : index
    %0 = vector.load %arg2[%c0, %c0_0] : memref<16x2xbf16, #tpu.memory_space<vmem>>, vector<16x2xbf16>
    %c0_1 = arith.constant 0 : index
    %c0_2 = arith.constant 0 : index
    %c0_3 = arith.constant 0 : index
    %1 = vector.load %arg3[%c0_1, %c0_2, %c0_3] : memref<1x2x512xbf16, #tpu.memory_space<vmem>>, vector<1x2x512xbf16>
    %2 = vector.shape_cast %1 : vector<1x2x512xbf16> to vector<2x512xbf16>
    %cst = arith.constant dense<0.000000e+00> : vector<16x512xf32>
    %3 = tpu.matmul %0, %2, %cst {dimension_numbers = #tpu.dot_dimension_numbers<[1], [0], [0], [1], [0, 0, 1, 1], [], []>} : vector<16x2xbf16>, vector<2x512xbf16>, vector<16x512xf32> -> vector<16x512xf32>
    %c0_4 = arith.constant 0 : index
    %c0_5 = arith.constant 0 : index
    %c0_6 = arith.constant 0 : index
    %4 = vector.load %arg4[%c0_4, %c0_5, %c0_6] : memref<1x16x512xbf16, #tpu.memory_space<vmem>>, vector<1x16x512xbf16>
    %5 = vector.shape_cast %4 : vector<1x16x512xbf16> to vector<16x512xbf16>
    %6 = arith.extf %5 : vector<16x512xbf16> to vector<16x512xf32>
    %7 = arith.mulf %6, %3 : vector<16x512xf32>
    %8 = arith.addf %7, %6 : vector<16x512xf32>
    %9 = arith.truncf %8 : vector<16x512xf32> to vector<16x512xbf16>
    %c0_7 = arith.constant 0 : index
    %c0_8 = arith.constant 0 : index
    %c0_9 = arith.constant 0 : index
    %10 = vector.load %arg5[%c0_7, %c0_8, %c0_9] : memref<1x16x512xbf16, #tpu.memory_space<vmem>>, vector<1x16x512xbf16>
    %11 = vector.shape_cast %10 : vector<1x16x512xbf16> to vector<16x512xbf16>
    %12 = vector.shape_cast %9 : vector<16x512xbf16> to vector<1x16x512xbf16>
    tpu.vector_store %arg5[%c0_7, %c0_8, %c0_9], %12 {strides = array<i32>} : memref<1x16x512xbf16, #tpu.memory_space<vmem>>, vector<1x16x512xbf16>,
    return
  }
  func.func @transform_0(%arg0: i32, %arg1: i32) -> (i32, i32) {
    %c0_i32 = arith.constant 0 : i32
    %c0_i32_0 = arith.constant 0 : i32
    return %arg1, %c0_i32 : i32, i32
  }
  func.func @transform_1(%arg0: i32, %arg1: i32) -> (i32, i32, i32) {
    %c0_i32 = arith.constant 0 : i32
    %c0_i32_0 = arith.constant 0 : i32
    %c0_i32_1 = arith.constant 0 : i32
    return %arg0, %c0_i32, %c0_i32_0 : i32, i32, i32
  }
  func.func @transform_2(%arg0: i32, %arg1: i32) -> (i32, i32, i32) {
    %c0_i32 = arith.constant 0 : i32
    %c0_i32_0 = arith.constant 0 : i32
    return %arg0, %arg1, %c0_i32 : i32, i32, i32
  }
  func.func @transform_3(%arg0: i32, %arg1: i32) -> (i32, i32, i32) {
    %c0_i32 = arith.constant 0 : i32
    %c0_i32_0 = arith.constant 0 : i32
    return %arg0, %arg1, %c0_i32 : i32, i32, i32
  }
}

module attributes {stable_mosaic.version = 11 : i64} {
  func.func @_fgcn_map_kernel(%arg0: i32, %arg1: i32, %arg2: memref<1x256x32xbf16, #tpu.memory_space<vmem>>, %arg3: memref<1x256x32xbf16, #tpu.memory_space<vmem>>, %arg4: memref<1x8x16xf32, #tpu.memory_space<vmem>>, %arg5: memref<32x8xbf16, #tpu.memory_space<vmem>>, %arg6: memref<1x8xf32, #tpu.memory_space<vmem>>, %arg7: memref<16x32xbf16, #tpu.memory_space<vmem>>, %arg8: memref<1x32xf32, #tpu.memory_space<vmem>>, %arg9: memref<32x32xbf16, #tpu.memory_space<vmem>>, %arg10: memref<32x32xbf16, #tpu.memory_space<vmem>>, %arg11: memref<1x32xf32, #tpu.memory_space<vmem>>, %arg12: memref<1x32x256xf32, #tpu.memory_space<vmem>>) attributes {dimension_semantics = [#tpu.dimension_semantics<parallel>, #tpu.dimension_semantics<parallel>], iteration_bounds = array<i64: 2, 1>, scalar_prefetch = 0 : i64, scratch_operands = 0 : i64, tpu.core_type = #tpu.core_type<tc>, window_params = [{transform_indices = @transform_0, window_bounds = array<i64: 1, 256, 32>}, {transform_indices = @transform_1, window_bounds = array<i64: 1, 256, 32>}, {transform_indices = @transform_2, window_bounds = array<i64: 1, 8, 16>}, {pipeline_mode = #tpu.pipeline_mode<synchronous>, transform_indices = @transform_3, window_bounds = array<i64: 32, 8>}, {pipeline_mode = #tpu.pipeline_mode<synchronous>, transform_indices = @transform_4, window_bounds = array<i64: 1, 8>}, {pipeline_mode = #tpu.pipeline_mode<synchronous>, transform_indices = @transform_5, window_bounds = array<i64: 16, 32>}, {pipeline_mode = #tpu.pipeline_mode<synchronous>, transform_indices = @transform_6, window_bounds = array<i64: 1, 32>}, {pipeline_mode = #tpu.pipeline_mode<synchronous>, transform_indices = @transform_7, window_bounds = array<i64: 32, 32>}, {pipeline_mode = #tpu.pipeline_mode<synchronous>, transform_indices = @transform_8, window_bounds = array<i64: 32, 32>}, {pipeline_mode = #tpu.pipeline_mode<synchronous>, transform_indices = @transform_9, window_bounds = array<i64: 1, 32>}, {transform_indices = @transform_10, window_bounds = array<i64: 1, 32, 256>}]} {
    %c0 = arith.constant 0 : index
    %c0_0 = arith.constant 0 : index
    %c0_1 = arith.constant 0 : index
    %0 = vector.load %arg2[%c0, %c0_0, %c0_1] : memref<1x256x32xbf16, #tpu.memory_space<vmem>>, vector<1x256x32xbf16>
    %1 = vector.shape_cast %0 : vector<1x256x32xbf16> to vector<256x32xbf16>
    %c0_2 = arith.constant 0 : index
    %c0_3 = arith.constant 0 : index
    %2 = vector.load %arg5[%c0_2, %c0_3] : memref<32x8xbf16, #tpu.memory_space<vmem>>, vector<32x8xbf16>
    %cst = arith.constant dense<0.000000e+00> : vector<256x8xf32>
    %3 = tpu.matmul %1, %2, %cst {dimension_numbers = #tpu.dot_dimension_numbers<[1], [0], [0], [1], [0, 0, 1, 1], [], []>} : vector<256x32xbf16>, vector<32x8xbf16>, vector<256x8xf32> -> vector<256x8xf32>
    %c0_4 = arith.constant 0 : index
    %c0_5 = arith.constant 0 : index
    %4 = vector.load %arg6[%c0_4, %c0_5] : memref<1x8xf32, #tpu.memory_space<vmem>>, vector<1x8xf32>
    %5 = vector.broadcast %4 : vector<1x8xf32> to vector<256x8xf32>
    %6 = arith.addf %3, %5 : vector<256x8xf32>
    %7 = arith.truncf %6 : vector<256x8xf32> to vector<256x8xbf16>
    %c0_6 = arith.constant 0 : index
    %c0_7 = arith.constant 0 : index
    %c0_8 = arith.constant 0 : index
    %8 = vector.load %arg4[%c0_6, %c0_7, %c0_8] : memref<1x8x16xf32, #tpu.memory_space<vmem>>, vector<1x8x16xf32>
    %9 = vector.shape_cast %8 : vector<1x8x16xf32> to vector<8x16xf32>
    %10 = arith.truncf %9 : vector<8x16xf32> to vector<8x16xbf16>
    %cst_9 = arith.constant dense<0.000000e+00> : vector<256x16xf32>
    %11 = tpu.matmul %7, %10, %cst_9 {dimension_numbers = #tpu.dot_dimension_numbers<[1], [0], [0], [1], [0, 0, 1, 1], [], []>} : vector<256x8xbf16>, vector<8x16xbf16>, vector<256x16xf32> -> vector<256x16xf32>
    %12 = arith.truncf %11 : vector<256x16xf32> to vector<256x16xbf16>
    %c0_10 = arith.constant 0 : index
    %c0_11 = arith.constant 0 : index
    %13 = vector.load %arg7[%c0_10, %c0_11] : memref<16x32xbf16, #tpu.memory_space<vmem>>, vector<16x32xbf16>
    %cst_12 = arith.constant dense<0.000000e+00> : vector<256x32xf32>
    %14 = tpu.matmul %12, %13, %cst_12 {dimension_numbers = #tpu.dot_dimension_numbers<[1], [0], [0], [1], [0, 0, 1, 1], [], []>} : vector<256x16xbf16>, vector<16x32xbf16>, vector<256x32xf32> -> vector<256x32xf32>
    %c0_13 = arith.constant 0 : index
    %c0_14 = arith.constant 0 : index
    %15 = vector.load %arg8[%c0_13, %c0_14] : memref<1x32xf32, #tpu.memory_space<vmem>>, vector<1x32xf32>
    %16 = vector.broadcast %15 : vector<1x32xf32> to vector<256x32xf32>
    %17 = arith.addf %14, %16 : vector<256x32xf32>
    %18 = arith.extf %1 : vector<256x32xbf16> to vector<256x32xf32>
    %19 = arith.addf %18, %17 : vector<256x32xf32>
    %cst_15 = arith.constant 0.000000e+00 : f32
    %20 = vector.broadcast %cst_15 : f32 to vector<256x32xf32>
    %21 = arith.maximumf %19, %20 : vector<256x32xf32>
    %c0_16 = arith.constant 0 : index
    %c0_17 = arith.constant 0 : index
    %c0_18 = arith.constant 0 : index
    %22 = vector.load %arg3[%c0_16, %c0_17, %c0_18] : memref<1x256x32xbf16, #tpu.memory_space<vmem>>, vector<1x256x32xbf16>
    %23 = vector.shape_cast %22 : vector<1x256x32xbf16> to vector<256x32xbf16>
    %c0_19 = arith.constant 0 : index
    %c0_20 = arith.constant 0 : index
    %24 = vector.load %arg9[%c0_19, %c0_20] : memref<32x32xbf16, #tpu.memory_space<vmem>>, vector<32x32xbf16>
    %cst_21 = arith.constant dense<0.000000e+00> : vector<256x32xf32>
    %25 = tpu.matmul %23, %24, %cst_21 {dimension_numbers = #tpu.dot_dimension_numbers<[1], [0], [0], [1], [0, 0, 1, 1], [], []>} : vector<256x32xbf16>, vector<32x32xbf16>, vector<256x32xf32> -> vector<256x32xf32>
    %26 = arith.truncf %21 : vector<256x32xf32> to vector<256x32xbf16>
    %c0_22 = arith.constant 0 : index
    %c0_23 = arith.constant 0 : index
    %27 = vector.load %arg10[%c0_22, %c0_23] : memref<32x32xbf16, #tpu.memory_space<vmem>>, vector<32x32xbf16>
    %cst_24 = arith.constant dense<0.000000e+00> : vector<256x32xf32>
    %28 = tpu.matmul %26, %27, %cst_24 {dimension_numbers = #tpu.dot_dimension_numbers<[1], [0], [0], [1], [0, 0, 1, 1], [], []>} : vector<256x32xbf16>, vector<32x32xbf16>, vector<256x32xf32> -> vector<256x32xf32>
    %29 = arith.addf %25, %28 : vector<256x32xf32>
    %c0_25 = arith.constant 0 : index
    %c0_26 = arith.constant 0 : index
    %30 = vector.load %arg11[%c0_25, %c0_26] : memref<1x32xf32, #tpu.memory_space<vmem>>, vector<1x32xf32>
    %31 = vector.broadcast %30 : vector<1x32xf32> to vector<256x32xf32>
    %32 = arith.addf %29, %31 : vector<256x32xf32>
    %33 = tpu.transpose %32, [1, 0] : vector<256x32xf32> -> vector<32x256xf32>
    %c0_27 = arith.constant 0 : index
    %c0_28 = arith.constant 0 : index
    %c0_29 = arith.constant 0 : index
    %34 = vector.load %arg12[%c0_27, %c0_28, %c0_29] : memref<1x32x256xf32, #tpu.memory_space<vmem>>, vector<1x32x256xf32>
    %35 = vector.shape_cast %34 : vector<1x32x256xf32> to vector<32x256xf32>
    %36 = vector.shape_cast %33 : vector<32x256xf32> to vector<1x32x256xf32>
    tpu.vector_store %arg12[%c0_27, %c0_28, %c0_29], %36 {strides = array<i32>} : memref<1x32x256xf32, #tpu.memory_space<vmem>>, vector<1x32x256xf32>,
    return
  }
  func.func @transform_0(%arg0: i32, %arg1: i32) -> (i32, i32, i32) {
    %c0_i32 = arith.constant 0 : i32
    %c0_i32_0 = arith.constant 0 : i32
    return %arg0, %arg1, %c0_i32 : i32, i32, i32
  }
  func.func @transform_1(%arg0: i32, %arg1: i32) -> (i32, i32, i32) {
    %c0_i32 = arith.constant 0 : i32
    %c0_i32_0 = arith.constant 0 : i32
    return %arg0, %arg1, %c0_i32 : i32, i32, i32
  }
  func.func @transform_2(%arg0: i32, %arg1: i32) -> (i32, i32, i32) {
    %c0_i32 = arith.constant 0 : i32
    %c0_i32_0 = arith.constant 0 : i32
    %c0_i32_1 = arith.constant 0 : i32
    return %arg0, %c0_i32, %c0_i32_0 : i32, i32, i32
  }
  func.func @transform_3(%arg0: i32, %arg1: i32) -> (i32, i32) {
    %c0_i32 = arith.constant 0 : i32
    %c0_i32_0 = arith.constant 0 : i32
    %c0_i32_1 = arith.constant 0 : i32
    return %c0_i32, %c0_i32_0 : i32, i32
  }
  func.func @transform_4(%arg0: i32, %arg1: i32) -> (i32, i32) {
    %c0_i32 = arith.constant 0 : i32
    %c0_i32_0 = arith.constant 0 : i32
    %c0_i32_1 = arith.constant 0 : i32
    return %c0_i32, %c0_i32_0 : i32, i32
  }
  func.func @transform_5(%arg0: i32, %arg1: i32) -> (i32, i32) {
    %c0_i32 = arith.constant 0 : i32
    %c0_i32_0 = arith.constant 0 : i32
    %c0_i32_1 = arith.constant 0 : i32
    return %c0_i32, %c0_i32_0 : i32, i32
  }
  func.func @transform_6(%arg0: i32, %arg1: i32) -> (i32, i32) {
    %c0_i32 = arith.constant 0 : i32
    %c0_i32_0 = arith.constant 0 : i32
    %c0_i32_1 = arith.constant 0 : i32
    return %c0_i32, %c0_i32_0 : i32, i32
  }
  func.func @transform_7(%arg0: i32, %arg1: i32) -> (i32, i32) {
    %c0_i32 = arith.constant 0 : i32
    %c0_i32_0 = arith.constant 0 : i32
    %c0_i32_1 = arith.constant 0 : i32
    return %c0_i32, %c0_i32_0 : i32, i32
  }
  func.func @transform_8(%arg0: i32, %arg1: i32) -> (i32, i32) {
    %c0_i32 = arith.constant 0 : i32
    %c0_i32_0 = arith.constant 0 : i32
    %c0_i32_1 = arith.constant 0 : i32
    return %c0_i32, %c0_i32_0 : i32, i32
  }
  func.func @transform_9(%arg0: i32, %arg1: i32) -> (i32, i32) {
    %c0_i32 = arith.constant 0 : i32
    %c0_i32_0 = arith.constant 0 : i32
    %c0_i32_1 = arith.constant 0 : i32
    return %c0_i32, %c0_i32_0 : i32, i32
  }
  func.func @transform_10(%arg0: i32, %arg1: i32) -> (i32, i32, i32) {
    %c0_i32 = arith.constant 0 : i32
    %c0_i32_0 = arith.constant 0 : i32
    return %arg0, %c0_i32, %arg1 : i32, i32, i32
  }
}

module attributes {stable_mosaic.version = 11 : i64} {
  func.func @_fgcn_reduce_kernel(%arg0: i32, %arg1: i32, %arg2: memref<1x256x32xbf16, #tpu.memory_space<vmem>>, %arg3: memref<32x24xbf16, #tpu.memory_space<vmem>>, %arg4: memref<1x24xf32, #tpu.memory_space<vmem>>, %arg5: memref<8x8xbf16, #tpu.memory_space<vmem>>, %arg6: memref<1x8xf32, #tpu.memory_space<vmem>>, %arg7: memref<16x16xbf16, #tpu.memory_space<vmem>>, %arg8: memref<1x16xf32, #tpu.memory_space<vmem>>, %arg9: memref<1x8x16xf32, #tpu.memory_space<vmem>>, %arg10: memref<16x8xf32, #tpu.memory_space<vmem>>) attributes {dimension_semantics = [#tpu.dimension_semantics<parallel>, #tpu.dimension_semantics<arbitrary>], iteration_bounds = array<i64: 2, 1>, scalar_prefetch = 0 : i64, scratch_operands = 1 : i64, tpu.core_type = #tpu.core_type<tc>, window_params = [{transform_indices = @transform_0, window_bounds = array<i64: 1, 256, 32>}, {pipeline_mode = #tpu.pipeline_mode<synchronous>, transform_indices = @transform_1, window_bounds = array<i64: 32, 24>}, {pipeline_mode = #tpu.pipeline_mode<synchronous>, transform_indices = @transform_2, window_bounds = array<i64: 1, 24>}, {pipeline_mode = #tpu.pipeline_mode<synchronous>, transform_indices = @transform_3, window_bounds = array<i64: 8, 8>}, {pipeline_mode = #tpu.pipeline_mode<synchronous>, transform_indices = @transform_4, window_bounds = array<i64: 1, 8>}, {pipeline_mode = #tpu.pipeline_mode<synchronous>, transform_indices = @transform_5, window_bounds = array<i64: 16, 16>}, {pipeline_mode = #tpu.pipeline_mode<synchronous>, transform_indices = @transform_6, window_bounds = array<i64: 1, 16>}, {transform_indices = @transform_7, window_bounds = array<i64: 1, 8, 16>}]} {
    %c0_i32 = arith.constant 0 : i32
    %0 = arith.cmpi eq, %arg1, %c0_i32 : i32
    %1 = arith.extui %0 : i1 to i32
    %c0_i32_0 = arith.constant 0 : i32
    %2 = arith.cmpi ne, %1, %c0_i32_0 : i32
    scf.if %2 {
      %cst_14 = arith.constant 0.000000e+00 : f32
      %20 = vector.broadcast %cst_14 : f32 to vector<16x8xf32>
      %c0_15 = arith.constant 0 : index
      %c0_16 = arith.constant 0 : index
      %21 = vector.load %arg10[%c0_15, %c0_16] : memref<16x8xf32, #tpu.memory_space<vmem>>, vector<16x8xf32>
      tpu.vector_store %arg10[%c0_15, %c0_16], %20 {strides = array<i32>} : memref<16x8xf32, #tpu.memory_space<vmem>>, vector<16x8xf32>,
    } else {
    }
    %c0 = arith.constant 0 : index
    %c0_1 = arith.constant 0 : index
    %c0_2 = arith.constant 0 : index
    %3 = vector.load %arg2[%c0, %c0_1, %c0_2] : memref<1x256x32xbf16, #tpu.memory_space<vmem>>, vector<1x256x32xbf16>
    %4 = vector.shape_cast %3 : vector<1x256x32xbf16> to vector<256x32xbf16>
    %c0_3 = arith.constant 0 : index
    %c0_4 = arith.constant 0 : index
    %5 = vector.load %arg3[%c0_3, %c0_4] : memref<32x24xbf16, #tpu.memory_space<vmem>>, vector<32x24xbf16>
    %cst = arith.constant dense<0.000000e+00> : vector<256x24xf32>
    %6 = tpu.matmul %4, %5, %cst {dimension_numbers = #tpu.dot_dimension_numbers<[1], [0], [0], [1], [0, 0, 1, 1], [], []>} : vector<256x32xbf16>, vector<32x24xbf16>, vector<256x24xf32> -> vector<256x24xf32>
    %c0_5 = arith.constant 0 : index
    %c0_6 = arith.constant 0 : index
    %7 = vector.load %arg4[%c0_5, %c0_6] : memref<1x24xf32, #tpu.memory_space<vmem>>, vector<1x24xf32>
    %8 = vector.broadcast %7 : vector<1x24xf32> to vector<256x24xf32>
    %9 = arith.addf %6, %8 : vector<256x24xf32>
    %10 = arith.truncf %9 : vector<256x24xf32> to vector<256x24xbf16>
    %11 = vector.extract_strided_slice %10 {offsets = [0, 0], sizes = [256, 16], strides = [1, 1]} : vector<256x24xbf16> to vector<256x16xbf16>
    %12 = vector.extract_strided_slice %10 {offsets = [0, 16], sizes = [256, 8], strides = [1, 1]} : vector<256x24xbf16> to vector<256x8xbf16>
    %c0_7 = arith.constant 0 : index
    %c0_8 = arith.constant 0 : index
    %13 = vector.load %arg10[%c0_7, %c0_8] : memref<16x8xf32, #tpu.memory_space<vmem>>, vector<16x8xf32>
    %cst_9 = arith.constant dense<0.000000e+00> : vector<16x8xf32>
    %14 = tpu.matmul %11, %12, %cst_9 {dimension_numbers = #tpu.dot_dimension_numbers<[0], [0], [1], [1], [0, 1, 1, 1], [], []>} : vector<256x16xbf16>, vector<256x8xbf16>, vector<16x8xf32> -> vector<16x8xf32>
    %15 = arith.addf %13, %14 : vector<16x8xf32>
    %c0_10 = arith.constant 0 : index
    %c0_11 = arith.constant 0 : index
    %16 = vector.load %arg10[%c0_10, %c0_11] : memref<16x8xf32, #tpu.memory_space<vmem>>, vector<16x8xf32>
    tpu.vector_store %arg10[%c0_10, %c0_11], %15 {strides = array<i32>} : memref<16x8xf32, #tpu.memory_space<vmem>>, vector<16x8xf32>,
    %c0_i32_12 = arith.constant 0 : i32
    %17 = arith.cmpi eq, %arg1, %c0_i32_12 : i32
    %18 = arith.extui %17 : i1 to i32
    %c0_i32_13 = arith.constant 0 : i32
    %19 = arith.cmpi ne, %18, %c0_i32_13 : i32
    scf.if %19 {
      %c0_14 = arith.constant 0 : index
      %c0_15 = arith.constant 0 : index
      %20 = vector.load %arg10[%c0_14, %c0_15] : memref<16x8xf32, #tpu.memory_space<vmem>>, vector<16x8xf32>
      %21 = arith.truncf %20 : vector<16x8xf32> to vector<16x8xbf16>
      %c0_16 = arith.constant 0 : index
      %c0_17 = arith.constant 0 : index
      %22 = vector.load %arg5[%c0_16, %c0_17] : memref<8x8xbf16, #tpu.memory_space<vmem>>, vector<8x8xbf16>
      %cst_18 = arith.constant dense<0.000000e+00> : vector<16x8xf32>
      %23 = tpu.matmul %21, %22, %cst_18 {dimension_numbers = #tpu.dot_dimension_numbers<[1], [0], [0], [1], [0, 0, 1, 1], [], []>} : vector<16x8xbf16>, vector<8x8xbf16>, vector<16x8xf32> -> vector<16x8xf32>
      %c0_19 = arith.constant 0 : index
      %c0_20 = arith.constant 0 : index
      %24 = vector.load %arg6[%c0_19, %c0_20] : memref<1x8xf32, #tpu.memory_space<vmem>>, vector<1x8xf32>
      %25 = vector.broadcast %24 : vector<1x8xf32> to vector<16x8xf32>
      %26 = arith.addf %23, %25 : vector<16x8xf32>
      %27 = arith.addf %26, %20 : vector<16x8xf32>
      %28 = arith.truncf %27 : vector<16x8xf32> to vector<16x8xbf16>
      %c0_21 = arith.constant 0 : index
      %c0_22 = arith.constant 0 : index
      %29 = vector.load %arg7[%c0_21, %c0_22] : memref<16x16xbf16, #tpu.memory_space<vmem>>, vector<16x16xbf16>
      %cst_23 = arith.constant dense<0.000000e+00> : vector<8x16xf32>
      %30 = tpu.matmul %28, %29, %cst_23 {dimension_numbers = #tpu.dot_dimension_numbers<[0], [0], [1], [1], [0, 1, 1, 1], [], []>} : vector<16x8xbf16>, vector<16x16xbf16>, vector<8x16xf32> -> vector<8x16xf32>
      %c0_24 = arith.constant 0 : index
      %c0_25 = arith.constant 0 : index
      %31 = vector.load %arg8[%c0_24, %c0_25] : memref<1x16xf32, #tpu.memory_space<vmem>>, vector<1x16xf32>
      %32 = vector.broadcast %31 : vector<1x16xf32> to vector<8x16xf32>
      %33 = arith.addf %30, %32 : vector<8x16xf32>
      %c0_26 = arith.constant 0 : index
      %c0_27 = arith.constant 0 : index
      %c0_28 = arith.constant 0 : index
      %34 = vector.load %arg9[%c0_26, %c0_27, %c0_28] : memref<1x8x16xf32, #tpu.memory_space<vmem>>, vector<1x8x16xf32>
      %35 = vector.shape_cast %34 : vector<1x8x16xf32> to vector<8x16xf32>
      %36 = vector.shape_cast %33 : vector<8x16xf32> to vector<1x8x16xf32>
      tpu.vector_store %arg9[%c0_26, %c0_27, %c0_28], %36 {strides = array<i32>} : memref<1x8x16xf32, #tpu.memory_space<vmem>>, vector<1x8x16xf32>,
    } else {
    }
    return
  }
  func.func @transform_0(%arg0: i32, %arg1: i32) -> (i32, i32, i32) {
    %c0_i32 = arith.constant 0 : i32
    %c0_i32_0 = arith.constant 0 : i32
    return %arg0, %arg1, %c0_i32 : i32, i32, i32
  }
  func.func @transform_1(%arg0: i32, %arg1: i32) -> (i32, i32) {
    %c0_i32 = arith.constant 0 : i32
    %c0_i32_0 = arith.constant 0 : i32
    %c0_i32_1 = arith.constant 0 : i32
    return %c0_i32, %c0_i32_0 : i32, i32
  }
  func.func @transform_2(%arg0: i32, %arg1: i32) -> (i32, i32) {
    %c0_i32 = arith.constant 0 : i32
    %c0_i32_0 = arith.constant 0 : i32
    %c0_i32_1 = arith.constant 0 : i32
    return %c0_i32, %c0_i32_0 : i32, i32
  }
  func.func @transform_3(%arg0: i32, %arg1: i32) -> (i32, i32) {
    %c0_i32 = arith.constant 0 : i32
    %c0_i32_0 = arith.constant 0 : i32
    %c0_i32_1 = arith.constant 0 : i32
    return %c0_i32, %c0_i32_0 : i32, i32
  }
  func.func @transform_4(%arg0: i32, %arg1: i32) -> (i32, i32) {
    %c0_i32 = arith.constant 0 : i32
    %c0_i32_0 = arith.constant 0 : i32
    %c0_i32_1 = arith.constant 0 : i32
    return %c0_i32, %c0_i32_0 : i32, i32
  }
  func.func @transform_5(%arg0: i32, %arg1: i32) -> (i32, i32) {
    %c0_i32 = arith.constant 0 : i32
    %c0_i32_0 = arith.constant 0 : i32
    %c0_i32_1 = arith.constant 0 : i32
    return %c0_i32, %c0_i32_0 : i32, i32
  }
  func.func @transform_6(%arg0: i32, %arg1: i32) -> (i32, i32) {
    %c0_i32 = arith.constant 0 : i32
    %c0_i32_0 = arith.constant 0 : i32
    %c0_i32_1 = arith.constant 0 : i32
    return %c0_i32, %c0_i32_0 : i32, i32
  }
  func.func @transform_7(%arg0: i32, %arg1: i32) -> (i32, i32, i32) {
    %c0_i32 = arith.constant 0 : i32
    %c0_i32_0 = arith.constant 0 : i32
    %c0_i32_1 = arith.constant 0 : i32
    return %arg0, %c0_i32, %c0_i32_0 : i32, i32, i32
  }
}

</mosaic_0001>

<bundles_post_ra>
// kernel: dual_gcn_forward.8
= control target key start
LH: loop header
LB: loop body
LE: loop exit
PB: predicated region body
PF: predicated region fallthrough
CT: control target
= control target key end

     0   :  { %s935_s21 = smov 0   ;;  %s937_s22 = smov 0   ;;  %s1128_s0 = inlined_call_operand.vmem [shape: bf16[2,5,5,32], index: 0, kind: input, shape index: {}]   ;;  %s1129_s1 = inlined_call_operand.vmem [shape: bf16[2,5,5,32], index: 1, kind: input, shape index: {}]   ;;  %s1130_s2 = inlined_call_operand.vmem [shape: bf16[2,5,5,32], index: 2, kind: input, shape index: {}]   ;;  %s1131_s3 = inlined_call_operand.vmem [shape: bf16[2,5,5,32], index: 3, kind: input, shape index: {}]   ;;  %s1132_s4 = inlined_call_operand.vmem [shape: f32[9,1,32], index: 4, kind: input, shape index: {}]   ;;  %s1133_s5 = inlined_call_operand.vmem [shape: f32[1,32], index: 5, kind: input, shape index: {}]   ;;  %s1134_s6 = inlined_call_operand.vmem [shape: bf16[2,4,4,32], index: 6, kind: output, shape index: {}]  }
   0x1   :  { %s939_s23 = smov 0  }
   0x2 LB: > { %s28_s24 = sadd.s32 1, %s894_s22  ;;  %p811_p0 = scmp.ge.s32.totalorder %s898_s23, 1  ;;  %s898_s23 = sphi %s939_s23, %s16_s23   ;;  %s894_s22 = sphi %s937_s22, %s1136_s22   ;;  %s890_s21 = sphi %s935_s21, %s1135_s21  }
   0x3   : > { %p30_p1 = scmp.ge.s32.totalorder %s28_s24, 2  ;;  %p292_p2 = scmp.lt.s32.totalorder %s898_s23, 3 }
   0x5   : > { %s1138_s24 = smov (%p30_p1, %s28_s24), 0  ;;  %p293_p3 = pnand %p811_p0, %p292_p2 }
   0x6   : > { %p358_p4 = scmp.lt.s32.totalorder (!%p293_p3), %s890_s21, 1 }
   0x7   : > { %296 = sbr.rel (%p293_p3) target bundleno = 63 (0x3f), region = 44 }
   0xc   : > { %s1140_s21 = smov (!%p358_p4, %s890_s21), 1  ;;  %v959_v0 = vld [vmem:[%s1132_s4] ss:$0 sm:$0xff]  ;;  %v964_v1 = vld [vmem:[%s1132_s4 + $0x1] ss:$0 sm:$0xff]  ;;  %vm638_vm0 = vcmask 254976  }
   0xd   : > { %s841_s25 = smul.u32 20, %s1140_s21  ;;  %v969_v2 = vld [vmem:[%s1132_s4 + $0x2] ss:$0 sm:$0xff]  ;;  %v974_v3 = vld [vmem:[%s1132_s4 + $0x3] ss:$0 sm:$0xff]  ;;  %s840_s16 = sshll.u32 %s1140_s21, 3 }
   0xe   : > { %v989_v4 = vld [vmem:[%s1132_s4 + $0x4] ss:$0 sm:$0xff]  ;;  %v994_v5 = vld [vmem:[%s1132_s4 + $0x5] ss:$0 sm:$0xff]  ;;  %v1017_v20 = vld [vmem:[%s1132_s4 + $0x8] ss:$0 sm:$0xff]  ;;  %s1092_s18 = scalar_lea.vmem %s1134_s6, %s840_s16 }
   0xf   : > { %s979_s12 = scalar_lea.vmem %s1128_s0, %s841_s25  ;;  %s984_s15 = scalar_lea.vmem %s1129_s1, %s841_s25  ;;  %v1025_v24 = vld [vmem:[%s1132_s4 + $0x6] ss:$0 sm:$0xff]  ;;  %v1040_v41 = vld [vmem:[%s1132_s4 + $0x7] ss:$0 sm:$0xff] }
  0x10   : > { %s999_s27 = scalar_lea.vmem %s1130_s2, %s841_s25  ;;  %s1004_s30 = scalar_lea.vmem %s1131_s3, %s841_s25  ;;  %v404_v6 = vld [vmem:[%s979_s12] sm:$0x3]  ;;  %v823_v18 = vld [vmem:[%s979_s12 + $0x4] sm:$0x3]  ;;  %v834_v52 = vld [vmem:[%s979_s12 + $0x8] sm:$0x7] }
  0x11   : > { %v420_v7 = vld [vmem:[%s984_s15] sm:$0x3]  ;;  %v408_v9 = vunpack.c.l.bf16 %v404_v6  ;;  %v833_v19 = vld [vmem:[%s979_s12 + $0x4] sm:$0x7]  ;;  %v554_v29 = vunpack.c.l.bf16 %v823_v18  ;;  %v824_v56 = vld [vmem:[%s979_s12 + $0x8] sm:$0x3] }
  0x12   : > { %v441_v8 = vld [vmem:[%s979_s12] sm:$0x7]  ;;  %v424_v10 = vunpack.c.l.bf16 %v420_v7  ;;  %v828_v25 = vld [vmem:[%s984_s15 + $0x4] sm:$0x3]  ;;  %v597_v36 = vunpack.c.l.bf16 %v833_v19  ;;  %v406_v57 = vld [vmem:[%s979_s12 + $0x8] sm:$0x3] }
  0x13   : > { %v445_v11 = vunpack.c.l.bf16 %v441_v8  ;;  %v474_v12 = vld [vmem:[%s999_s27] sm:$0x3]  ;;  %v416_v21 = vmul.f32 %v959_v0, %v408_v9  ;;  %v405_v26 = vld [vmem:[%s979_s12 + $0x4] sm:$0x3]  ;;  %v576_v40 = vunpack.c.l.bf16 %v828_v25  ;;  %v563_v54 = vmul.f32 %v1025_v24, %v554_v29  ;;  %v422_v58 = vld [vmem:[%s984_s15 + $0x8] sm:$0x3] }
  0x14   : > { %v495_v13 = vld [vmem:[%s1004_s30] sm:$0x3]  ;;  %v478_v15 = vunpack.c.l.bf16 %v474_v12  ;;  %v433_v22 = vmul.f32 %v964_v1, %v424_v10  ;;  %v421_v30 = vld [vmem:[%s984_s15 + $0x4] sm:$0x3]  ;;  %v409_v42 = vunpack.c.l.bf16 %v405_v26  ;;  %v1043_v45 = vmul.f32 %v1017_v20, %v597_v36  ;;  %v829_v63 = vld [vmem:[%s984_s15 + $0x8] sm:$0x3] }
  0x15   : > { %v516_v14 = vld [vmem:[%s999_s27] sm:$0x7]  ;;  %v499_v16 = vunpack.c.l.bf16 %v495_v13  ;;  %v454_v23 = vmul.f32 %v969_v2, %v445_v11  ;;  %v442_v31 = vld [vmem:[%s979_s12 + $0x4] sm:$0x7]  ;;  %v425_v43 = vunpack.c.l.bf16 %v421_v30  ;;  %v585_v59 = vmul.f32 %v1040_v41, %v576_v40  ;;  %v443_v10 = vld [vmem:[%s979_s12 + $0x8] sm:$0x7] }
  0x16   : > { %v520_v17 = vunpack.c.l.bf16 %v516_v14  ;;  %v487_v27 = vmul.f32 %v974_v3, %v478_v15  ;;  %v475_v32 = vld [vmem:[%s999_s27 + $0x4] sm:$0x3]  ;;  %v437_v33 = vadd.f32 %v433_v22, %v416_v21  ;;  %v446_v46 = vunpack.c.l.bf16 %v442_v31  ;;  %v476_v11 = vld [vmem:[%s999_s27 + $0x8] sm:$0x3] }
  0x17   : > { %v462_v34 = vrot.slane %v454_v23, 1  ;;  %v508_v35 = vmul.f32 %v989_v4, %v499_v16  ;;  %v496_v37 = vld [vmem:[%s1004_s30 + $0x4] sm:$0x3]  ;;  %v479_v47 = vunpack.c.l.bf16 %v475_v32  ;;  %v417_v48 = vmul.f32 %v959_v0, %v409_v42  ;;  %v497_v16 = vld [vmem:[%s1004_s30 + $0x8] sm:$0x3] }
  0x18   : > { %v529_v28 = vmul.f32 %v994_v5, %v520_v17  ;;  %v517_v38 = vld [vmem:[%s999_s27 + $0x4] sm:$0x7]  ;;  %v434_v49 = vmul.f32 %v964_v1, %v425_v43  ;;  %v500_v50 = vunpack.c.l.bf16 %v496_v37  ;;  %v455_v55 = vmul.f32 %v969_v2, %v446_v46  ;;  %v518_v22 = vld [vmem:[%s999_s27 + $0x8] sm:$0x7]  ;;  %v835_v32 = vld [vmem:[%s979_s12 + $0xc] sm:$0x7] }
  0x19   : > { %v470_v44 = vadd.f32 %v462_v34, %v437_v33  ;;  %v521_v51 = vunpack.c.l.bf16 %v517_v38  ;;  %v614_v60 = vrot.slane %v1043_v45, 1  ;;  %v488_v62 = vmul.f32 %v974_v3, %v479_v47  ;;  %v1070_v33 = vld [vmem:[%s1133_s5] ss:$0 sm:$0xff]  ;;  %v407_v38 = vld [vmem:[%s979_s12 + $0xc] sm:$0x3] }
  0x1a   : > { %v537_v39 = vrot.slane %v529_v28, 1  ;;  %v438_v61 = vadd.f32 %v434_v49, %v417_v48  ;;  %v463_v7 = vrot.slane %v455_v55, 1  ;;  %v598_v9 = vunpack.c.l.bf16 %v834_v52  ;;  %v830_v45 = vld [vmem:[%s984_s15 + $0xc] sm:$0x3] }
  0x1b   : > { %v491_v53 = vadd.f32 %v487_v27, %v470_v44  ;;  %v530_v8 = vmul.f32 %v994_v5, %v521_v51  ;;  %v509_v12 = vmul.f32 %v989_v4, %v500_v50  ;;  %v555_v13 = vunpack.c.l.bf16 %v824_v56  ;;  %v825_v44 = vld [vmem:[%s979_s12 + $0xc] sm:$0x3] }
  0x1c   : > { %v410_v14 = vunpack.c.l.bf16 %v406_v57  ;;  %v426_v15 = vunpack.c.l.bf16 %v422_v58  ;;  %v471_v18 = vadd.f32 %v463_v7, %v438_v61  ;;  %v577_v19 = vunpack.c.l.bf16 %v829_v63  ;;  %v423_v50 = vld [vmem:[%s984_s15 + $0xc] sm:$0x3] }
  0x1d   : > { %v512_v6 = vadd.f32 %v508_v35, %v491_v53  ;;  %v607_v21 = vmul.f32 %v1017_v20, %v598_v9  ;;  %v447_v26 = vunpack.c.l.bf16 %v443_v10  ;;  %v480_v27 = vunpack.c.l.bf16 %v476_v11  ;;  %v444_v55 = vld [vmem:[%s979_s12 + $0xc] sm:$0x7] }
  0x1e   : > { %v418_v23 = vmul.f32 %v959_v0, %v410_v14  ;;  %v435_v25 = vmul.f32 %v964_v1, %v426_v15  ;;  %v492_v29 = vadd.f32 %v488_v62, %v471_v18  ;;  %v538_v30 = vrot.slane %v530_v8, 1  ;;  %v477_v56 = vld [vmem:[%s999_s27 + $0xc] sm:$0x3] }
  0x1f   : > { %v545_v17 = vadd.f32 %v537_v39, %v512_v6  ;;  %v501_v31 = vunpack.c.l.bf16 %v497_v16  ;;  %v564_v34 = vmul.f32 %v1025_v24, %v555_v13  ;;  %v456_v36 = vmul.f32 %v969_v2, %v447_v26  ;;  %v498_v62 = vld [vmem:[%s1004_s30 + $0xc] sm:$0x3]  ;;  %v836_v26 = vld [vmem:[%s979_s12 + $0x10] sm:$0x7] }
  0x20   : > { %v439_v35 = vadd.f32 %v435_v25, %v418_v23  ;;  %v522_v37 = vunpack.c.l.bf16 %v518_v22  ;;  %v513_v40 = vadd.f32 %v509_v12, %v492_v29  ;;  %v586_v42 = vmul.f32 %v1040_v41, %v577_v19  ;;  %v519_v9 = vld [vmem:[%s999_s27 + $0xc] sm:$0x7]  ;;  %v826_v25 = vld [vmem:[%s979_s12 + $0x10] sm:$0x3] }
  0x21   : > { %v567_v28 = vadd.f32 %v563_v54, %v545_v17  ;;  %v615_v43 = vrot.slane %v607_v21, 1  ;;  %v464_v46 = vrot.slane %v456_v36, 1  ;;  %v489_v47 = vmul.f32 %v974_v3, %v480_v27 }
  0x22   : > { %v531_v48 = vmul.f32 %v994_v5, %v522_v37  ;;  %v599_v49 = vunpack.c.l.bf16 %v835_v32  ;;  %v546_v52 = vadd.f32 %v538_v30, %v513_v40  ;;  %v510_v53 = vmul.f32 %v989_v4, %v501_v31  ;;  %v831_v32 = vld [vmem:[%s984_s15 + $0x10] sm:$0x3] }
  0x23   : > { %v589_v39 = vadd.f32 %v585_v59, %v567_v28  ;;  %v411_v54 = vunpack.c.l.bf16 %v407_v38  ;;  %v472_v57 = vadd.f32 %v464_v46, %v439_v35  ;;  %v556_v59 = vunpack.c.l.bf16 %v825_v44 }
  0x24   : > { %v539_v58 = vrot.slane %v531_v48, 1  ;;  %v578_v61 = vunpack.c.l.bf16 %v830_v45  ;;  %v568_v6 = vadd.f32 %v564_v34, %v546_v52  ;;  %v427_v8 = vunpack.c.l.bf16 %v423_v50 }
  0x25   : > { %v622_v51 = vadd.f32 %v614_v60, %v589_v39  ;;  %v419_v7 = vmul.f32 %v959_v0, %v411_v54  ;;  %v493_v60 = vadd.f32 %v489_v47, %v472_v57  ;;  %v608_v10 = vmul.f32 %v1017_v20, %v599_v49 }
  0x26   : > { %v448_v11 = vunpack.c.l.bf16 %v444_v55  ;;  %v481_v12 = vunpack.c.l.bf16 %v477_v56  ;;  %v590_v14 = vadd.f32 %v586_v42, %v568_v6  ;;  %v436_v15 = vmul.f32 %v964_v1, %v427_v8 }
  0x27   : > { %v630_v63 = vadd.f32 %v1070_v33, %v622_v51  ;;  %v502_v0 = vunpack.c.l.bf16 %v498_v62  ;;  %v514_v16 = vadd.f32 %v510_v53, %v493_v60  ;;  %v565_v17 = vmul.f32 %v1025_v24, %v556_v59 }
  0x28   : > { %v457_v18 = vmul.f32 %v969_v2, %v448_v11  ;;  %v523_v19 = vunpack.c.l.bf16 %v519_v9  ;;  %v623_v21 = vadd.f32 %v615_v43, %v590_v14  ;;  %v587_v22 = vmul.f32 %v1040_v41, %v578_v61 }
  0x29   : > { %v634_v13 = vpack.c.bf16 %v630_v63, %v630_v63  ;;  %v440_v23 = vadd.f32 %v436_v15, %v419_v7  ;;  %v547_v27 = vadd.f32 %v539_v58, %v514_v16  ;;  %v490_v1 = vmul.f32 %v974_v3, %v481_v12 }
  0x2a   : > { %v465_v28 = vrot.slane %v457_v18, 1  ;;  %v532_v29 = vmul.f32 %v994_v5, %v523_v19  ;;  %v631_v30 = vadd.f32 %v1070_v33, %v623_v21  ;;  %v616_v31 = vrot.slane %v608_v10, 1 }
  0x2b   : > { %639 = vst.msk [vmem:[%s1092_s18] sm:$0x3] %vm638_vm0, %v634_v13  ;;  %v511_v2 = vmul.f32 %v989_v4, %v502_v0  ;;  %v569_v34 = vadd.f32 %v565_v17, %v547_v27  ;;  %v557_v36 = vunpack.c.l.bf16 %v826_v25  ;;  %v600_v37 = vunpack.c.l.bf16 %v836_v26 }
  0x2c   : > { %v473_v35 = vadd.f32 %v465_v28, %v440_v23  ;;  %v635_v38 = vpack.c.bf16 %v631_v30, %v631_v30  ;;  %v540_v42 = vrot.slane %v532_v29, 1  ;;  %v579_v43 = vunpack.c.l.bf16 %v831_v32 }
  0x2d   : > { %v591_v39 = vadd.f32 %v587_v22, %v569_v34  ;;  %v566_v44 = vmul.f32 %v1025_v24, %v557_v36  ;;  %v609_v4 = vmul.f32 %v1017_v20, %v600_v37 }
  0x2e   : > { %v494_v40 = vadd.f32 %v490_v1, %v473_v35  ;;  %640 = vst.msk [vmem:[%s1092_s18 + $0x2] sm:$0x3] %vm638_vm0, %v635_v38  ;;  %v588_v47 = vmul.f32 %v1040_v41, %v579_v43 }
  0x2f   : > { %v624_v3 = vadd.f32 %v616_v31, %v591_v39  ;;  %v617_v50 = vrot.slane %v609_v4, 1 }
  0x30   : > { %v515_v5 = vadd.f32 %v511_v2, %v494_v40 }
  0x31   : > { %v632_v45 = vadd.f32 %v1070_v33, %v624_v3 }
  0x32   : > { %v548_v46 = vadd.f32 %v540_v42, %v515_v5 }
  0x33   : > { %v636_v48 = vpack.c.bf16 %v632_v45, %v632_v45 }
  0x34   : > { %v570_v49 = vadd.f32 %v566_v44, %v548_v46 }
  0x35   : > { %641 = vst.msk [vmem:[%s1092_s18 + $0x4] sm:$0x3] %vm638_vm0, %v636_v48 }
  0x36   : > { %v592_v51 = vadd.f32 %v588_v47, %v570_v49 }
  0x38   : > { %v625_v52 = vadd.f32 %v617_v50, %v592_v51 }
  0x3a   : > { %v633_v53 = vadd.f32 %v1070_v33, %v625_v52 }
  0x3c   : > { %v637_v54 = vpack.c.bf16 %v633_v53, %v633_v53 }
  0x3e   : > { %642 = vst.msk [vmem:[%s1092_s18 + $0x6] sm:$0x3] %vm638_vm0, %v637_v54 }
  0x3f PF: > { %s16_s23 = sadd.s32 1, %s898_s23   ;;  %s1135_s21 = smov %s894_s22 }
  0x40   : > { %p13_p5 = scmp.ge.s32.totalorder %s16_s23, 4   ;;  %s1136_s22 = smov %s1138_s24 }
  0x42   :  { %15 = sbr.rel (!%p13_p5) target bundleno = 2 (0x2), region = 99 }

// kernel: dual_gcn_forward.10
= control target key start
LH: loop header
LB: loop body
LE: loop exit
PB: predicated region body
PF: predicated region fallthrough
CT: control target
= control target key end

     0   :  { %s622_s24 = smov 0   ;;  %s678_s0 = inlined_call_operand.vmem [shape: bf16[2,4,32], index: 0, kind: input, shape index: {}]   ;;  %s679_s1 = inlined_call_operand.vmem [shape: bf16[32,48], index: 1, kind: input, shape index: {}]   ;;  %s680_s2 = inlined_call_operand.vmem [shape: f32[1,48], index: 2, kind: input, shape index: {}]   ;;  %s681_s3 = inlined_call_operand.vmem [shape: bf16[16,16], index: 3, kind: input, shape index: {}]   ;;  %s682_s4 = inlined_call_operand.vmem [shape: f32[1,16], index: 4, kind: input, shape index: {}]   ;;  %s683_s5 = inlined_call_operand.vmem [shape: bf16[16,32], index: 5, kind: input, shape index: {}]   ;;  %s684_s6 = inlined_call_operand.vmem [shape: f32[1,32], index: 6, kind: input, shape index: {}]   ;;  %s685_s7 = inlined_call_operand.vmem [shape: bf16[2,4,32], index: 7, kind: output, shape index: {}]  }
   0x1 LB: > { %s516_s25 = sadd.s32 4294967295, %s578_s24   ;;  %p520_p0 = scmp.ge.s32.totalorder %s578_s24, 1  ;;  %s578_s24 = sphi %s622_s24, %s17_s24  }
   0x2   : > { %p236_p1 = scmp.lt.s32.totalorder %s578_s24, 3 }
   0x4   : > { %p237_p2 = pnand %p520_p0, %p236_p1 }
   0x5   : > { %p266_p3 = scmp.lt.s32.totalorder (!%p237_p2), %s516_s25, 1  ;;  %s580_s13 = smov (!%p237_p2), 112  }
   0x6   : > { %240 = sbr.rel (%p237_p2) target bundleno = 1158 (0x486), region = 48  ;;  %s581_s14 = smov (!%p237_p2), 96  }
   0xb   : > { %v547_v0 = vld [vmem:[%s679_s1 + $0x8] sm:$0xff]  ;;  %v546_v1 = vld [vmem:[%s679_s1] sm:$0xff]  ;;  %s687_s25 = smov (!%p266_p3, %s516_s25), 1  ;;  %vm296_vm0 = vcmask 261120   ;;  %vm339_vm1 = vcmask 1041408   ;;  %vm335_vm2 = vcmask 31744  }
   0xc   : > { %306 = vmatpush.bf16.msra.mxu0 %v547_v0  ;;  %s521_s30 = sshll.u32 %s687_s25, 1  ;;  %v561_v3 = vld [vmem:[%s680_s2] ss:$0 sm:$0xff]  ;;  %vm357_vm3 = vcmask 130048   ;;  %vm461_vm4 = vcmask 254976  }
   0xd   : > { %s269_s10 = scalar_lea.vmem %s678_s0, %s521_s30  ;;  %v548_v35 = vld [vmem:[%s681_s3] sm:$0xff]  ;;  %s273_s27 = scalar_lea.vmem %s685_s7, %s521_s30 }
   0xe   : > { %v644_v2 = vld [vmem:[%s269_s10] sm:$0x3]  ;;  %422 = vmatpush.bf16.msra.mxu3 %v548_v35 }
   0xf   : > { %v549_v36 = vld [vmem:[%s683_s5] sm:$0xff]  ;;  %v457_v46 = vunpack.c.l.bf16 %v644_v2 }
  0x10   : > { %307 = vmatpush.bf16.msra.mxu0 %v546_v1  ;;  %v562_v40 = vld [vmem:[%s682_s4] ss:$0 sm:$0xff] }
  0x11   : > { %v563_v45 = vld [vmem:[%s684_s6] ss:$0 sm:$0xff] }
  0x13   : > { %531 = vmatmul.msk.bf16.vlgmr.msra.gmra.mxu0 %vm296_vm0, %v644_v2 }
  0x90   : > { %v309_v4 = vpop.f32.mrf.mxu0 }
  0x91   : > { %v310_v5 = vadd.f32 %v561_v3, %v309_v4 }
  0x93   : > { %v313_v6 = vpack.c.bf16 %v310_v5, %v310_v5 }
  0x95   : > { %v331_v7 = vunpack.c.l.b16 %v313_v6 }
  0x97   : > { %v332_v8 = vpack.c.b16 %v331_v7, %v331_v7 }
  0x98   : > { %v311_v9 = vpop.f32.mrf.mxu0 }
  0x99   : > { %333 = vrot.lane.b32.xlu0 %v332_v8, %s580_s13 }
  0xbb   : > { %314 = vxpose.xlu0.c.b16.start.end [1/1] (short) (narrow) %v313_v6, 16 }
 0x10b   : > { %v334_v10 = vpop.permute.xlu0 %333 }
 0x10c   : > { %v341_v11 = vsel %vm339_vm1, %v334_v10, 0 }
 0x10d   : > { %350 = vmatpush.bf16.msra.mxu1 %v341_v11 }
 0x111   : > { %451 = vmatpush.bf16.msrb.mxu1 %v549_v36 }
 0x167   : > { %v322_v12 = vpop.trf.xlu0 }
 0x168   : > { %532 = vmatmul.msk.bf16.vlgmr.msra.gmra.mxu1 %vm335_vm2, %v322_v12 }
 0x1e5   : > { %v352_v13 = vpop.f32.mrf.mxu1 }
 0x1e6   : > { %v358_v14 = vsel %vm357_vm3, %v352_v13, -inf }
 0x1e7   : > { %359 = vmax.xlane.f32.xlu1 %v358_v14 }
 0x1ed   : > { %v354_v15 = vpop.f32.mrf.mxu1 }
 0x1ee   : > { %v361_v16 = vsel %vm357_vm3, %v354_v15, -inf }
 0x1ef   : > { %362 = vmax.xlane.f32.xlu1 %v361_v16 }
 0x208   : > { %381 = vrot.lane.b32.xlu1 %v332_v8, %s581_s14 }
 0x25a   : > { %v360_v17 = vpop.xlane.xlu1 %359 }
 0x25b   : > { %v364_v18 = vsub.f32 %v352_v13, %v360_v17 }
 0x25d   : > { %v366_v19 = vmul.f32 1.442695, %v364_v18 }
 0x25f   : > { %564 = vpow2.f32 %v366_v19 }
 0x262   : > { %v363_v20 = vpop.xlane.xlu1 %362 }
 0x263   : > { %v365_v21 = vsub.f32 %v354_v15, %v363_v20 }
 0x265   : > { %v565_v22 = vpop.eup %564  ;;  %v368_v23 = vmul.f32 1.442695, %v365_v21 }
 0x266   : > { %v370_v24 = vsel %vm357_vm3, %v565_v22, 0.0 }
 0x267   : > { %566 = vpow2.f32 %v368_v23  ;;  %371 = vadd.xlane.f32.xlu2 %v370_v24 }
 0x26d   : > { %v567_v25 = vpop.eup %566 }
 0x26e   : > { %v373_v26 = vsel %vm357_vm3, %v567_v25, 0.0 }
 0x26f   : > { %374 = vadd.xlane.f32.xlu2 %v373_v26 }
 0x27a   : > { %v382_v34 = vpop.permute.xlu1 %381 }
 0x2da   : > { %v372_v27 = vpop.xlane.xlu2 %371 }
 0x2db   : > { %568 = vrcp.f32 %v372_v27 }
 0x2e1   : > { %v569_v29 = vpop.eup %568 }
 0x2e2   : > { %v375_v28 = vpop.xlane.xlu2 %374  ;;  %v378_v31 = vmul.f32 %v569_v29, %v565_v22 }
 0x2e3   : > { %570 = vrcp.f32 %v375_v28 }
 0x2e9   : > { %v571_v30 = vpop.eup %570 }
 0x2ea   : > { %v379_v32 = vmul.f32 %v571_v30, %v567_v25 }
 0x2ec   : > { %v380_v33 = vpack.c.bf16 %v379_v32, %v378_v31 }
 0x2ee   : > { %393 = vmatpush.bf16.msra.mxu2 %v380_v33 }
 0x2f1   : > { %533 = vmatmul.msk.bf16.vlgmr.msra.gmra.mxu2 %vm357_vm3, %v382_v34 }
 0x374   : > { %v395_v37 = vpop.f32.mrf.mxu2 }
 0x375   : > { %v399_v38 = vpack.c.bf16 %v395_v37, %v395_v37 }
 0x377   : > { %538 = vmatmul.msk.bf16.vlgmr.msra.gmra.mxu3 %vm357_vm3, %v399_v38 }
 0x37c   : > { %v397_v39 = vpop.f32.mrf.mxu2 }
 0x3fa   : > { %v424_v41 = vpop.f32.mrf.mxu3 }
 0x3fb   : > { %v425_v42 = vadd.f32 %v562_v40, %v424_v41 }
 0x3fd   : > { %v428_v43 = vpack.c.bf16 %v425_v42, %v425_v42 }
 0x3ff   : > { %543 = vmatmul.msk.bf16.vlgmr.msrb.gmra.mxu1 %vm357_vm3, %v428_v43 }
 0x402   : > { %v426_v44 = vpop.f32.mrf.mxu3 }
 0x47c   : > { %v453_v47 = vpop.f32.mrf.mxu1 }
 0x47d   : > { %v454_v48 = vadd.f32 %v563_v45, %v453_v47 }
 0x47f   : > { %v458_v49 = vadd.f32 %v457_v46, %v454_v48 }
 0x481   : > { %v459_v50 = vmax.f32 %v458_v49, 0.0 }
 0x483   : > { %v460_v51 = vpack.c.bf16 %v459_v50, %v459_v50 }
 0x484   : > { %v455_v52 = vpop.f32.mrf.mxu1 }
 0x485   : > { %462 = vst.msk [vmem:[%s273_s27] sm:$0x3] %vm461_vm4, %v460_v51 }
 0x486 PF: > { %s17_s24 = sadd.s32 1, %s578_s24  }
 0x487   : > { %p14_p4 = scmp.ge.s32.totalorder %s17_s24, 4  }
 0x489   :  { %16 = sbr.rel (!%p14_p4) target bundleno = 1 (0x1), region = 78 }

// kernel: dual_gcn_forward.9
= control target key start
LH: loop header
LB: loop body
LE: loop exit
PB: predicated region body
PF: predicated region fallthrough
CT: control target
= control target key end

     0   :  { %s837_s21 = smov 0   ;;  %s839_s22 = smov 0   ;;  %s935_s0 = inlined_call_operand.vmem [shape: bf16[2,3,3,32], index: 0, kind: input, shape index: {}]   ;;  %s936_s1 = inlined_call_operand.vmem [shape: bf16[2,3,3,32], index: 1, kind: input, shape index: {}]   ;;  %s937_s2 = inlined_call_operand.vmem [shape: bf16[2,3,3,32], index: 2, kind: input, shape index: {}]   ;;  %s938_s3 = inlined_call_operand.vmem [shape: bf16[2,3,3,32], index: 3, kind: input, shape index: {}]   ;;  %s939_s4 = inlined_call_operand.vmem [shape: f32[9,1,32], index: 4, kind: input, shape index: {}]   ;;  %s940_s5 = inlined_call_operand.vmem [shape: f32[1,32], index: 5, kind: input, shape index: {}]   ;;  %s941_s6 = inlined_call_operand.vmem [shape: bf16[2,2,2,32], index: 6, kind: output, shape index: {}]  }
   0x1   :  { %s841_s23 = smov 0  }
   0x2 LB: > { %s28_s24 = sadd.s32 1, %s796_s22  ;;  %p715_p0 = scmp.ge.s32.totalorder %s800_s23, 1  ;;  %s800_s23 = sphi %s841_s23, %s16_s23   ;;  %s796_s22 = sphi %s839_s22, %s943_s22   ;;  %s792_s21 = sphi %s837_s21, %s942_s21  }
   0x3   : > { %p30_p1 = scmp.ge.s32.totalorder %s28_s24, 2  ;;  %p292_p2 = scmp.lt.s32.totalorder %s800_s23, 3 }
   0x5   : > { %s945_s24 = smov (%p30_p1, %s28_s24), 0  ;;  %p293_p3 = pnand %p715_p0, %p292_p2 }
   0x6   : > { %p357_p4 = scmp.lt.s32.totalorder (!%p293_p3), %s792_s21, 1 }
   0x7   : > { %296 = sbr.rel (%p293_p3) target bundleno = 47 (0x2f), region = 44 }
   0xc   : > { %s947_s21 = smov (!%p357_p4, %s792_s21), 1  ;;  %v768_v0 = vld [vmem:[%s939_s4] ss:$0 sm:$0xff]  ;;  %v769_v1 = vld [vmem:[%s939_s4 + $0x1] ss:$0 sm:$0xff]  ;;  %vm550_vm0 = vcmask 253952  }
   0xd   : > { %s743_s25 = smul.u32 6, %s947_s21  ;;  %v770_v2 = vld [vmem:[%s939_s4 + $0x2] ss:$0 sm:$0xff]  ;;  %v771_v11 = vld [vmem:[%s939_s4 + $0x3] ss:$0 sm:$0xff] }
   0xe   : > { %v773_v16 = vld [vmem:[%s939_s4 + $0x5] ss:$0 sm:$0xff]  ;;  %v772_v20 = vld [vmem:[%s939_s4 + $0x4] ss:$0 sm:$0xff]  ;;  %v774_v42 = vld [vmem:[%s939_s4 + $0x6] ss:$0 sm:$0xff] }
   0xf   : > { %s864_s30 = scalar_lea.vmem %s935_s0, %s743_s25  ;;  %s869_s9 = scalar_lea.vmem %s936_s1, %s743_s25  ;;  %v776_v44 = vld [vmem:[%s939_s4 + $0x8] ss:$0 sm:$0xff]  ;;  %v775_v47 = vld [vmem:[%s939_s4 + $0x7] ss:$0 sm:$0xff] }
  0x10   : > { %s880_s16 = scalar_lea.vmem %s937_s2, %s743_s25  ;;  %s388_s19 = scalar_lea.vmem %s938_s3, %s743_s25  ;;  %v402_v3 = vld [vmem:[%s864_s30] sm:$0x1]  ;;  %v413_v5 = vld [vmem:[%s869_s9 + $0x2] sm:$0x1]  ;;  %v731_v54 = vld [vmem:[%s864_s30 + $0x4] sm:$0x1] }
  0x11   : > { %v412_v4 = vld [vmem:[%s869_s9] sm:$0x1]  ;;  %v404_v6 = vunpack.c.l.bf16 %v402_v3  ;;  %v415_v8 = vunpack.c.l.bf16 %v413_v5  ;;  %v447_v22 = vld [vmem:[%s880_s16 + $0x2] sm:$0x1]  ;;  %v737_v55 = vld [vmem:[%s864_s30 + $0x4] sm:$0x3] }
  0x12   : > { %v414_v7 = vunpack.c.l.bf16 %v412_v4  ;;  %v425_v9 = vld [vmem:[%s864_s30] sm:$0x3]  ;;  %v403_v24 = vld [vmem:[%s864_s30 + $0x2] sm:$0x1]  ;;  %v449_v36 = vunpack.c.l.bf16 %v447_v22  ;;  %v734_v62 = vld [vmem:[%s869_s9 + $0x4] sm:$0x1]  ;;  %v524_v3 = vunpack.c.l.bf16 %v737_v55 }
  0x13   : > { %v446_v10 = vld [vmem:[%s880_s16] sm:$0x1]  ;;  %v427_v12 = vunpack.c.l.bf16 %v425_v9  ;;  %v410_v17 = vmul.f32 %v768_v0, %v404_v6  ;;  %v422_v25 = vmul.f32 %v769_v1, %v415_v8  ;;  %v730_v27 = vld [vmem:[%s864_s30 + $0x2] sm:$0x1]  ;;  %v405_v34 = vunpack.c.l.bf16 %v403_v24 }
  0x14   : > { %v448_v13 = vunpack.c.l.bf16 %v446_v10  ;;  %v459_v14 = vld [vmem:[%s388_s19] sm:$0x1]  ;;  %v421_v18 = vmul.f32 %v769_v1, %v414_v7  ;;  %v736_v28 = vld [vmem:[%s864_s30 + $0x2] sm:$0x3]  ;;  %v496_v41 = vunpack.c.l.bf16 %v730_v27  ;;  %v456_v57 = vmul.f32 %v771_v11, %v449_v36 }
  0x15   : > { %v472_v15 = vld [vmem:[%s880_s16] sm:$0x3]  ;;  %v461_v19 = vunpack.c.l.bf16 %v459_v14  ;;  %v434_v21 = vmul.f32 %v770_v2, %v427_v12  ;;  %v426_v29 = vld [vmem:[%s864_s30 + $0x2] sm:$0x3]  ;;  %v523_v43 = vunpack.c.l.bf16 %v736_v28  ;;  %v411_v45 = vmul.f32 %v768_v0, %v405_v34 }
  0x16   : > { %v474_v23 = vunpack.c.l.bf16 %v472_v15  ;;  %v423_v26 = vadd.f32 %v421_v18, %v410_v17  ;;  %v455_v31 = vmul.f32 %v771_v11, %v448_v13  ;;  %v460_v32 = vld [vmem:[%s388_s19 + $0x2] sm:$0x1]  ;;  %v428_v39 = vunpack.c.l.bf16 %v426_v29  ;;  %v777_v14 = vld [vmem:[%s940_s5] ss:$0 sm:$0xff] }
  0x17   : > { %v723_v30 = vrot.slane %v434_v21, 9  ;;  %v473_v35 = vld [vmem:[%s880_s16 + $0x2] sm:$0x3]  ;;  %v468_v37 = vmul.f32 %v772_v20, %v461_v19  ;;  %v462_v46 = vunpack.c.l.bf16 %v460_v32  ;;  %v424_v53 = vadd.f32 %v422_v25, %v411_v45 }
  0x18   : > { %v481_v33 = vmul.f32 %v773_v16, %v474_v23  ;;  %v733_v38 = vld [vmem:[%s869_s9 + $0x2] sm:$0x1]  ;;  %v435_v48 = vmul.f32 %v770_v2, %v428_v39  ;;  %v475_v49 = vunpack.c.l.bf16 %v473_v35  ;;  %v503_v60 = vmul.f32 %v774_v42, %v496_v41  ;;  %s720_s9 = sshll.u32 %s947_s21, 1 }
  0x19   : > { %v444_v40 = vadd.f32 %v723_v30, %v423_v26  ;;  %v510_v52 = vunpack.c.l.bf16 %v733_v38  ;;  %v530_v61 = vmul.f32 %v776_v44, %v523_v43  ;;  %v469_v0 = vmul.f32 %v772_v20, %v462_v46  ;;  %s401_s17 = scalar_lea.vmem %s941_s6, %s720_s9 }
  0x1a   : > { %v728_v51 = vrot.slane %v481_v33, 9  ;;  %v724_v56 = vrot.slane %v435_v48, 9  ;;  %v482_v58 = vmul.f32 %v773_v16, %v475_v49  ;;  %v497_v1 = vunpack.c.l.bf16 %v731_v54 }
  0x1b   : > { %v457_v50 = vadd.f32 %v455_v31, %v444_v40  ;;  %v517_v4 = vmul.f32 %v775_v47, %v510_v52  ;;  %v511_v7 = vunpack.c.l.bf16 %v734_v62  ;;  %v739_v9 = vrot.slane %v530_v61, 9 }
  0x1c   : > { %v445_v63 = vadd.f32 %v724_v56, %v424_v53  ;;  %v729_v6 = vrot.slane %v482_v58, 9  ;;  %v504_v12 = vmul.f32 %v774_v42, %v497_v1  ;;  %v531_v11 = vmul.f32 %v776_v44, %v524_v3 }
  0x1d   : > { %v470_v59 = vadd.f32 %v468_v37, %v457_v50  ;;  %v518_v16 = vmul.f32 %v775_v47, %v511_v7 }
  0x1e   : > { %v458_v5 = vadd.f32 %v456_v57, %v445_v63  ;;  %v740_v19 = vrot.slane %v531_v11, 9 }
  0x1f   : > { %v491_v2 = vadd.f32 %v728_v51, %v470_v59 }
  0x20   : > { %v471_v10 = vadd.f32 %v469_v0, %v458_v5 }
  0x21   : > { %v505_v8 = vadd.f32 %v503_v60, %v491_v2 }
  0x22   : > { %v492_v15 = vadd.f32 %v729_v6, %v471_v10 }
  0x23   : > { %v519_v13 = vadd.f32 %v517_v4, %v505_v8 }
  0x24   : > { %v506_v18 = vadd.f32 %v504_v12, %v492_v15 }
  0x25   : > { %v540_v17 = vadd.f32 %v739_v9, %v519_v13 }
  0x26   : > { %v520_v21 = vadd.f32 %v518_v16, %v506_v18 }
  0x27   : > { %v546_v20 = vadd.f32 %v777_v14, %v540_v17 }
  0x28   : > { %v541_v23 = vadd.f32 %v740_v19, %v520_v21 }
  0x29   : > { %v548_v22 = vpack.c.bf16 %v546_v20, %v546_v20 }
  0x2a   : > { %v547_v24 = vadd.f32 %v777_v14, %v541_v23 }
  0x2b   : > { %551 = vst.msk [vmem:[%s401_s17] sm:$0x1] %vm550_vm0, %v548_v22 }
  0x2c   : > { %v549_v25 = vpack.c.bf16 %v547_v24, %v547_v24 }
  0x2e   : > { %552 = vst.msk [vmem:[%s401_s17 + $0x1] sm:$0x1] %vm550_vm0, %v549_v25 }
  0x2f PF: > { %s16_s23 = sadd.s32 1, %s800_s23   ;;  %s942_s21 = smov %s796_s22 }
  0x30   : > { %p13_p5 = scmp.ge.s32.totalorder %s16_s23, 4   ;;  %s943_s22 = smov %s945_s24 }
  0x32   :  { %15 = sbr.rel (!%p13_p5) target bundleno = 2 (0x2), region = 99 }

// kernel: dual_gcn_forward.7
= control target key start
LH: loop header
LB: loop body
LE: loop exit
PB: predicated region body
PF: predicated region fallthrough
CT: control target
= control target key end

     0   :  { %s1232_s21 = smov 0   ;;  %s1234_s22 = smov 0   ;;  %s1554_s0 = inlined_call_operand.vmem [shape: bf16[2,9,9,32], index: 0, kind: input, shape index: {}]   ;;  %s1555_s1 = inlined_call_operand.vmem [shape: bf16[2,9,9,32], index: 1, kind: input, shape index: {}]   ;;  %s1556_s2 = inlined_call_operand.vmem [shape: bf16[2,9,9,32], index: 2, kind: input, shape index: {}]   ;;  %s1557_s3 = inlined_call_operand.vmem [shape: bf16[2,9,9,32], index: 3, kind: input, shape index: {}]   ;;  %s1558_s4 = inlined_call_operand.vmem [shape: f32[9,1,32], index: 4, kind: input, shape index: {}]   ;;  %s1559_s5 = inlined_call_operand.vmem [shape: f32[1,32], index: 5, kind: input, shape index: {}]   ;;  %s1560_s6 = inlined_call_operand.vmem [shape: bf16[2,8,8,32], index: 6, kind: output, shape index: {}]  }
   0x1   :  { %s1236_s23 = smov 0  }
   0x2 LB: > { %s28_s24 = sadd.s32 1, %s1191_s22  ;;  %p1096_p0 = scmp.ge.s32.totalorder %s1195_s23, 1  ;;  %s1195_s23 = sphi %s1236_s23, %s16_s23   ;;  %s1191_s22 = sphi %s1234_s22, %s1562_s22   ;;  %s1187_s21 = sphi %s1232_s21, %s1561_s21  }
   0x3   : > { %p30_p1 = scmp.ge.s32.totalorder %s28_s24, 2  ;;  %p292_p2 = scmp.lt.s32.totalorder %s1195_s23, 3 }
   0x5   : > { %s1564_s24 = smov (%p30_p1, %s28_s24), 0  ;;  %p293_p3 = pnand %p1096_p0, %p292_p2 }
   0x6   : > { %p358_p4 = scmp.lt.s32.totalorder (!%p293_p3), %s1187_s21, 1 }
   0x7   : > { %296 = sbr.rel (%p293_p3) target bundleno = 111 (0x6f), region = 44 }
   0xc   : > { %s1566_s21 = smov (!%p358_p4, %s1187_s21), 1  ;;  %v1256_v0 = vld [vmem:[%s1558_s4] ss:$0 sm:$0xff]  ;;  %v1261_v1 = vld [vmem:[%s1558_s4 + $0x1] ss:$0 sm:$0xff]  ;;  %vm522_vm0 = vcmask 1046528  }
   0xd   : > { %s1138_s25 = smul.u32 72, %s1566_s21  ;;  %v1266_v2 = vld [vmem:[%s1558_s4 + $0x2] ss:$0 sm:$0xff]  ;;  %v1281_v3 = vld [vmem:[%s1558_s4 + $0x3] ss:$0 sm:$0xff]  ;;  %vm919_vm1 = vcmask 257024  }
   0xe   : > { %v1286_v4 = vld [vmem:[%s1558_s4 + $0x5] ss:$0 sm:$0xff]  ;;  %v1307_v16 = vld [vmem:[%s1558_s4 + $0x4] ss:$0 sm:$0xff]  ;;  %v1318_v24 = vld [vmem:[%s1558_s4 + $0x8] ss:$0 sm:$0xff] }
   0xf   : > { %s1271_s10 = scalar_lea.vmem %s1554_s0, %s1138_s25  ;;  %s1276_s13 = scalar_lea.vmem %s1555_s1, %s1138_s25  ;;  %v1326_v28 = vld [vmem:[%s1558_s4 + $0x6] ss:$0 sm:$0xff]  ;;  %v1341_v49 = vld [vmem:[%s1558_s4 + $0x7] ss:$0 sm:$0xff] }
  0x10   : > { %s1291_s20 = scalar_lea.vmem %s1556_s2, %s1138_s25  ;;  %s1296_s28 = scalar_lea.vmem %s1557_s3, %s1138_s25  ;;  %v404_v5 = vld [vmem:[%s1271_s10] sm:$0xf]  ;;  %v469_v7 = vld [vmem:[%s1271_s10 + $0x4] sm:$0x1]  ;;  %v1108_v18 = vld [vmem:[%s1271_s10 + $0x8] sm:$0xf] }
  0x11   : > { %v432_v6 = vld [vmem:[%s1276_s13] sm:$0xf]  ;;  %v412_v8 = vunpack.c.l.bf16 %v404_v5  ;;  %v477_v10 = vunpack.c.l.bf16 %v469_v7  ;;  %v637_v13 = vld [vmem:[%s1291_s20 + $0x4] sm:$0x1]  ;;  %v1126_v23 = vld [vmem:[%s1271_s10 + $0xc] sm:$0x1]  ;;  %v739_v34 = vunpack.c.l.bf16 %v1108_v18 }
  0x12   : > { %v440_v9 = vunpack.c.l.bf16 %v432_v6  ;;  %v563_v11 = vld [vmem:[%s1291_s20] sm:$0xf]  ;;  %v645_v17 = vunpack.c.l.bf16 %v637_v13  ;;  %v1117_v29 = vld [vmem:[%s1276_s13 + $0x8] sm:$0xf]  ;;  %v814_v38 = vunpack.c.l.bf16 %v1126_v23  ;;  %v470_v40 = vld [vmem:[%s1271_s10 + $0xc] sm:$0x1] }
  0x13   : > { %v600_v12 = vld [vmem:[%s1296_s28] sm:$0xf]  ;;  %v571_v14 = vunpack.c.l.bf16 %v563_v11  ;;  %v424_v19 = vmul.f32 %v1256_v0, %v412_v8  ;;  %v490_v21 = vmul.f32 %v1266_v2, %v412_v8  ;;  %v491_v22 = vmul.f32 %v1266_v2, %v477_v10  ;;  %v405_v30 = vld [vmem:[%s1271_s10 + $0x8] sm:$0xf]  ;;  %v638_v52 = vld [vmem:[%s1291_s20 + $0xc] sm:$0x1] }
  0x14   : > { %v608_v15 = vunpack.c.l.bf16 %v600_v12  ;;  %v453_v20 = vmul.f32 %v1261_v1, %v440_v9  ;;  %v659_v27 = vmul.f32 %v1286_v4, %v645_v17  ;;  %v433_v39 = vld [vmem:[%s1276_s13 + $0x8] sm:$0xf]  ;;  %v777_v42 = vunpack.c.l.bf16 %v1117_v29  ;;  %v1109_v6 = vld [vmem:[%s1271_s10 + $0x10] sm:$0xf]  ;;  %v1127_v11 = vld [vmem:[%s1271_s10 + $0x14] sm:$0x1] }
  0x15   : > { %v584_v25 = vmul.f32 %v1281_v3, %v571_v14  ;;  %v658_v26 = vmul.f32 %v1286_v4, %v571_v14  ;;  %v523_v32 = vrot.slane %v490_v21, 1  ;;  %v524_v33 = vrot.slane %v491_v22, 1  ;;  %v564_v45 = vld [vmem:[%s1291_s20 + $0x8] sm:$0xf]  ;;  %v406_v12 = vld [vmem:[%s1271_s10 + $0x10] sm:$0xf] }
  0x16   : > { %v461_v31 = vadd.f32 %v453_v20, %v424_v19  ;;  %v621_v35 = vmul.f32 %v1307_v16, %v608_v15  ;;  %v691_v37 = vrot.slane %v659_v27, 1  ;;  %v827_v43 = vmul.f32 %v1318_v24, %v739_v34  ;;  %v601_v51 = vld [vmem:[%s1296_s28 + $0x8] sm:$0xf]  ;;  %v1118_v18 = vld [vmem:[%s1276_s13 + $0x10] sm:$0xf]  ;;  %s1137_s16 = sshll.u32 %s1566_s21, 5 }
  0x17   : > { %v690_v36 = vrot.slane %v658_v26, 1  ;;  %v525_v41 = vsel %vm522_vm0, %v523_v32, %v524_v33  ;;  %v413_v44 = vunpack.c.l.bf16 %v405_v30  ;;  %v752_v48 = vmul.f32 %v1326_v28, %v739_v34  ;;  %v434_v29 = vld [vmem:[%s1276_s13 + $0x10] sm:$0xf]  ;;  %v471_v34 = vld [vmem:[%s1271_s10 + $0x14] sm:$0x1]  ;;  %s1388_s18 = scalar_lea.vmem %s1560_s6, %s1137_s16 }
  0x18   : > { %v555_v46 = vadd.f32 %v525_v41, %v461_v31  ;;  %v828_v50 = vmul.f32 %v1318_v24, %v814_v38  ;;  %v859_v53 = vrot.slane %v827_v43, 1  ;;  %v441_v55 = vunpack.c.l.bf16 %v433_v39  ;;  %v565_v39 = vld [vmem:[%s1291_s20 + $0x10] sm:$0xf]  ;;  %v1371_v41 = vld [vmem:[%s1559_s5] ss:$0 sm:$0xff] }
  0x19   : > { %v692_v47 = vsel %vm522_vm0, %v690_v36, %v691_v37  ;;  %v425_v54 = vmul.f32 %v1256_v0, %v413_v44  ;;  %v478_v56 = vunpack.c.l.bf16 %v470_v40  ;;  %v492_v59 = vmul.f32 %v1266_v2, %v413_v44 }
  0x1a   : > { %v592_v57 = vadd.f32 %v584_v25, %v555_v46  ;;  %v860_v58 = vrot.slane %v828_v50, 1  ;;  %v572_v60 = vunpack.c.l.bf16 %v564_v45  ;;  %v454_v61 = vmul.f32 %v1261_v1, %v441_v55  ;;  %v602_v45 = vld [vmem:[%s1296_s28 + $0x10] sm:$0xf]  ;;  %v639_v55 = vld [vmem:[%s1291_s20 + $0x14] sm:$0x1] }
  0x1b   : > { %v493_v62 = vmul.f32 %v1266_v2, %v478_v56  ;;  %v609_v63 = vunpack.c.l.bf16 %v601_v51  ;;  %v646_v5 = vunpack.c.l.bf16 %v638_v52  ;;  %v790_v8 = vmul.f32 %v1341_v49, %v777_v42 }
  0x1c   : > { %v629_v7 = vadd.f32 %v621_v35, %v592_v57  ;;  %v861_v9 = vsel %vm522_vm0, %v859_v53, %v860_v58  ;;  %v526_v10 = vrot.slane %v492_v59, 1  ;;  %v462_v13 = vadd.f32 %v454_v61, %v425_v54 }
  0x1d   : > { %v527_v14 = vrot.slane %v493_v62, 1  ;;  %v585_v15 = vmul.f32 %v1281_v3, %v572_v60  ;;  %v660_v17 = vmul.f32 %v1286_v4, %v572_v60  ;;  %v622_v20 = vmul.f32 %v1307_v16, %v609_v63  ;;  %v1110_v60 = vld [vmem:[%s1271_s10 + $0x18] sm:$0xf] }
  0x1e   : > { %v722_v19 = vadd.f32 %v692_v47, %v629_v7  ;;  %v661_v21 = vmul.f32 %v1286_v4, %v646_v5  ;;  %v740_v22 = vunpack.c.l.bf16 %v1109_v6  ;;  %v815_v26 = vunpack.c.l.bf16 %v1127_v11  ;;  %v1128_v6 = vld [vmem:[%s1271_s10 + $0x1c] sm:$0x1]  ;;  %v1119_v11 = vld [vmem:[%s1276_s13 + $0x18] sm:$0xf] }
  0x1f   : > { %v528_v23 = vsel %vm522_vm0, %v526_v10, %v527_v14  ;;  %v693_v25 = vrot.slane %v660_v17, 1  ;;  %v414_v27 = vunpack.c.l.bf16 %v406_v12  ;;  %v778_v33 = vunpack.c.l.bf16 %v1118_v18  ;;  %v407_v17 = vld [vmem:[%s1271_s10 + $0x18] sm:$0xf] }
  0x20   : > { %v760_v30 = vadd.f32 %v752_v48, %v722_v19  ;;  %v556_v31 = vadd.f32 %v528_v23, %v462_v13  ;;  %v694_v32 = vrot.slane %v661_v21, 1  ;;  %v753_v35 = vmul.f32 %v1326_v28, %v740_v22  ;;  %v472_v23 = vld [vmem:[%s1271_s10 + $0x1c] sm:$0x1] }
  0x21   : > { %v829_v36 = vmul.f32 %v1318_v24, %v740_v22  ;;  %v830_v37 = vmul.f32 %v1318_v24, %v815_v26  ;;  %v426_v38 = vmul.f32 %v1256_v0, %v414_v27  ;;  %v442_v44 = vunpack.c.l.bf16 %v434_v29  ;;  %v435_v22 = vld [vmem:[%s1276_s13 + $0x18] sm:$0xf] }
  0x22   : > { %v798_v40 = vadd.f32 %v790_v8, %v760_v30  ;;  %v593_v42 = vadd.f32 %v585_v15, %v556_v31  ;;  %v695_v43 = vsel %vm522_vm0, %v693_v25, %v694_v32  ;;  %v479_v48 = vunpack.c.l.bf16 %v471_v34 }
  0x23   : > { %v862_v46 = vrot.slane %v829_v36, 1  ;;  %v863_v47 = vrot.slane %v830_v37, 1  ;;  %v494_v50 = vmul.f32 %v1266_v2, %v414_v27  ;;  %v455_v53 = vmul.f32 %v1261_v1, %v442_v44 }
  0x24   : > { %v891_v51 = vadd.f32 %v861_v9, %v798_v40  ;;  %v630_v52 = vadd.f32 %v622_v20, %v593_v42  ;;  %v573_v54 = vunpack.c.l.bf16 %v565_v39  ;;  %v791_v56 = vmul.f32 %v1341_v49, %v778_v33  ;;  %v603_v39 = vld [vmem:[%s1296_s28 + $0x18] sm:$0xf] }
  0x25   : > { %v495_v57 = vmul.f32 %v1266_v2, %v479_v48  ;;  %v529_v58 = vrot.slane %v494_v50, 1  ;;  %v610_v59 = vunpack.c.l.bf16 %v602_v45  ;;  %v864_v63 = vsel %vm522_vm0, %v862_v46, %v863_v47  ;;  %v640_v50 = vld [vmem:[%s1291_s20 + $0x1c] sm:$0x1] }
  0x26   : > { %v903_v61 = vadd.f32 %v1371_v41, %v891_v51  ;;  %v723_v62 = vadd.f32 %v695_v43, %v630_v52  ;;  %v463_v5 = vadd.f32 %v455_v53, %v426_v38  ;;  %v586_v8 = vmul.f32 %v1281_v3, %v573_v54  ;;  %v566_v38 = vld [vmem:[%s1291_s20 + $0x18] sm:$0xf] }
  0x27   : > { %v530_v7 = vrot.slane %v495_v57, 1  ;;  %v647_v9 = vunpack.c.l.bf16 %v639_v55  ;;  %v662_v10 = vmul.f32 %v1286_v4, %v573_v54  ;;  %v623_v14 = vmul.f32 %v1307_v16, %v610_v59  ;;  %v1111_v55 = vld [vmem:[%s1271_s10 + $0x20] sm:$0xf] }
  0x28   : > { %v911_v12 = vpack.c.bf16 %v903_v61, %v903_v61  ;;  %v761_v13 = vadd.f32 %v753_v35, %v723_v62  ;;  %v741_v15 = vunpack.c.l.bf16 %v1110_v60  ;;  %v816_v21 = vunpack.c.l.bf16 %v1128_v6  ;;  %v1129_v60 = vld [vmem:[%s1271_s10 + $0x24] sm:$0x1]  ;;  %v408_v61 = vld [vmem:[%s1271_s10 + $0x20] sm:$0xf] }
  0x29   : > { %v531_v18 = vsel %vm522_vm0, %v529_v58, %v530_v7  ;;  %v663_v19 = vmul.f32 %v1286_v4, %v647_v9  ;;  %v696_v20 = vrot.slane %v662_v10, 1  ;;  %v779_v29 = vunpack.c.l.bf16 %v1119_v11  ;;  %v1120_v7 = vld [vmem:[%s1276_s13 + $0x20] sm:$0xf] }
  0x2a   : > { %920 = vst.msk [vmem:[%s1388_s18] sm:$0xf] %vm919_vm1, %v911_v12  ;;  %v799_v25 = vadd.f32 %v791_v56, %v761_v13  ;;  %v557_v26 = vadd.f32 %v531_v18, %v463_v5  ;;  %v754_v27 = vmul.f32 %v1326_v28, %v741_v15  ;;  %v831_v31 = vmul.f32 %v1318_v24, %v741_v15 }
  0x2b   : > { %v697_v30 = vrot.slane %v663_v19, 1  ;;  %v832_v32 = vmul.f32 %v1318_v24, %v816_v21  ;;  %v415_v33 = vunpack.c.l.bf16 %v407_v17  ;;  %v443_v36 = vunpack.c.l.bf16 %v435_v22  ;;  %v436_v17 = vld [vmem:[%s1276_s13 + $0x20] sm:$0xf]  ;;  %v473_v22 = vld [vmem:[%s1271_s10 + $0x24] sm:$0x1] }
  0x2c   : > { %v892_v34 = vadd.f32 %v864_v63, %v799_v25  ;;  %v594_v35 = vadd.f32 %v586_v8, %v557_v26  ;;  %v480_v37 = vunpack.c.l.bf16 %v472_v23  ;;  %v865_v42 = vrot.slane %v831_v31, 1 }
  0x2d   : > { %v698_v40 = vsel %vm522_vm0, %v696_v20, %v697_v30  ;;  %v866_v43 = vrot.slane %v832_v32, 1  ;;  %v427_v44 = vmul.f32 %v1256_v0, %v415_v33  ;;  %v456_v47 = vmul.f32 %v1261_v1, %v443_v36 }
  0x2e   : > { %v904_v45 = vadd.f32 %v1371_v41, %v892_v34  ;;  %v631_v46 = vadd.f32 %v623_v14, %v594_v35  ;;  %v496_v48 = vmul.f32 %v1266_v2, %v415_v33  ;;  %v792_v51 = vmul.f32 %v1341_v49, %v779_v29  ;;  %v567_v33 = vld [vmem:[%s1291_s20 + $0x20] sm:$0xf] }
  0x2f   : > { %v497_v52 = vmul.f32 %v1266_v2, %v480_v37  ;;  %v574_v53 = vunpack.c.l.bf16 %v566_v38  ;;  %v611_v54 = vunpack.c.l.bf16 %v603_v39  ;;  %v464_v58 = vadd.f32 %v456_v47, %v427_v44  ;;  %v604_v34 = vld [vmem:[%s1296_s28 + $0x20] sm:$0xf]  ;;  %v641_v44 = vld [vmem:[%s1291_s20 + $0x24] sm:$0x1] }
  0x30   : > { %v912_v56 = vpack.c.bf16 %v904_v45, %v904_v45  ;;  %v724_v57 = vadd.f32 %v698_v40, %v631_v46  ;;  %v532_v59 = vrot.slane %v496_v48, 1  ;;  %v867_v62 = vsel %vm522_vm0, %v865_v42, %v866_v43 }
  0x31   : > { %v533_v63 = vrot.slane %v497_v52, 1  ;;  %v587_v5 = vmul.f32 %v1281_v3, %v574_v53  ;;  %v648_v6 = vunpack.c.l.bf16 %v640_v50  ;;  %v624_v9 = vmul.f32 %v1307_v16, %v611_v54  ;;  %v1112_v50 = vld [vmem:[%s1271_s10 + $0x28] sm:$0xf] }
  0x32   : > { %921 = vst.msk [vmem:[%s1388_s18 + $0x4] sm:$0xf] %vm919_vm1, %v912_v56  ;;  %v762_v8 = vadd.f32 %v754_v27, %v724_v57  ;;  %v664_v10 = vmul.f32 %v1286_v4, %v574_v53  ;;  %v742_v11 = vunpack.c.l.bf16 %v1111_v55  ;;  %v817_v14 = vunpack.c.l.bf16 %v1129_v60  ;;  %v1130_v55 = vld [vmem:[%s1271_s10 + $0x2c] sm:$0x1]  ;;  %v409_v56 = vld [vmem:[%s1271_s10 + $0x28] sm:$0xf] }
  0x33   : > { %v534_v12 = vsel %vm522_vm0, %v532_v59, %v533_v63  ;;  %v665_v13 = vmul.f32 %v1286_v4, %v648_v6  ;;  %v416_v15 = vunpack.c.l.bf16 %v408_v61  ;;  %v780_v21 = vunpack.c.l.bf16 %v1120_v7  ;;  %v1121_v61 = vld [vmem:[%s1276_s13 + $0x28] sm:$0xf] }
  0x34   : > { %v800_v18 = vadd.f32 %v792_v51, %v762_v8  ;;  %v558_v19 = vadd.f32 %v534_v12, %v464_v58  ;;  %v699_v20 = vrot.slane %v664_v10, 1  ;;  %v755_v25 = vmul.f32 %v1326_v28, %v742_v11 }
  0x35   : > { %v700_v23 = vrot.slane %v665_v13, 1  ;;  %v833_v26 = vmul.f32 %v1318_v24, %v742_v11  ;;  %v834_v27 = vmul.f32 %v1318_v24, %v817_v14  ;;  %v428_v31 = vmul.f32 %v1256_v0, %v416_v15  ;;  %v437_v11 = vld [vmem:[%s1276_s13 + $0x28] sm:$0xf] }
  0x36   : > { %v893_v29 = vadd.f32 %v867_v62, %v800_v18  ;;  %v595_v30 = vadd.f32 %v587_v5, %v558_v19  ;;  %v444_v32 = vunpack.c.l.bf16 %v436_v17  ;;  %v481_v38 = vunpack.c.l.bf16 %v473_v22  ;;  %v474_v17 = vld [vmem:[%s1271_s10 + $0x2c] sm:$0x1] }
  0x37   : > { %v701_v35 = vsel %vm522_vm0, %v699_v20, %v700_v23  ;;  %v868_v36 = vrot.slane %v833_v26, 1  ;;  %v869_v37 = vrot.slane %v834_v27, 1  ;;  %v498_v43 = vmul.f32 %v1266_v2, %v416_v15  ;;  %v568_v27 = vld [vmem:[%s1291_s20 + $0x28] sm:$0xf] }
  0x38   : > { %v905_v39 = vadd.f32 %v1371_v41, %v893_v29  ;;  %v632_v40 = vadd.f32 %v624_v9, %v595_v30  ;;  %v457_v42 = vmul.f32 %v1261_v1, %v444_v32  ;;  %v793_v45 = vmul.f32 %v1341_v49, %v780_v21  ;;  %v605_v29 = vld [vmem:[%s1296_s28 + $0x28] sm:$0xf] }
  0x39   : > { %v499_v46 = vmul.f32 %v1266_v2, %v481_v38  ;;  %v575_v47 = vunpack.c.l.bf16 %v567_v33  ;;  %v612_v48 = vunpack.c.l.bf16 %v604_v34  ;;  %v535_v54 = vrot.slane %v498_v43, 1  ;;  %v642_v38 = vld [vmem:[%s1291_s20 + $0x2c] sm:$0x1] }
  0x3a   : > { %v913_v51 = vpack.c.bf16 %v905_v39, %v905_v39  ;;  %v725_v52 = vadd.f32 %v701_v35, %v632_v40  ;;  %v465_v53 = vadd.f32 %v457_v42, %v428_v31  ;;  %v870_v57 = vsel %vm522_vm0, %v868_v36, %v869_v37 }
  0x3b   : > { %v536_v58 = vrot.slane %v499_v46, 1  ;;  %v588_v59 = vmul.f32 %v1281_v3, %v575_v47  ;;  %v649_v60 = vunpack.c.l.bf16 %v641_v44  ;;  %v625_v63 = vmul.f32 %v1307_v16, %v612_v48  ;;  %v1113_v44 = vld [vmem:[%s1271_s10 + $0x30] sm:$0xf] }
  0x3c   : > { %922 = vst.msk [vmem:[%s1388_s18 + $0x8] sm:$0xf] %vm919_vm1, %v913_v51  ;;  %v763_v62 = vadd.f32 %v755_v25, %v725_v52  ;;  %v666_v5 = vmul.f32 %v1286_v4, %v575_v47  ;;  %v743_v6 = vunpack.c.l.bf16 %v1112_v50  ;;  %v818_v9 = vunpack.c.l.bf16 %v1130_v55  ;;  %v1131_v50 = vld [vmem:[%s1271_s10 + $0x34] sm:$0x1]  ;;  %v410_v51 = vld [vmem:[%s1271_s10 + $0x30] sm:$0xf] }
  0x3d   : > { %v537_v7 = vsel %vm522_vm0, %v535_v54, %v536_v58  ;;  %v667_v8 = vmul.f32 %v1286_v4, %v649_v60  ;;  %v417_v10 = vunpack.c.l.bf16 %v409_v56  ;;  %v781_v15 = vunpack.c.l.bf16 %v1121_v61  ;;  %v1122_v56 = vld [vmem:[%s1276_s13 + $0x30] sm:$0xf] }
  0x3e   : > { %v801_v12 = vadd.f32 %v793_v45, %v763_v62  ;;  %v559_v13 = vadd.f32 %v537_v7, %v465_v53  ;;  %v702_v14 = vrot.slane %v666_v5, 1  ;;  %v756_v19 = vmul.f32 %v1326_v28, %v743_v6 }
  0x3f   : > { %v703_v18 = vrot.slane %v667_v8, 1  ;;  %v835_v20 = vmul.f32 %v1318_v24, %v743_v6  ;;  %v836_v21 = vmul.f32 %v1318_v24, %v818_v9  ;;  %v429_v25 = vmul.f32 %v1256_v0, %v417_v10  ;;  %v438_v6 = vld [vmem:[%s1276_s13 + $0x30] sm:$0xf] }
  0x40   : > { %v894_v22 = vadd.f32 %v870_v57, %v801_v12  ;;  %v596_v23 = vadd.f32 %v588_v59, %v559_v13  ;;  %v445_v26 = vunpack.c.l.bf16 %v437_v11  ;;  %v482_v33 = vunpack.c.l.bf16 %v474_v17  ;;  %v475_v11 = vld [vmem:[%s1271_s10 + $0x34] sm:$0x1] }
  0x41   : > { %v704_v30 = vsel %vm522_vm0, %v702_v14, %v703_v18  ;;  %v871_v31 = vrot.slane %v835_v20, 1  ;;  %v872_v32 = vrot.slane %v836_v21, 1  ;;  %v500_v37 = vmul.f32 %v1266_v2, %v417_v10  ;;  %v569_v21 = vld [vmem:[%s1291_s20 + $0x30] sm:$0xf] }
  0x42   : > { %v906_v34 = vadd.f32 %v1371_v41, %v894_v22  ;;  %v633_v35 = vadd.f32 %v625_v63, %v596_v23  ;;  %v458_v36 = vmul.f32 %v1261_v1, %v445_v26  ;;  %v794_v39 = vmul.f32 %v1341_v49, %v781_v15  ;;  %v606_v22 = vld [vmem:[%s1296_s28 + $0x30] sm:$0xf] }
  0x43   : > { %v501_v40 = vmul.f32 %v1266_v2, %v482_v33  ;;  %v576_v42 = vunpack.c.l.bf16 %v568_v27  ;;  %v613_v43 = vunpack.c.l.bf16 %v605_v29  ;;  %v538_v48 = vrot.slane %v500_v37, 1  ;;  %v643_v33 = vld [vmem:[%s1291_s20 + $0x34] sm:$0x1] }
  0x44   : > { %v914_v45 = vpack.c.bf16 %v906_v34, %v906_v34  ;;  %v726_v46 = vadd.f32 %v704_v30, %v633_v35  ;;  %v466_v47 = vadd.f32 %v458_v36, %v429_v25  ;;  %v873_v52 = vsel %vm522_vm0, %v871_v31, %v872_v32 }
  0x45   : > { %v539_v53 = vrot.slane %v501_v40, 1  ;;  %v589_v54 = vmul.f32 %v1281_v3, %v576_v42  ;;  %v650_v55 = vunpack.c.l.bf16 %v642_v38  ;;  %v626_v58 = vmul.f32 %v1307_v16, %v613_v43  ;;  %v1114_v38 = vld [vmem:[%s1271_s10 + $0x38] sm:$0xf] }
  0x46   : > { %923 = vst.msk [vmem:[%s1388_s18 + $0xc] sm:$0xf] %vm919_vm1, %v914_v45  ;;  %v764_v57 = vadd.f32 %v756_v19, %v726_v46  ;;  %v668_v59 = vmul.f32 %v1286_v4, %v576_v42  ;;  %v744_v60 = vunpack.c.l.bf16 %v1113_v44  ;;  %v819_v63 = vunpack.c.l.bf16 %v1131_v50  ;;  %v1132_v45 = vld [vmem:[%s1271_s10 + $0x3c] sm:$0x1]  ;;  %v411_v46 = vld [vmem:[%s1271_s10 + $0x38] sm:$0xf] }
  0x47   : > { %v540_v61 = vsel %vm522_vm0, %v538_v48, %v539_v53  ;;  %v669_v62 = vmul.f32 %v1286_v4, %v650_v55  ;;  %v418_v5 = vunpack.c.l.bf16 %v410_v51  ;;  %v782_v10 = vunpack.c.l.bf16 %v1122_v56 }
  0x48   : > { %v802_v7 = vadd.f32 %v794_v39, %v764_v57  ;;  %v560_v8 = vadd.f32 %v540_v61, %v466_v47  ;;  %v705_v9 = vrot.slane %v668_v59, 1  ;;  %v757_v13 = vmul.f32 %v1326_v28, %v744_v60  ;;  %v1123_v39 = vld [vmem:[%s1276_s13 + $0x38] sm:$0xf] }
  0x49   : > { %v706_v12 = vrot.slane %v669_v62, 1  ;;  %v837_v14 = vmul.f32 %v1318_v24, %v744_v60  ;;  %v838_v15 = vmul.f32 %v1318_v24, %v819_v63  ;;  %v430_v19 = vmul.f32 %v1256_v0, %v418_v5  ;;  %v439_v60 = vld [vmem:[%s1276_s13 + $0x38] sm:$0xf] }
  0x4a   : > { %v895_v17 = vadd.f32 %v873_v52, %v802_v7  ;;  %v597_v18 = vadd.f32 %v589_v54, %v560_v8  ;;  %v446_v20 = vunpack.c.l.bf16 %v438_v6  ;;  %v483_v27 = vunpack.c.l.bf16 %v475_v11  ;;  %v476_v6 = vld [vmem:[%s1271_s10 + $0x3c] sm:$0x1] }
  0x4b   : > { %v707_v23 = vsel %vm522_vm0, %v705_v9, %v706_v12  ;;  %v874_v25 = vrot.slane %v837_v14, 1  ;;  %v875_v26 = vrot.slane %v838_v15, 1  ;;  %v502_v32 = vmul.f32 %v1266_v2, %v418_v5  ;;  %v570_v15 = vld [vmem:[%s1291_s20 + $0x38] sm:$0xf] }
  0x4c   : > { %v907_v29 = vadd.f32 %v1371_v41, %v895_v17  ;;  %v634_v30 = vadd.f32 %v626_v58, %v597_v18  ;;  %v459_v31 = vmul.f32 %v1261_v1, %v446_v20  ;;  %v795_v34 = vmul.f32 %v1341_v49, %v782_v10  ;;  %v607_v17 = vld [vmem:[%s1296_s28 + $0x38] sm:$0xf] }
  0x4d   : > { %v503_v35 = vmul.f32 %v1266_v2, %v483_v27  ;;  %v577_v36 = vunpack.c.l.bf16 %v569_v21  ;;  %v614_v37 = vunpack.c.l.bf16 %v606_v22  ;;  %v541_v44 = vrot.slane %v502_v32, 1  ;;  %v1115_v32 = vld [vmem:[%s1271_s10 + $0x40] sm:$0xf] }
  0x4e   : > { %v915_v40 = vpack.c.bf16 %v907_v29, %v907_v29  ;;  %v727_v42 = vadd.f32 %v707_v23, %v634_v30  ;;  %v467_v43 = vadd.f32 %v459_v31, %v430_v19  ;;  %v876_v47 = vsel %vm522_vm0, %v874_v25, %v875_v26 }
  0x4f   : > { %v542_v48 = vrot.slane %v503_v35, 1  ;;  %v590_v50 = vmul.f32 %v1281_v3, %v577_v36  ;;  %v651_v51 = vunpack.c.l.bf16 %v643_v33  ;;  %v670_v53 = vmul.f32 %v1286_v4, %v577_v36 }
  0x50   : > { %924 = vst.msk [vmem:[%s1388_s18 + $0x10] sm:$0xf] %vm919_vm1, %v915_v40  ;;  %v765_v52 = vadd.f32 %v757_v13, %v727_v42  ;;  %v745_v54 = vunpack.c.l.bf16 %v1114_v38  ;;  %v783_v55 = vunpack.c.l.bf16 %v1123_v39  ;;  %v820_v58 = vunpack.c.l.bf16 %v1132_v45 }
  0x51   : > { %v543_v56 = vsel %vm522_vm0, %v541_v44, %v542_v48  ;;  %v671_v57 = vmul.f32 %v1286_v4, %v651_v51  ;;  %v419_v59 = vunpack.c.l.bf16 %v411_v46  ;;  %v627_v63 = vmul.f32 %v1307_v16, %v614_v37  ;;  %v1133_v37 = vld [vmem:[%s1271_s10 + $0x44] sm:$0x1]  ;;  %v1124_v46 = vld [vmem:[%s1276_s13 + $0x40] sm:$0xf] }
  0x52   : > { %v803_v61 = vadd.f32 %v795_v34, %v765_v52  ;;  %v561_v62 = vadd.f32 %v543_v56, %v467_v43  ;;  %v708_v5 = vrot.slane %v670_v53, 1  ;;  %v758_v8 = vmul.f32 %v1326_v28, %v745_v54 }
  0x53   : > { %v709_v7 = vrot.slane %v671_v57, 1  ;;  %v839_v9 = vmul.f32 %v1318_v24, %v745_v54  ;;  %v840_v10 = vmul.f32 %v1318_v24, %v820_v58  ;;  %v431_v13 = vmul.f32 %v1256_v0, %v419_v59  ;;  %v644_v0 = vld [vmem:[%s1291_s20 + $0x3c] sm:$0x1] }
  0x54   : > { %v896_v11 = vadd.f32 %v876_v47, %v803_v61  ;;  %v598_v12 = vadd.f32 %v590_v50, %v561_v62  ;;  %v447_v14 = vunpack.c.l.bf16 %v439_v60  ;;  %v796_v19 = vmul.f32 %v1341_v49, %v783_v55 }
  0x55   : > { %v710_v18 = vsel %vm522_vm0, %v708_v5, %v709_v7  ;;  %v877_v20 = vrot.slane %v839_v9, 1  ;;  %v484_v21 = vunpack.c.l.bf16 %v476_v6  ;;  %v504_v26 = vmul.f32 %v1266_v2, %v419_v59 }
  0x56   : > { %v908_v22 = vadd.f32 %v1371_v41, %v896_v11  ;;  %v635_v23 = vadd.f32 %v627_v63, %v598_v12  ;;  %v460_v25 = vmul.f32 %v1261_v1, %v447_v14  ;;  %v878_v27 = vrot.slane %v840_v10, 1 }
  0x57   : > { %v505_v29 = vmul.f32 %v1266_v2, %v484_v21  ;;  %v578_v30 = vunpack.c.l.bf16 %v570_v15  ;;  %v615_v31 = vunpack.c.l.bf16 %v607_v17  ;;  %v544_v36 = vrot.slane %v504_v26, 1 }
  0x58   : > { %v916_v33 = vpack.c.bf16 %v908_v22, %v908_v22  ;;  %v728_v34 = vadd.f32 %v710_v18, %v635_v23  ;;  %v468_v35 = vadd.f32 %v460_v25, %v431_v13  ;;  %v652_v39 = vunpack.c.l.bf16 %v644_v0 }
  0x59   : > { %v545_v38 = vrot.slane %v505_v29, 1  ;;  %v591_v40 = vmul.f32 %v1281_v3, %v578_v30  ;;  %v672_v42 = vmul.f32 %v1286_v4, %v578_v30  ;;  %v746_v43 = vunpack.c.l.bf16 %v1115_v32 }
  0x5a   : > { %925 = vst.msk [vmem:[%s1388_s18 + $0x14] sm:$0xf] %vm919_vm1, %v916_v33  ;;  %v766_v1 = vadd.f32 %v758_v8, %v728_v34  ;;  %v879_v2 = vsel %vm522_vm0, %v877_v20, %v878_v27  ;;  %v673_v45 = vmul.f32 %v1286_v4, %v652_v39  ;;  %v821_v47 = vunpack.c.l.bf16 %v1133_v37 }
  0x5b   : > { %v546_v44 = vsel %vm522_vm0, %v544_v36, %v545_v38  ;;  %v628_v51 = vmul.f32 %v1307_v16, %v615_v31  ;;  %v711_v52 = vrot.slane %v672_v42, 1  ;;  %v841_v3 = vmul.f32 %v1318_v24, %v746_v43 }
  0x5c   : > { %v804_v48 = vadd.f32 %v796_v19, %v766_v1  ;;  %v562_v50 = vadd.f32 %v546_v44, %v468_v35  ;;  %v712_v53 = vrot.slane %v673_v45, 1  ;;  %v842_v54 = vmul.f32 %v1318_v24, %v821_v47 }
  0x5d   : > { %v784_v57 = vunpack.c.l.bf16 %v1124_v46  ;;  %v759_v60 = vmul.f32 %v1326_v28, %v746_v43  ;;  %v880_v61 = vrot.slane %v841_v3, 1 }
  0x5e   : > { %v897_v55 = vadd.f32 %v879_v2, %v804_v48  ;;  %v599_v56 = vadd.f32 %v591_v40, %v562_v50  ;;  %v713_v58 = vsel %vm522_vm0, %v711_v52, %v712_v53  ;;  %v881_v16 = vrot.slane %v842_v54, 1 }
  0x5f   : > { %v797_v5 = vmul.f32 %v1341_v49, %v784_v57 }
  0x60   : > { %v909_v4 = vadd.f32 %v1371_v41, %v897_v55  ;;  %v636_v59 = vadd.f32 %v628_v51, %v599_v56  ;;  %v882_v6 = vsel %vm522_vm0, %v880_v61, %v881_v16 }
  0x62   : > { %v917_v62 = vpack.c.bf16 %v909_v4, %v909_v4  ;;  %v729_v63 = vadd.f32 %v713_v58, %v636_v59 }
  0x64   : > { %926 = vst.msk [vmem:[%s1388_s18 + $0x18] sm:$0xf] %vm919_vm1, %v917_v62  ;;  %v767_v24 = vadd.f32 %v759_v60, %v729_v63 }
  0x66   : > { %v805_v7 = vadd.f32 %v797_v5, %v767_v24 }
  0x68   : > { %v898_v8 = vadd.f32 %v882_v6, %v805_v7 }
  0x6a   : > { %v910_v9 = vadd.f32 %v1371_v41, %v898_v8 }
  0x6c   : > { %v918_v10 = vpack.c.bf16 %v910_v9, %v910_v9 }
  0x6e   : > { %927 = vst.msk [vmem:[%s1388_s18 + $0x1c] sm:$0xf] %vm919_vm1, %v918_v10 }
  0x6f PF: > { %s16_s23 = sadd.s32 1, %s1195_s23   ;;  %s1561_s21 = smov %s1191_s22 }
  0x70   : > { %p13_p5 = scmp.ge.s32.totalorder %s16_s23, 4   ;;  %s1562_s22 = smov %s1564_s24 }
  0x72   :  { %15 = sbr.rel (!%p13_p5) target bundleno = 2 (0x2), region = 99 }

// kernel: dual_gcn_forward.11
= control target key start
LH: loop header
LB: loop body
LE: loop exit
PB: predicated region body
PF: predicated region fallthrough
CT: control target
= control target key end

     0   :  { %s589_s12 = smov 0   ;;  %s591_s13 = smov 0   ;;  %s638_s0 = inlined_call_operand.vmem [shape: bf16[16,2], index: 0, kind: input, shape index: {}]   ;;  %s639_s1 = inlined_call_operand.vmem [shape: bf16[2,2,512], index: 1, kind: input, shape index: {}]   ;;  %s640_s2 = inlined_call_operand.vmem [shape: bf16[2,16,512], index: 2, kind: input, shape index: {}]   ;;  %s641_s3 = inlined_call_operand.vmem [shape: bf16[2,16,512], index: 3, kind: output, shape index: {}]  }
   0x1   :  { %s593_s14 = smov 0  }
   0x2 LB: > { %s25_s15 = sadd.s32 1, %s563_s13  ;;  %p502_p0 = scmp.ge.s32.totalorder %s567_s14, 1  ;;  %s567_s14 = sphi %s593_s14, %s13_s14   ;;  %s563_s13 = sphi %s591_s13, %s643_s13   ;;  %s559_s12 = sphi %s589_s12, %s642_s12  }
   0x3   : > { %p27_p1 = scmp.ge.s32.totalorder %s25_s15, 2  ;;  %p179_p2 = scmp.lt.s32.totalorder %s567_s14, 3 }
   0x5   : > { %s645_s15 = smov (%p27_p1, %s25_s15), 0  ;;  %p180_p3 = pnand %p502_p0, %p179_p2 }
   0x6   : > { %p228_p4 = scmp.lt.s32.totalorder (!%p180_p3), %s559_s12, 1 }
   0x7   : > { %183 = sbr.rel (%p180_p3) target bundleno = 176 (0xb0), region = 32 }
   0xc   : > { %s647_s12 = smov (!%p228_p4, %s559_s12), 1  ;;  %vm273_vm0 = vcmask 1040384   ;;  %v520_v8 = vld [vmem:[%s638_s0] sm:$0xff]  ;;  %vm269_vm1 = vcmask 15360  }
   0xd   : > { %s503_s16 = sshll.u32 %s647_s12, 2  ;;  %s518_s22 = sshll.u32 %s647_s12, 5 }
   0xe   : > { %s231_s19 = scalar_lea.vmem %s639_s1, %s503_s16  ;;  %s241_s25 = scalar_lea.vmem %s640_s2, %s518_s22 }
   0xf   : > { %v257_v0 = vld [vmem:[%s231_s19] sm:$0xf]  ;;  %v339_v17 = vld [vmem:[%s241_s25 + $0x8] sm:$0xff]  ;;  %v340_v18 = vld [vmem:[%s241_s25 + $0x10] sm:$0xff]  ;;  %s623_s28 = scalar_lea.vmem %s641_s3, %s518_s22 }
  0x10   : > { %264 = vst [vmem:[#allocation1] ss:$9 sm:$0xff] %v257_v0  ;;  %v338_v10 = vld [vmem:[%s241_s25] sm:$0xff]  ;;  %v344_v21 = vunpack.c.l.bf16 %v339_v17  ;;  %v345_v22 = vunpack.c.h.bf16 %v339_v17  ;;  %v346_v24 = vunpack.c.l.bf16 %v340_v18  ;;  %v347_v25 = vunpack.c.h.bf16 %v340_v18  ;;  %v341_v34 = vld [vmem:[%s241_s25 + $0x18] sm:$0xff] }
  0x11   : > { %v342_v11 = vunpack.c.l.bf16 %v338_v10  ;;  %v343_v12 = vunpack.c.h.bf16 %v338_v10  ;;  %v348_v40 = vunpack.c.l.bf16 %v341_v34  ;;  %v349_v41 = vunpack.c.h.bf16 %v341_v34 }
  0x17   : > { %v265_v1 = vld [vmem:[#allocation1] sm:$0xff]  ;;  %v266_v2 = vld [vmem:[#allocation1 + $0x9] sm:$0xff]  ;;  %v267_v3 = vld [vmem:[#allocation1 + $0x12] sm:$0xff] }
  0x18   : > { %v274_v4 = vsel %vm273_vm0, %v265_v1, 0  ;;  %v276_v5 = vsel %vm273_vm0, %v266_v2, 0  ;;  %v278_v6 = vsel %vm273_vm0, %v267_v3, 0  ;;  %v268_v7 = vld [vmem:[#allocation1 + $0x1b] sm:$0xff] }
  0x19   : > { %289 = vmatpush.bf16.msra.mxu0 %v274_v4  ;;  %303 = vmatpush.bf16.msra.mxu1 %v276_v5  ;;  %v280_v9 = vsel %vm273_vm0, %v268_v7, 0 }
  0x1a   : > { %317 = vmatpush.bf16.msra.mxu2 %v278_v6  ;;  %331 = vmatpush.bf16.msra.mxu3 %v280_v9 }
  0x1c   : > { %512 = vmatmul.msk.bf16.vlgmr.msra.gmra.mxu0 %vm269_vm1, %v520_v8  ;;  %513 = vmatmul.msk.bf16.vlgmr.msra.gmra.mxu1 %vm269_vm1, %v520_v8 }
  0x1d   : > { %514 = vmatmul.msk.bf16.vlgmr.msra.gmra.mxu2 %vm269_vm1, %v520_v8  ;;  %515 = vmatmul.msk.bf16.vlgmr.msra.gmra.mxu3 %vm269_vm1, %v520_v8 }
  0x99   : > { %v291_v13 = vpop.f32.mrf.mxu0  ;;  %v305_v14 = vpop.f32.mrf.mxu1 }
  0x9a   : > { %v350_v15 = vmul.f32 %v342_v11, %v291_v13  ;;  %v351_v16 = vmul.f32 %v343_v12, %v305_v14 }
  0x9c   : > { %v358_v19 = vadd.f32 %v350_v15, %v342_v11  ;;  %v359_v20 = vadd.f32 %v351_v16, %v343_v12 }
  0x9e   : > { %v366_v23 = vpack.c.bf16 %v359_v20, %v358_v19 }
  0xa0   : > { %370 = vst [vmem:[%s623_s28] sm:$0xff] %v366_v23  ;;  %v319_v26 = vpop.f32.mrf.mxu2  ;;  %v333_v27 = vpop.f32.mrf.mxu3 }
  0xa1   : > { %v352_v28 = vmul.f32 %v344_v21, %v319_v26  ;;  %v353_v29 = vmul.f32 %v345_v22, %v333_v27  ;;  %v293_v30 = vpop.f32.mrf.mxu0  ;;  %v307_v31 = vpop.f32.mrf.mxu1 }
  0xa2   : > { %v354_v32 = vmul.f32 %v346_v24, %v293_v30  ;;  %v355_v33 = vmul.f32 %v347_v25, %v307_v31 }
  0xa3   : > { %v360_v35 = vadd.f32 %v352_v28, %v344_v21  ;;  %v361_v36 = vadd.f32 %v353_v29, %v345_v22 }
  0xa4   : > { %v362_v37 = vadd.f32 %v354_v32, %v346_v24  ;;  %v363_v38 = vadd.f32 %v355_v33, %v347_v25 }
  0xa5   : > { %v367_v39 = vpack.c.bf16 %v361_v36, %v360_v35 }
  0xa6   : > { %v368_v42 = vpack.c.bf16 %v363_v38, %v362_v37 }
  0xa7   : > { %371 = vst [vmem:[%s623_s28 + $0x8] sm:$0xff] %v367_v39 }
  0xa8   : > { %372 = vst [vmem:[%s623_s28 + $0x10] sm:$0xff] %v368_v42  ;;  %v321_v43 = vpop.f32.mrf.mxu2  ;;  %v335_v44 = vpop.f32.mrf.mxu3 }
  0xa9   : > { %v356_v45 = vmul.f32 %v348_v40, %v321_v43  ;;  %v357_v46 = vmul.f32 %v349_v41, %v335_v44 }
  0xab   : > { %v364_v47 = vadd.f32 %v356_v45, %v348_v40  ;;  %v365_v48 = vadd.f32 %v357_v46, %v349_v41 }
  0xad   : > { %v369_v49 = vpack.c.bf16 %v365_v48, %v364_v47 }
  0xaf   : > { %373 = vst [vmem:[%s623_s28 + $0x18] sm:$0xff] %v369_v49 }
  0xb0 PF: > { %s13_s14 = sadd.s32 1, %s567_s14   ;;  %s642_s12 = smov %s563_s13 }
  0xb1   : > { %p10_p5 = scmp.ge.s32.totalorder %s13_s14, 4   ;;  %s643_s13 = smov %s645_s15 }
  0xb3   :  { %12 = sbr.rel (!%p10_p5) target bundleno = 2 (0x2), region = 68 }

// kernel: dual_gcn_forward.12
= control target key start
LH: loop header
LB: loop body
LE: loop exit
PB: predicated region body
PF: predicated region fallthrough
CT: control target
= control target key end

     0   :  { %s1218_s24 = smov 0   ;;  %s1220_s25 = smov 0   ;;  %s1400_s0 = inlined_call_operand.vmem [shape: bf16[2,256,32], index: 0, kind: input, shape index: {}]   ;;  %s1401_s1 = inlined_call_operand.vmem [shape: bf16[32,24], index: 1, kind: input, shape index: {}]   ;;  %s1402_s2 = inlined_call_operand.vmem [shape: f32[1,24], index: 2, kind: input, shape index: {}]   ;;  %s1403_s3 = inlined_call_operand.vmem [shape: bf16[8,8], index: 3, kind: input, shape index: {}]   ;;  %s1404_s4 = inlined_call_operand.vmem [shape: f32[1,8], index: 4, kind: input, shape index: {}]   ;;  %s1405_s5 = inlined_call_operand.vmem [shape: bf16[16,16], index: 5, kind: input, shape index: {}]   ;;  %s1406_s6 = inlined_call_operand.vmem [shape: f32[1,16], index: 6, kind: input, shape index: {}]   ;;  %s1407_s7 = inlined_call_operand.vmem [shape: f32[2,8,16], index: 7, kind: output, shape index: {}]  }
   0x1   :  { %s1222_s26 = smov 0  }
   0x2 LB: > { %s29_s27 = sadd.s32 1, %s1169_s25  ;;  %p978_p0 = scmp.ge.s32.totalorder %s1173_s26, 1  ;;  %s1173_s26 = sphi %s1222_s26, %s17_s26   ;;  %s1169_s25 = sphi %s1220_s25, %s1409_s25   ;;  %s1165_s24 = sphi %s1218_s24, %s1408_s24  }
   0x3   : > { %p31_p1 = scmp.ge.s32.totalorder %s29_s27, 2  ;;  %p256_p2 = scmp.lt.s32.totalorder %s1173_s26, 3 }
   0x5   : > { %s1411_s27 = smov (%p31_p1, %s29_s27), 0  ;;  %p257_p3 = pnand %p978_p0, %p256_p2 }
   0x6   : > { %p292_p4 = scmp.lt.s32.totalorder (!%p257_p3), %s1165_s24, 1  ;;  %s1175_s15 = smov (!%p257_p3), 112  }
   0x7   : > { %260 = sbr.rel (%p257_p3) target bundleno = 1056 (0x420), region = 48 }
   0xc   : > { %v1096_v0 = vld [vmem:[%s1401_s1 + $0x8] sm:$0xff]  ;;  %v1095_v1 = vld [vmem:[%s1401_s1] sm:$0xff]  ;;  %s1413_s24 = smov (!%p292_p4, %s1165_s24), 1  ;;  %vm445_vm0 = vcmask 261120   ;;  %vm840_vm1 = vcmask 1043456   ;;  %vm310_vm2 = vcmask 64512  }
   0xd   : > { %500 = vmatpush.bf16.msra.mxu0 %v1096_v0  ;;  %1098 = vmatpush.bf16.msra.mxu1 %v1096_v0  ;;  %s1078_s9 = sshll.u32 %s1413_s24, 7  ;;  %v1285_v20 = vld [vmem:[%s1402_s2] ss:$0 sm:$0xff]  ;;  %vm889_vm3 = vcmask 130048   ;;  %s981_s22 = sshll.u32 %s1413_s24, 3 }
   0xe   : > { %1099 = vmatpush.bf16.msra.mxu2 %v1096_v0  ;;  %1100 = vmatpush.bf16.msra.mxu3 %v1096_v0  ;;  %s1248_s12 = scalar_lea.vmem %s1400_s0, %s1078_s9  ;;  %s304_s8 = scalar_lea.vmem %s1407_s7, %s981_s22 }
   0xf   : > { %v1079_v2 = vld [vmem:[%s1248_s12] sm:$0xff]  ;;  %v1085_v3 = vld [vmem:[%s1248_s12 + $0x30] sm:$0xff]  ;;  %v1080_v6 = vld [vmem:[%s1248_s12 + $0x8] sm:$0xff] }
  0x10   : > { %v1087_v4 = vld [vmem:[%s1248_s12 + $0x40] sm:$0xff]  ;;  %v1086_v7 = vld [vmem:[%s1248_s12 + $0x38] sm:$0xff]  ;;  %v1088_v8 = vld [vmem:[%s1248_s12 + $0x48] sm:$0xff] }
  0x11   : > { %501 = vmatpush.bf16.msra.mxu0 %v1095_v1  ;;  %1101 = vmatpush.bf16.msra.mxu1 %v1095_v1  ;;  %v1091_v5 = vld [vmem:[%s1248_s12 + $0x60] sm:$0xff]  ;;  %v1092_v9 = vld [vmem:[%s1248_s12 + $0x68] sm:$0xff]  ;;  %v1081_v10 = vld [vmem:[%s1248_s12 + $0x10] sm:$0xff] }
  0x12   : > { %1102 = vmatpush.bf16.msra.mxu2 %v1095_v1  ;;  %1103 = vmatpush.bf16.msra.mxu3 %v1095_v1  ;;  %v1089_v11 = vld [vmem:[%s1248_s12 + $0x50] sm:$0xff]  ;;  %v1082_v13 = vld [vmem:[%s1248_s12 + $0x18] sm:$0xff]  ;;  %v1083_v16 = vld [vmem:[%s1248_s12 + $0x20] sm:$0xff] }
  0x13   : > { %v1093_v12 = vld [vmem:[%s1248_s12 + $0x70] sm:$0xff]  ;;  %v1090_v14 = vld [vmem:[%s1248_s12 + $0x58] sm:$0xff]  ;;  %v1084_v17 = vld [vmem:[%s1248_s12 + $0x28] sm:$0xff] }
  0x14   : > { %1054 = vmatmul.msk.bf16.vlgmr.msra.gmra.mxu0 %vm445_vm0, %v1079_v2  ;;  %1060 = vmatmul.msk.bf16.vlgmr.msra.gmra.mxu1 %vm445_vm0, %v1085_v3  ;;  %v1094_v15 = vld [vmem:[%s1248_s12 + $0x78] sm:$0xff] }
  0x15   : > { %1062 = vmatmul.msk.bf16.vlgmr.msra.gmra.mxu2 %vm445_vm0, %v1087_v4  ;;  %1066 = vmatmul.msk.bf16.vlgmr.msra.gmra.mxu3 %vm445_vm0, %v1091_v5 }
  0x24   : > { %1055 = vmatmul.msk.bf16.gmra.mxu0 %vm445_vm0, %v1080_v6  ;;  %1061 = vmatmul.msk.bf16.gmra.mxu1 %vm445_vm0, %v1086_v7 }
  0x25   : > { %1063 = vmatmul.msk.bf16.gmra.mxu2 %vm445_vm0, %v1088_v8  ;;  %1067 = vmatmul.msk.bf16.gmra.mxu3 %vm445_vm0, %v1092_v9 }
  0x34   : > { %1056 = vmatmul.msk.bf16.gmra.mxu0 %vm445_vm0, %v1081_v10 }
  0x35   : > { %1064 = vmatmul.msk.bf16.gmra.mxu2 %vm445_vm0, %v1089_v11  ;;  %1068 = vmatmul.msk.bf16.gmra.mxu3 %vm445_vm0, %v1093_v12 }
  0x44   : > { %1057 = vmatmul.msk.bf16.gmra.mxu0 %vm445_vm0, %v1082_v13 }
  0x45   : > { %1065 = vmatmul.msk.bf16.gmra.mxu2 %vm445_vm0, %v1090_v14  ;;  %1069 = vmatmul.msk.bf16.gmra.mxu3 %vm445_vm0, %v1094_v15 }
  0x54   : > { %1058 = vmatmul.msk.bf16.gmra.mxu0 %vm445_vm0, %v1083_v16 }
  0x64   : > { %1059 = vmatmul.msk.bf16.gmra.mxu0 %vm445_vm0, %v1084_v17 }
  0x91   : > { %v503_v18 = vpop.f32.mrf.mxu0  ;;  %v533_v19 = vpop.f32.mrf.mxu1 }
  0x92   : > { %v504_v21 = vadd.f32 %v1285_v20, %v503_v18  ;;  %v534_v22 = vadd.f32 %v1285_v20, %v533_v19 }
  0x94   : > { %v583_v23 = vpack.c.bf16 %v504_v21, %v504_v21  ;;  %v595_v24 = vpack.c.bf16 %v534_v22, %v534_v22 }
  0x96   : > { %v649_v32 = vunpack.c.l.b16 %v583_v23  ;;  %v661_v33 = vunpack.c.l.b16 %v595_v24 }
  0x98   : > { %v543_v25 = vpop.f32.mrf.mxu2  ;;  %v563_v26 = vpop.f32.mrf.mxu3 }
  0x99   : > { %v505_v27 = vpop.f32.mrf.mxu0  ;;  %v535_v28 = vpop.f32.mrf.mxu1  ;;  %v564_v31 = vadd.f32 %v1285_v20, %v563_v26  ;;  %v544_v36 = vadd.f32 %v1285_v20, %v543_v25 }
  0x9a   : > { %v506_v29 = vadd.f32 %v1285_v20, %v505_v27  ;;  %v536_v30 = vadd.f32 %v1285_v20, %v535_v28 }
  0x9b   : > { %v607_v39 = vpack.c.bf16 %v564_v31, %v564_v31  ;;  %v599_v44 = vpack.c.bf16 %v544_v36, %v544_v36 }
  0x9c   : > { %v584_v34 = vpack.c.bf16 %v506_v29, %v506_v29  ;;  %v596_v35 = vpack.c.bf16 %v536_v30, %v536_v30 }
  0x9d   : > { %v673_v49 = vunpack.c.l.b16 %v607_v39  ;;  %v665_v54 = vunpack.c.l.b16 %v599_v44 }
  0x9e   : > { %v650_v37 = vunpack.c.l.b16 %v584_v34  ;;  %v662_v38 = vunpack.c.l.b16 %v596_v35 }
  0xa0   : > { %v1293_v40 = vpack.c.b16 %v650_v37, %v649_v32  ;;  %v545_v41 = vpop.f32.mrf.mxu2  ;;  %v565_v42 = vpop.f32.mrf.mxu3  ;;  %v1295_v43 = vpack.c.b16 %v662_v38, %v661_v33 }
  0xa1   : > { %v546_v45 = vadd.f32 %v1285_v20, %v545_v41  ;;  %v566_v46 = vadd.f32 %v1285_v20, %v565_v42  ;;  %v508_v47 = vpop.f32.mrf.mxu0  ;;  %v538_v48 = vpop.f32.mrf.mxu1 }
  0xa2   : > { %757 = vrot.lane.b32.xlu2 %v1295_v43, %s1175_s15  ;;  %v509_v52 = vadd.f32 %v1285_v20, %v508_v47  ;;  %v539_v53 = vadd.f32 %v1285_v20, %v538_v48 }
  0xa3   : > { %v600_v50 = vpack.c.bf16 %v546_v45, %v546_v45  ;;  %v608_v51 = vpack.c.bf16 %v566_v46, %v566_v46 }
  0xa4   : > { %v585_v59 = vpack.c.bf16 %v509_v52, %v509_v52  ;;  %v597_v60 = vpack.c.bf16 %v539_v53, %v539_v53 }
  0xa5   : > { %v666_v55 = vunpack.c.l.b16 %v600_v50  ;;  %v674_v56 = vunpack.c.l.b16 %v608_v51 }
  0xa6   : > { %v651_v4 = vunpack.c.l.b16 %v585_v59  ;;  %v663_v5 = vunpack.c.l.b16 %v597_v60 }
  0xa7   : > { %v1303_v57 = vpack.c.b16 %v666_v55, %v665_v54  ;;  %v1305_v58 = vpack.c.b16 %v674_v56, %v673_v49 }
  0xa8   : > { %v1307_v61 = vpop.f32.mrf.mxu2  ;;  %v568_v62 = vpop.f32.mrf.mxu3 }
  0xa9   : > { %v510_v63 = vpop.f32.mrf.mxu0  ;;  %v540_v0 = vpop.f32.mrf.mxu1  ;;  %v569_v3 = vadd.f32 %v1285_v20, %v568_v62 }
  0xaa   : > { %v511_v1 = vadd.f32 %v1285_v20, %v510_v63  ;;  %v541_v2 = vadd.f32 %v1285_v20, %v540_v0  ;;  %769 = vrot.lane.b32.xlu2 %v1305_v58, %s1175_s15 }
  0xab   : > { %v609_v10 = vpack.c.bf16 %v569_v3, %v569_v3 }
  0xac   : > { %v586_v6 = vpack.c.bf16 %v511_v1, %v511_v1  ;;  %v598_v7 = vpack.c.bf16 %v541_v2, %v541_v2 }
  0xad   : > { %v675_v17 = vunpack.c.l.b16 %v609_v10 }
  0xae   : > { %v652_v8 = vunpack.c.l.b16 %v586_v6  ;;  %v664_v9 = vunpack.c.l.b16 %v598_v7 }
  0xb0   : > { %v1314_v11 = vpack.c.b16 %v652_v8, %v651_v4  ;;  %v550_v12 = vpop.f32.mrf.mxu2  ;;  %v570_v13 = vpop.f32.mrf.mxu3  ;;  %v1316_v14 = vpack.c.b16 %v664_v9, %v663_v5 }
  0xb1   : > { %v571_v15 = vadd.f32 %v1285_v20, %v570_v13  ;;  %v513_v16 = vpop.f32.mrf.mxu0  ;;  %v551_v13 = vadd.f32 %v1285_v20, %v550_v12 }
  0xb2   : > { %759 = vrot.lane.b32.xlu1 %v1316_v14, %s1175_s15  ;;  %v514_v19 = vadd.f32 %v1285_v20, %v513_v16 }
  0xb3   : > { %v610_v18 = vpack.c.bf16 %v571_v15, %v571_v15 }
  0xb4   : > { %v587_v23 = vpack.c.bf16 %v514_v19, %v514_v19  ;;  %v549_v19 = vadd.f32 %v1285_v20, %v1307_v61 }
  0xb5   : > { %v676_v21 = vunpack.c.l.b16 %v610_v18 }
  0xb6   : > { %v653_v28 = vunpack.c.l.b16 %v587_v23 }
  0xb7   : > { %v1322_v22 = vpack.c.b16 %v676_v21, %v675_v17 }
  0xb8   : > { %v553_v24 = vpop.f32.mrf.mxu2  ;;  %v573_v25 = vpop.f32.mrf.mxu3 }
  0xb9   : > { %v515_v26 = vpop.f32.mrf.mxu0  ;;  %v574_v39 = vadd.f32 %v1285_v20, %v573_v25  ;;  %v602_v25 = vpack.c.bf16 %v551_v13, %v551_v13 }
  0xba   : > { %v516_v27 = vadd.f32 %v1285_v20, %v515_v26  ;;  %771 = vrot.lane.b32.xlu1 %v1322_v22, %s1175_s15 }
  0xbb   : > { %v611_v45 = vpack.c.bf16 %v574_v39, %v574_v39  ;;  %v668_v61 = vunpack.c.l.b16 %v602_v25 }
  0xbc   : > { %v588_v29 = vpack.c.bf16 %v516_v27, %v516_v27 }
  0xbd   : > { %v677_v56 = vunpack.c.l.b16 %v611_v45 }
  0xbe   : > { %v654_v30 = vunpack.c.l.b16 %v588_v29  ;;  %v601_v29 = vpack.c.bf16 %v549_v19, %v549_v19 }
  0xc0   : > { %v1327_v31 = vpack.c.b16 %v654_v30, %v653_v28  ;;  %v555_v32 = vpop.f32.mrf.mxu2  ;;  %v575_v33 = vpop.f32.mrf.mxu3  ;;  %v554_v28 = vadd.f32 %v1285_v20, %v553_v24 }
  0xc1   : > { %v518_v34 = vpop.f32.mrf.mxu0  ;;  %v576_v41 = vadd.f32 %v1285_v20, %v575_v33  ;;  %v556_v23 = vadd.f32 %v1285_v20, %v555_v32 }
  0xc2   : > { %v519_v59 = vadd.f32 %v1285_v20, %v518_v34  ;;  %v603_v32 = vpack.c.bf16 %v554_v28, %v554_v28  ;;  %v667_v34 = vunpack.c.l.b16 %v601_v29 }
  0xc3   : > { %v612_v48 = vpack.c.bf16 %v576_v41, %v576_v41  ;;  %v604_v30 = vpack.c.bf16 %v556_v23, %v556_v23 }
  0xc4   : > { %v589_v5 = vpack.c.bf16 %v519_v59, %v519_v59  ;;  %v690_v24 = vpack.c.b16 %v668_v61, %v667_v34 }
  0xc5   : > { %v678_v63 = vunpack.c.l.b16 %v612_v48 }
  0xc6   : > { %v655_v15 = vunpack.c.l.b16 %v589_v5 }
  0xc7   : > { %v695_v9 = vpack.c.b16 %v678_v63, %v677_v56  ;;  %v832_v56 = vld [vmem:[%s1403_s3] sm:$0xf] }
  0xc8   : > { %v558_v35 = vpop.f32.mrf.mxu2  ;;  %v578_v36 = vpop.f32.mrf.mxu3  ;;  %v842_v59 = vsel %vm840_vm1, %v832_v56, 0 }
  0xc9   : > { %v520_v37 = vpop.f32.mrf.mxu0  ;;  %v579_v38 = vadd.f32 %v1285_v20, %v578_v36  ;;  %v559_v42 = vadd.f32 %v1285_v20, %v558_v35  ;;  %v670_v35 = vunpack.c.l.b16 %v604_v30  ;;  %851 = vmatpush.bf16.msrb.mxu3 %v842_v59 }
  0xca   : > { %v521_v60 = vadd.f32 %v1285_v20, %v520_v37  ;;  %v669_v37 = vunpack.c.l.b16 %v603_v32 }
  0xcb   : > { %v613_v44 = vpack.c.bf16 %v579_v38, %v579_v38  ;;  %v605_v49 = vpack.c.bf16 %v559_v42, %v559_v42 }
  0xcc   : > { %v590_v6 = vpack.c.bf16 %v521_v60, %v521_v60  ;;  %v691_v39 = vpack.c.b16 %v670_v35, %v669_v37 }
  0xcd   : > { %v679_v53 = vunpack.c.l.b16 %v613_v44  ;;  %v671_v0 = vunpack.c.l.b16 %v605_v49 }
  0xce   : > { %v656_v16 = vunpack.c.l.b16 %v590_v6 }
  0xd0   : > { %v560_v46 = vpop.f32.mrf.mxu2  ;;  %v580_v47 = vpop.f32.mrf.mxu3  ;;  %v684_v26 = vpack.c.b16 %v656_v16, %v655_v15  ;;  %v1149_v15 = vld [vmem:[%s1404_s4] ss:$0 sm:$0xff] }
  0xd1   : > { %v561_v50 = vadd.f32 %v1285_v20, %v560_v46  ;;  %v581_v51 = vadd.f32 %v1285_v20, %v580_v47  ;;  %v523_v52 = vpop.f32.mrf.mxu0 }
  0xd2   : > { %v524_v62 = vadd.f32 %v1285_v20, %v523_v52 }
  0xd3   : > { %v606_v54 = vpack.c.bf16 %v561_v50, %v561_v50  ;;  %v614_v55 = vpack.c.bf16 %v581_v51, %v581_v51 }
  0xd4   : > { %v591_v7 = vpack.c.bf16 %v524_v62, %v524_v62  ;;  %v1176_v62 = vmov 0.0  }
  0xd5   : > { %v672_v1 = vunpack.c.l.b16 %v606_v54  ;;  %v680_v2 = vunpack.c.l.b16 %v614_v55  ;;  %311 = vst.msk [vmem:[#allocation2] sm:$0xff] %vm310_vm2, %v1176_v62 }
  0xd6   : > { %v657_v17 = vunpack.c.l.b16 %v591_v7  ;;  %312 = vst.msk [vmem:[#allocation2 + $0x8] sm:$0xff] %vm310_vm2, %v1176_v62 }
  0xd7   : > { %v692_v3 = vpack.c.b16 %v672_v1, %v671_v0  ;;  %v696_v4 = vpack.c.b16 %v680_v2, %v679_v53 }
  0xd9   : > { %775 = vrot.lane.b32.xlu0 %v696_v4, %s1175_s15  ;;  %1110 = vmatpush.lsf.bf16.msrb.mxu2 %v696_v4  ;;  %v525_v8 = vpop.f32.mrf.mxu0 }
  0xda   : > { %767 = vrot.lane.b32.xlu1 %v692_v3, %s1175_s15  ;;  %v526_v10 = vadd.f32 %v1285_v20, %v525_v8 }
  0xdc   : > { %v592_v18 = vpack.c.bf16 %v526_v10, %v526_v10  ;;  %v615_v0 = vld [vmem:[#allocation2] sm:$0xff] }
  0xdd   : > { %1111 = vmatpush.lsf.bf16.msrb.mxu2 %v695_v9  ;;  %v616_v4 = vld [vmem:[#allocation2 + $0x8] sm:$0xff]  ;;  %v1097_v10 = vld [vmem:[%s1405_s5] sm:$0xff] }
  0xde   : > { %v658_v21 = vunpack.c.l.b16 %v592_v18  ;;  %900 = vmatpush.bf16.msra.mxu3 %v1097_v10 }
  0xe0   : > { %v685_v27 = vpack.c.b16 %v658_v21, %v657_v17 }
  0xe1   : > { %773 = vrot.lane.b32.xlu0 %v695_v9, %s1175_s15  ;;  %1112 = vmatpush.lsf.bf16.msrb.mxu2 %v1322_v22  ;;  %v528_v12 = vpop.f32.mrf.mxu0 }
  0xe2   : > { %751 = vrot.lane.b32.xlu1 %v684_v26, %s1175_s15  ;;  %753 = vrot.lane.b32.xlu2 %v685_v27, %s1175_s15  ;;  %v529_v33 = vadd.f32 %v1285_v20, %v528_v12 }
  0xe4   : > { %v593_v36 = vpack.c.bf16 %v529_v33, %v529_v33 }
  0xe5   : > { %1113 = vmatpush.lsf.bf16.msrb.mxu2 %v1305_v58 }
  0xe6   : > { %v659_v41 = vunpack.c.l.b16 %v593_v36 }
  0xe9   : > { %1114 = vmatpush.lsf.bf16.msrb.mxu2 %v692_v3  ;;  %v530_v22 = vpop.f32.mrf.mxu0 }
  0xea   : > { %761 = vrot.lane.b32.xlu1 %v1303_v57, %s1175_s15  ;;  %v531_v38 = vadd.f32 %v1285_v20, %v530_v22  ;;  %763 = vrot.lane.b32.xlu2 %v690_v24, %s1175_s15 }
  0xec   : > { %v594_v42 = vpack.c.bf16 %v531_v38, %v531_v38 }
  0xed   : > { %1115 = vmatpush.lsf.bf16.msrb.mxu2 %v691_v39 }
  0xee   : > { %v660_v44 = vunpack.c.l.b16 %v594_v42 }
  0xf0   : > { %v686_v58 = vpack.c.b16 %v660_v44, %v659_v41 }
  0xf1   : > { %1116 = vmatpush.lsf.bf16.msrb.mxu2 %v690_v24 }
  0xf2   : > { %755 = vrot.lane.b32.xlu0 %v686_v58, %s1175_s15  ;;  %747 = vrot.lane.b32.xlu2 %v1314_v11, %s1175_s15 }
  0xf5   : > { %1117 = vmatpush.lsf.bf16.msrb.mxu2 %v1303_v57 }
  0xf7   : > { %1118 = vllmr.2.mxu2 }
  0xfa   : > { %765 = vrot.lane.b32.xlu0 %v691_v39, %s1175_s15 }
  0xfc   : > { %v758_v45 = vpop.permute.xlu2 %757 }
 0x102   : > { %749 = vrot.lane.b32.xlu0 %v1327_v31, %s1175_s15 }
 0x104   : > { %v770_v48 = vpop.permute.xlu2 %769 }
 0x10a   : > { %745 = vrot.lane.b32.xlu0 %v1293_v40, %s1175_s15 }
 0x11f   : > { %713 = vxpose.xlu1.c.b16.start [1/8] (narrow) %v1293_v40, 16 }
 0x124   : > { %v760_v20 = vpop.permute.xlu1 %759 }
 0x125   : > { %793 = vmatpush.bf16.msrb.mxu1 %v760_v20 }
 0x129   : > { %794 = vmatpush.bf16.msrb.mxu1 %v758_v45 }
 0x12c   : > { %v772_v47 = vpop.permute.xlu1 %771 }
 0x12f   : > { %714 = vxpose.xlu1.c.b16.cont [2/8] (narrow) %v1314_v11, 16 }
 0x13c   : > { %v754_v40 = vpop.permute.xlu2 %753 }
 0x13f   : > { %715 = vxpose.xlu1.c.b16.cont [3/8] (narrow) %v1327_v31, 16 }
 0x144   : > { %v764_v31 = vpop.permute.xlu2 %763 }
 0x14b   : > { %v776_v57 = vpop.permute.xlu0 %775 }
 0x14c   : > { %807 = vmatpush.bf16.msra.mxu2 %v776_v57  ;;  %v768_v49 = vpop.permute.xlu1 %767  ;;  %v748_v54 = vpop.permute.xlu2 %747 }
 0x14f   : > { %716 = vxpose.xlu1.c.b16.cont [4/8] (narrow) %v684_v26, 16  ;;  %v1150_v26 = vld [vmem:[%s1406_s6] ss:$0 sm:$0xff] }
 0x153   : > { %v774_v46 = vpop.permute.xlu0 %773 }
 0x154   : > { %808 = vmatpush.bf16.msra.mxu2 %v774_v46  ;;  %v752_v51 = vpop.permute.xlu1 %751 }
 0x158   : > { %809 = vmatpush.bf16.msra.mxu2 %v772_v47 }
 0x15c   : > { %810 = vmatpush.bf16.msra.mxu2 %v770_v48  ;;  %v762_v52 = vpop.permute.xlu1 %761 }
 0x15f   : > { %717 = vxpose.xlu1.c.b16.cont [5/8] (narrow) %v685_v27, 16 }
 0x160   : > { %811 = vmatpush.bf16.msra.mxu2 %v768_v49 }
 0x164   : > { %v756_v50 = vpop.permute.xlu0 %755 }
 0x165   : > { %795 = vmatpush.bf16.msrb.mxu1 %v756_v50 }
 0x169   : > { %796 = vmatpush.bf16.msrb.mxu1 %v754_v40 }
 0x16c   : > { %v766_v11 = vpop.permute.xlu0 %765 }
 0x16d   : > { %797 = vmatpush.bf16.msrb.mxu1 %v752_v51  ;;  %812 = vmatpush.bf16.msra.mxu2 %v766_v11 }
 0x16f   : > { %718 = vxpose.xlu1.c.b16.cont [6/8] (narrow) %v686_v58, 16 }
 0x171   : > { %813 = vmatpush.bf16.msra.mxu2 %v764_v31 }
 0x174   : > { %v750_v53 = vpop.permute.xlu0 %749 }
 0x175   : > { %798 = vmatpush.bf16.msrb.mxu1 %v750_v53  ;;  %814 = vmatpush.bf16.msra.mxu2 %v762_v52 }
 0x178   : > { %1119 = vmatmul.lmr.bf16.vlgmr.msra.gmra.2.mxu2 }
 0x179   : > { %799 = vmatpush.bf16.msrb.mxu1 %v748_v54 }
 0x17c   : > { %v746_v55 = vpop.permute.xlu0 %745 }
 0x17d   : > { %800 = vmatpush.bf16.msrb.mxu1 %v746_v55 }
 0x17f   : > { %719 = vxpose.xlu1.c.b16.cont [7/8] (narrow) %v1295_v43, 16 }
 0x180   : > { %1120 = vmatmul.lmr.bf16.gmra.2.mxu2 }
 0x18f   : > { %720 = vxpose.xlu1.c.b16.end [8/8] (narrow) %v1316_v14, 16 }
 0x1cb   : > { %v721_v60 = vpop.trf.xlu1 }
 0x1cc   : > { %801 = vmatmul.bf16.vlgmr.msrb.gmra.mxu1 %v721_v60 }
 0x1fb   : > { %v816_v63 = vpop.f32.mrf.mxu2 }
 0x203   : > { %v818_v2 = vpop.f32.mrf.mxu2 }
 0x249   : > { %v802_v43 = vpop.f32.mrf.mxu1 }
 0x24a   : > { %v817_v1 = vadd.f32 %v816_v63, %v802_v43 }
 0x24c   : > { %v821_v14 = vadd.f32 %v817_v1, %v615_v0 }
 0x24e   : > { %824 = vst.msk [vmem:[#allocation2] sm:$0xff] %vm310_vm2, %v821_v14 }
 0x251   : > { %v804_v3 = vpop.f32.mrf.mxu1 }
 0x252   : > { %v819_v5 = vadd.f32 %v818_v2, %v804_v3 }
 0x254   : > { %v822_v6 = vadd.f32 %v819_v5, %v616_v4 }
 0x255   : > { %v829_v7 = vld [vmem:[#allocation2] sm:$0xff] }
 0x256   : > { %825 = vst.msk [vmem:[#allocation2 + $0x8] sm:$0xff] %vm310_vm2, %v822_v6 }
 0x25d   : > { %v830_v8 = vld [vmem:[#allocation2 + $0x8] sm:$0xff] }
 0x25e   : > { %v831_v9 = vpack.c.bf16 %v830_v8, %v829_v7 }
 0x260   : > { %1070 = vmatmul.msk.bf16.vlgmr.msrb.gmra.mxu3 %vm310_vm2, %v831_v9 }
 0x2e3   : > { %v853_v13 = vpop.f32.mrf.mxu3 }
 0x2e4   : > { %v854_v16 = vadd.f32 %v1149_v15, %v853_v13 }
 0x2e6   : > { %v858_v19 = vadd.f32 %v854_v16, %v829_v7 }
 0x2eb   : > { %v855_v17 = vpop.f32.mrf.mxu3 }
 0x2ec   : > { %v856_v18 = vadd.f32 %v1149_v15, %v855_v17 }
 0x2ee   : > { %v859_v21 = vadd.f32 %v856_v18, %v830_v8 }
 0x2f0   : > { %v860_v23 = vpack.c.bf16 %v859_v21, %v858_v19 }
 0x2f2   : > { %867 = vxpose.xlu2.c.b16.start.end [1/1] (short) (narrow) %v860_v23, 16 }
 0x393   : > { %v875_v25 = vpop.trf.xlu2 }
 0x394   : > { %1075 = vmatmul.msk.bf16.vlgmr.msra.gmra.mxu3 %vm889_vm3, %v875_v25 }
 0x417   : > { %v902_v27 = vpop.f32.mrf.mxu3 }
 0x418   : > { %v903_v28 = vadd.f32 %v1150_v26, %v902_v27 }
 0x41a   : > { %906 = vst.msk [vmem:[%s304_s8] sm:$0xff] %vm889_vm3, %v903_v28 }
 0x41f   : > { %v904_v12 = vpop.f32.mrf.mxu3 }
 0x420 PF: > { %s17_s26 = sadd.s32 1, %s1173_s26   ;;  %s1408_s24 = smov %s1169_s25 }
 0x421   : > { %p14_p5 = scmp.ge.s32.totalorder %s17_s26, 4   ;;  %s1409_s25 = smov %s1411_s27 }
 0x423   :  { %16 = sbr.rel (!%p14_p5) target bundleno = 2 (0x2), region = 86 }

// kernel: dual_gcn_forward.13
= control target key start
LH: loop header
LB: loop body
LE: loop exit
PB: predicated region body
PF: predicated region fallthrough
CT: control target
= control target key end

     0   :  { %s2206_s13 = smov 0   ;;  %s2208_s14 = smov 0   ;;  %s2597_s0 = inlined_call_operand.vmem [shape: bf16[2,256,32], index: 0, kind: input, shape index: {}]   ;;  %s2598_s1 = inlined_call_operand.vmem [shape: bf16[2,256,32], index: 1, kind: input, shape index: {}]   ;;  %s2599_s2 = inlined_call_operand.vmem [shape: f32[2,8,16], index: 2, kind: input, shape index: {}]   ;;  %s2600_s3 = inlined_call_operand.vmem [shape: bf16[32,8], index: 3, kind: input, shape index: {}]   ;;  %s2601_s4 = inlined_call_operand.vmem [shape: f32[1,8], index: 4, kind: input, shape index: {}]   ;;  %s2602_s5 = inlined_call_operand.vmem [shape: bf16[16,32], index: 5, kind: input, shape index: {}]   ;;  %s2603_s6 = inlined_call_operand.vmem [shape: f32[1,32], index: 6, kind: input, shape index: {}]   ;;  %s2604_s7 = inlined_call_operand.vmem [shape: bf16[32,32], index: 7, kind: input, shape index: {}]   ;;  %s2605_s8 = inlined_call_operand.vmem [shape: bf16[32,32], index: 8, kind: input, shape index: {}]   ;;  %s2606_s9 = inlined_call_operand.vmem [shape: f32[1,32], index: 9, kind: input, shape index: {}]   ;;  %s2607_s10 = inlined_call_operand.vmem [shape: f32[2,32,256], index: 10, kind: output, shape index: {}]  }
   0x1   :  { %s2210_s15 = smov 0  }
   0x2 LB: > { %s32_s16 = sadd.s32 1, %s2145_s14  ;;  %p1808_p0 = scmp.ge.s32.totalorder %s2149_s15, 1  ;;  %s2149_s15 = sphi %s2210_s15, %s20_s15   ;;  %s2145_s14 = sphi %s2208_s14, %s2609_s14   ;;  %s2141_s13 = sphi %s2206_s13, %s2608_s13  }
   0x3   : > { %p34_p1 = scmp.ge.s32.totalorder %s32_s16, 2  ;;  %p359_p2 = scmp.lt.s32.totalorder %s2149_s15, 3 }
   0x5   : > { %s2611_s16 = smov (%p34_p1, %s32_s16), 0  ;;  %p360_p3 = pnand %p1808_p0, %p359_p2 }
   0x6   : > { %p419_p4 = scmp.lt.s32.totalorder (!%p360_p3), %s2141_s13, 1 }
   0x7   : > { %363 = sbr.rel (%p360_p3) target bundleno = 1016 (0x3f8), region = 60 }
   0xc   : > { %v2074_v0 = vld [vmem:[%s2600_s3 + $0x8] sm:$0xff]  ;;  %v2073_v1 = vld [vmem:[%s2600_s3] sm:$0xff]  ;;  %s2613_s13 = smov (!%p419_p4, %s2141_s13), 1  ;;  %vm585_vm0 = vcmask 261120   ;;  %vm790_vm1 = vcmask 1043456   ;;  %vm741_vm2 = vcmask 64512  }
   0xd   : > { %640 = vmatpush.bf16.msra.mxu0 %v2074_v0  ;;  %2096 = vmatpush.bf16.msra.mxu3 %v2074_v0  ;;  %s2054_s21 = sshll.u32 %s2613_s13, 7  ;;  %s1813_s22 = sshll.u32 %s2613_s13, 3  ;;  %v2265_v15 = vld [vmem:[%s2601_s4] ss:$0 sm:$0xff]  ;;  %vm911_vm3 = vcmask 130048  }
   0xe   : > { %s2239_s25 = scalar_lea.vmem %s2597_s0, %s2054_s21  ;;  %s441_s28 = scalar_lea.vmem %s2599_s2, %s1813_s22 }
   0xf   : > { %v2057_v2 = vld [vmem:[%s2239_s25] sm:$0xff]  ;;  %v2058_v6 = vld [vmem:[%s2239_s25 + $0x8] sm:$0xff]  ;;  %v2059_v7 = vld [vmem:[%s2239_s25 + $0x10] sm:$0xff]  ;;  %s2380_s29 = scalar_lea.vmem %s2598_s1, %s2054_s21 }
  0x10   : > { %v739_v3 = vld [vmem:[%s441_s28] sm:$0xff]  ;;  %v2060_v8 = vld [vmem:[%s2239_s25 + $0x18] sm:$0xff]  ;;  %v2062_v10 = vld [vmem:[%s2239_s25 + $0x28] sm:$0xff] }
  0x11   : > { %641 = vmatpush.bf16.msra.mxu0 %v2073_v1  ;;  %2097 = vmatpush.bf16.msra.mxu3 %v2073_v1  ;;  %v740_v4 = vpack.c.bf16 %v739_v3, %v739_v3  ;;  %v2061_v9 = vld [vmem:[%s2239_s25 + $0x20] sm:$0xff]  ;;  %v2063_v11 = vld [vmem:[%s2239_s25 + $0x30] sm:$0xff]  ;;  %v2064_v12 = vld [vmem:[%s2239_s25 + $0x38] sm:$0xff] }
  0x12   : > { %v2065_v13 = vld [vmem:[%s2239_s25 + $0x40] sm:$0xff]  ;;  %v2066_v20 = vld [vmem:[%s2239_s25 + $0x48] sm:$0xff]  ;;  %v2067_v26 = vld [vmem:[%s2239_s25 + $0x50] sm:$0xff] }
  0x13   : > { %v792_v5 = vsel %vm790_vm1, %v740_v4, 0  ;;  %v2068_v32 = vld [vmem:[%s2239_s25 + $0x58] sm:$0xff]  ;;  %v2071_v34 = vld [vmem:[%s2239_s25 + $0x70] sm:$0xff]  ;;  %v2069_v39 = vld [vmem:[%s2239_s25 + $0x60] sm:$0xff] }
  0x14   : > { %1888 = vmatmul.msk.bf16.vlgmr.msra.gmra.mxu0 %vm585_vm0, %v2057_v2  ;;  %2098 = vmatpush.bf16.msra.mxu1 %v792_v5  ;;  %v2072_v41 = vld [vmem:[%s2239_s25 + $0x78] sm:$0xff]  ;;  %v2070_v46 = vld [vmem:[%s2239_s25 + $0x68] sm:$0xff] }
  0x15   : > { %801 = vmatpush.bf16.msrb.mxu0 %v792_v5  ;;  %2099 = vmatpush.bf16.msra.mxu2 %v792_v5 }
  0x16   : > { %1902 = vmatmul.msk.bf16.vlgmr.msra.gmra.mxu3 %vm585_vm0, %v2071_v34 }
  0x24   : > { %1889 = vmatmul.msk.bf16.gmra.mxu0 %vm585_vm0, %v2058_v6 }
  0x26   : > { %1903 = vmatmul.msk.bf16.gmra.mxu3 %vm585_vm0, %v2072_v41 }
  0x34   : > { %1890 = vmatmul.msk.bf16.gmra.mxu0 %vm585_vm0, %v2059_v7 }
  0x44   : > { %1891 = vmatmul.msk.bf16.gmra.mxu0 %vm585_vm0, %v2060_v8  ;;  %v2075_v8 = vld [vmem:[%s2602_s5] sm:$0xff] }
  0x45   : > { %967 = vmatpush.bf16.msrb.mxu2 %v2075_v8 }
  0x54   : > { %1892 = vmatmul.msk.bf16.gmra.mxu0 %vm585_vm0, %v2061_v9 }
  0x64   : > { %1893 = vmatmul.msk.bf16.gmra.mxu0 %vm585_vm0, %v2062_v10 }
  0x74   : > { %1894 = vmatmul.msk.bf16.gmra.mxu0 %vm585_vm0, %v2063_v11 }
  0x84   : > { %1895 = vmatmul.msk.bf16.gmra.mxu0 %vm585_vm0, %v2064_v12 }
  0x91   : > { %v643_v14 = vpop.f32.mrf.mxu0 }
  0x92   : > { %v644_v17 = vadd.f32 %v2265_v15, %v643_v14 }
  0x94   : > { %1896 = vmatmul.msk.bf16.gmra.mxu0 %vm585_vm0, %v2065_v13 }
  0x99   : > { %v645_v16 = vpop.f32.mrf.mxu0 }
  0x9a   : > { %v646_v18 = vadd.f32 %v2265_v15, %v645_v16 }
  0x9c   : > { %v723_v19 = vpack.c.bf16 %v646_v18, %v644_v17 }
  0xa1   : > { %v648_v21 = vpop.f32.mrf.mxu0 }
  0xa2   : > { %v649_v23 = vadd.f32 %v2265_v15, %v648_v21 }
  0xa4   : > { %1897 = vmatmul.msk.bf16.gmra.mxu0 %vm585_vm0, %v2066_v20 }
  0xa9   : > { %v650_v22 = vpop.f32.mrf.mxu0 }
  0xaa   : > { %v651_v24 = vadd.f32 %v2265_v15, %v650_v22 }
  0xac   : > { %v724_v25 = vpack.c.bf16 %v651_v24, %v649_v23 }
  0xb1   : > { %v653_v27 = vpop.f32.mrf.mxu0 }
  0xb2   : > { %v654_v29 = vadd.f32 %v2265_v15, %v653_v27 }
  0xb4   : > { %1898 = vmatmul.msk.bf16.gmra.mxu0 %vm585_vm0, %v2067_v26  ;;  %v713_v26 = vpop.f32.mrf.mxu3 }
  0xb9   : > { %v655_v28 = vpop.f32.mrf.mxu0 }
  0xba   : > { %v656_v30 = vadd.f32 %v2265_v15, %v655_v28 }
  0xbc   : > { %v725_v31 = vpack.c.bf16 %v656_v30, %v654_v29 }
  0xc1   : > { %v658_v33 = vpop.f32.mrf.mxu0 }
  0xc2   : > { %v659_v36 = vadd.f32 %v2265_v15, %v658_v33 }
  0xc4   : > { %1899 = vmatmul.msk.bf16.gmra.mxu0 %vm585_vm0, %v2068_v32  ;;  %v714_v32 = vadd.f32 %v2265_v15, %v713_v26  ;;  %v2397_v26 = vld [vmem:[%s2603_s6] ss:$0 sm:$0xff] }
  0xc9   : > { %v660_v35 = vpop.f32.mrf.mxu0 }
  0xca   : > { %v661_v37 = vadd.f32 %v2265_v15, %v660_v35 }
  0xcc   : > { %v726_v38 = vpack.c.bf16 %v661_v37, %v659_v36 }
  0xd1   : > { %v663_v40 = vpop.f32.mrf.mxu0 }
  0xd2   : > { %v664_v43 = vadd.f32 %v2265_v15, %v663_v40 }
  0xd4   : > { %1900 = vmatmul.msk.bf16.gmra.mxu0 %vm585_vm0, %v2069_v39 }
  0xd9   : > { %v665_v42 = vpop.f32.mrf.mxu0 }
  0xda   : > { %v666_v44 = vadd.f32 %v2265_v15, %v665_v42 }
  0xdc   : > { %v727_v45 = vpack.c.bf16 %v666_v44, %v664_v43 }
  0xe1   : > { %v668_v47 = vpop.f32.mrf.mxu0 }
  0xe2   : > { %v669_v49 = vadd.f32 %v2265_v15, %v668_v47 }
  0xe4   : > { %1901 = vmatmul.msk.bf16.gmra.mxu0 %vm585_vm0, %v2070_v46 }
  0xe9   : > { %v670_v48 = vpop.f32.mrf.mxu0 }
  0xea   : > { %v671_v50 = vadd.f32 %v2265_v15, %v670_v48 }
  0xec   : > { %v728_v51 = vpack.c.bf16 %v671_v50, %v669_v49 }
  0xf1   : > { %v673_v52 = vpop.f32.mrf.mxu0 }
  0xf2   : > { %v674_v54 = vadd.f32 %v2265_v15, %v673_v52 }
  0xf4   : > { %1904 = vmatmul.msk.bf16.vlgmr.msrb.gmra.mxu0 %vm741_vm2, %v723_v19 }
  0xf9   : > { %v675_v53 = vpop.f32.mrf.mxu0 }
  0xfa   : > { %v676_v55 = vadd.f32 %v2265_v15, %v675_v53 }
  0xfc   : > { %v729_v56 = vpack.c.bf16 %v676_v55, %v674_v54 }
  0xfe   : > { %1910 = vmatmul.msk.bf16.vlgmr.msra.gmra.mxu1 %vm741_vm2, %v729_v56 }
 0x101   : > { %v678_v57 = vpop.f32.mrf.mxu0 }
 0x102   : > { %v679_v59 = vadd.f32 %v2265_v15, %v678_v57 }
 0x104   : > { %1905 = vmatmul.msk.bf16.gmra.mxu0 %vm741_vm2, %v724_v25 }
 0x109   : > { %v680_v58 = vpop.f32.mrf.mxu0 }
 0x10a   : > { %v681_v60 = vadd.f32 %v2265_v15, %v680_v58 }
 0x10c   : > { %v730_v61 = vpack.c.bf16 %v681_v60, %v679_v59 }
 0x10e   : > { %1911 = vmatmul.msk.bf16.gmra.mxu1 %vm741_vm2, %v730_v61 }
 0x111   : > { %v683_v62 = vpop.f32.mrf.mxu0 }
 0x112   : > { %v684_v0 = vadd.f32 %v2265_v15, %v683_v62 }
 0x114   : > { %1906 = vmatmul.msk.bf16.gmra.mxu0 %vm741_vm2, %v725_v31  ;;  %v715_v31 = vpop.f32.mrf.mxu3 }
 0x115   : > { %v716_v33 = vadd.f32 %v2265_v15, %v715_v31 }
 0x117   : > { %v737_v36 = vpack.c.bf16 %v716_v33, %v714_v32 }
 0x119   : > { %v685_v63 = vpop.f32.mrf.mxu0 }
 0x11a   : > { %v686_v1 = vadd.f32 %v2265_v15, %v685_v63 }
 0x11c   : > { %v731_v2 = vpack.c.bf16 %v686_v1, %v684_v0  ;;  %v718_v35 = vpop.f32.mrf.mxu3 }
 0x11d   : > { %v719_v39 = vadd.f32 %v2265_v15, %v718_v35 }
 0x11e   : > { %1912 = vmatmul.msk.bf16.gmra.mxu1 %vm741_vm2, %v731_v2  ;;  %v2092_v2 = vld [vmem:[%s2604_s7] sm:$0xff] }
 0x121   : > { %v688_v3 = vpop.f32.mrf.mxu0 }
 0x122   : > { %v689_v5 = vadd.f32 %v2265_v15, %v688_v3 }
 0x124   : > { %1907 = vmatmul.msk.bf16.gmra.mxu0 %vm741_vm2, %v726_v38  ;;  %v720_v38 = vpop.f32.mrf.mxu3 }
 0x125   : > { %v721_v40 = vadd.f32 %v2265_v15, %v720_v38 }
 0x127   : > { %v738_v41 = vpack.c.bf16 %v721_v40, %v719_v39  ;;  %v2078_v39 = vld [vmem:[%s2380_s29 + $0x10] sm:$0xff] }
 0x129   : > { %v690_v4 = vpop.f32.mrf.mxu0 }
 0x12a   : > { %v691_v6 = vadd.f32 %v2265_v15, %v690_v4  ;;  %v2095_v4 = vld [vmem:[%s2605_s8 + $0x8] sm:$0xff] }
 0x12b   : > { %1267 = vmatpush.bf16.msrb.mxu3 %v2095_v4 }
 0x12c   : > { %v732_v7 = vpack.c.bf16 %v691_v6, %v689_v5 }
 0x12e   : > { %1913 = vmatmul.msk.bf16.gmra.mxu1 %vm741_vm2, %v732_v7 }
 0x131   : > { %v693_v9 = vpop.f32.mrf.mxu0 }
 0x132   : > { %v694_v11 = vadd.f32 %v2265_v15, %v693_v9 }
 0x134   : > { %1908 = vmatmul.msk.bf16.gmra.mxu0 %vm741_vm2, %v727_v45 }
 0x139   : > { %v695_v10 = vpop.f32.mrf.mxu0 }
 0x13a   : > { %v696_v12 = vadd.f32 %v2265_v15, %v695_v10 }
 0x13c   : > { %v733_v13 = vpack.c.bf16 %v696_v12, %v694_v11  ;;  %v2094_v11 = vld [vmem:[%s2605_s8] sm:$0xff] }
 0x13d   : > { %1268 = vmatpush.bf16.msrb.mxu3 %v2094_v11 }
 0x13e   : > { %1914 = vmatmul.msk.bf16.gmra.mxu1 %vm741_vm2, %v733_v13 }
 0x141   : > { %v698_v14 = vpop.f32.mrf.mxu0 }
 0x142   : > { %v699_v17 = vadd.f32 %v2265_v15, %v698_v14 }
 0x144   : > { %1909 = vmatmul.msk.bf16.gmra.mxu0 %vm741_vm2, %v728_v51 }
 0x149   : > { %v700_v16 = vpop.f32.mrf.mxu0 }
 0x14a   : > { %v701_v18 = vadd.f32 %v2265_v15, %v700_v16 }
 0x14c   : > { %v734_v19 = vpack.c.bf16 %v701_v18, %v699_v17  ;;  %v2076_v17 = vld [vmem:[%s2380_s29] sm:$0xff] }
 0x14e   : > { %1915 = vmatmul.msk.bf16.vlgmr.msra.gmra.mxu2 %vm741_vm2, %v734_v19 }
 0x151   : > { %v703_v20 = vpop.f32.mrf.mxu0 }
 0x152   : > { %v704_v22 = vadd.f32 %v2265_v15, %v703_v20 }
 0x159   : > { %v705_v21 = vpop.f32.mrf.mxu0 }
 0x15a   : > { %v706_v23 = vadd.f32 %v2265_v15, %v705_v21 }
 0x15c   : > { %v735_v24 = vpack.c.bf16 %v706_v23, %v704_v22 }
 0x15e   : > { %1916 = vmatmul.msk.bf16.gmra.mxu2 %vm741_vm2, %v735_v24  ;;  %v2077_v24 = vld [vmem:[%s2380_s29 + $0x8] sm:$0xff] }
 0x161   : > { %v708_v25 = vpop.f32.mrf.mxu0 }
 0x162   : > { %v709_v28 = vadd.f32 %v2265_v15, %v708_v25 }
 0x169   : > { %v710_v27 = vpop.f32.mrf.mxu0 }
 0x16a   : > { %v711_v29 = vadd.f32 %v2265_v15, %v710_v27  ;;  %v2093_v15 = vld [vmem:[%s2604_s7 + $0x8] sm:$0xff]  ;;  %v453_v27 = vld [vmem:[%s2239_s25] sm:$0xff]  }
 0x16b   : > { %1496 = vmatpush.bf16.msrb.mxu1 %v2093_v15  ;;  %v1050_v31 = vunpack.c.h.bf16 %v453_v27 }
 0x16c   : > { %v736_v30 = vpack.c.bf16 %v711_v29, %v709_v28 }
 0x16e   : > { %1917 = vmatmul.msk.bf16.gmra.mxu2 %vm741_vm2, %v736_v30  ;;  %v1049_v30 = vunpack.c.l.bf16 %v453_v27 }
 0x16f   : > { %1497 = vmatpush.bf16.msrb.mxu1 %v2092_v2 }
 0x171   : > { %v803_v34 = vpop.f32.mrf.mxu0 }
 0x172   : > { %2036 = vmatmul.msk.bf16.vlgmr.msrb.gmra.mxu1 %vm585_vm0, %v2076_v17 }
 0x179   : > { %v805_v37 = vpop.f32.mrf.mxu0 }
 0x17a   : > { %v883_v44 = vpack.c.bf16 %v805_v37, %v803_v34 }
 0x17b   : > { %v833_v58 = vpop.f32.mrf.mxu1 }
 0x17e   : > { %1918 = vmatmul.msk.bf16.gmra.mxu2 %vm741_vm2, %v737_v36 }
 0x181   : > { %v808_v42 = vpop.f32.mrf.mxu0 }
 0x182   : > { %2037 = vmatmul.msk.bf16.gmra.mxu1 %vm585_vm0, %v2077_v24 }
 0x183   : > { %v835_v61 = vpop.f32.mrf.mxu1 }
 0x184   : > { %v889_v8 = vpack.c.bf16 %v835_v61, %v833_v58  ;;  %v457_v61 = vld [vmem:[%s2239_s25 + $0x10] sm:$0xff]  }
 0x185   : > { %v1054_v2 = vunpack.c.h.bf16 %v457_v61 }
 0x189   : > { %v810_v43 = vpop.f32.mrf.mxu0 }
 0x18a   : > { %v884_v46 = vpack.c.bf16 %v810_v43, %v808_v42  ;;  %v455_v43 = vld [vmem:[%s2239_s25 + $0x8] sm:$0xff]  }
 0x18b   : > { %v838_v5 = vpop.f32.mrf.mxu1 }
 0x18e   : > { %1919 = vmatmul.msk.bf16.gmra.mxu2 %vm741_vm2, %v738_v41 }
 0x191   : > { %v813_v45 = vpop.f32.mrf.mxu0 }
 0x192   : > { %2038 = vmatmul.msk.bf16.gmra.mxu1 %vm585_vm0, %v2078_v39 }
 0x193   : > { %v840_v9 = vpop.f32.mrf.mxu1 }
 0x194   : > { %v890_v16 = vpack.c.bf16 %v840_v9, %v838_v5 }
 0x199   : > { %v815_v47 = vpop.f32.mrf.mxu0 }
 0x19a   : > { %v885_v49 = vpack.c.bf16 %v815_v47, %v813_v45  ;;  %v1051_v45 = vunpack.c.l.bf16 %v455_v43 }
 0x19b   : > { %v843_v12 = vpop.f32.mrf.mxu1 }
 0x19e   : > { %1924 = vmatmul.msk.bf16.vlgmr.msrb.gmra.mxu2 %vm911_vm3, %v883_v44 }
 0x1a1   : > { %v818_v48 = vpop.f32.mrf.mxu0 }
 0x1a3   : > { %v845_v18 = vpop.f32.mrf.mxu1 }
 0x1a4   : > { %v891_v23 = vpack.c.bf16 %v845_v18, %v843_v12 }
 0x1a9   : > { %v820_v50 = vpop.f32.mrf.mxu0 }
 0x1aa   : > { %v886_v52 = vpack.c.bf16 %v820_v50, %v818_v48 }
 0x1ab   : > { %v848_v22 = vpop.f32.mrf.mxu1 }
 0x1ae   : > { %1925 = vmatmul.msk.bf16.gmra.mxu2 %vm911_vm3, %v884_v46  ;;  %v1052_v46 = vunpack.c.h.bf16 %v455_v43  ;;  %v463_v43 = vld [vmem:[%s2239_s25 + $0x28] sm:$0xff]  }
 0x1b1   : > { %v823_v51 = vpop.f32.mrf.mxu0 }
 0x1b3   : > { %v850_v28 = vpop.f32.mrf.mxu1 }
 0x1b4   : > { %v892_v35 = vpack.c.bf16 %v850_v28, %v848_v22  ;;  %v459_v22 = vld [vmem:[%s2239_s25 + $0x18] sm:$0xff]  }
 0x1b5   : > { %v1055_v24 = vunpack.c.l.bf16 %v459_v22 }
 0x1b9   : > { %v825_v54 = vpop.f32.mrf.mxu0 }
 0x1ba   : > { %v887_v57 = vpack.c.bf16 %v825_v54, %v823_v51 }
 0x1bb   : > { %v853_v40 = vpop.f32.mrf.mxu1 }
 0x1be   : > { %1926 = vmatmul.msk.bf16.gmra.mxu2 %vm911_vm3, %v885_v49 }
 0x1c1   : > { %v828_v59 = vpop.f32.mrf.mxu0 }
 0x1c3   : > { %v855_v47 = vpop.f32.mrf.mxu1 }
 0x1c4   : > { %v893_v15 = vpack.c.bf16 %v855_v47, %v853_v40  ;;  %v2082_v40 = vld [vmem:[%s2380_s29 + $0x30] sm:$0xff] }
 0x1c9   : > { %v830_v62 = vpop.f32.mrf.mxu0 }
 0x1ca   : > { %v888_v1 = vpack.c.bf16 %v830_v62, %v828_v59 }
 0x1ce   : > { %1927 = vmatmul.msk.bf16.gmra.mxu2 %vm911_vm3, %v886_v52 }
 0x1d1   : > { %v2339_v53 = vpop.f32.mrf.mxu2 }
 0x1d9   : > { %v2341_v55 = vpop.f32.mrf.mxu2 }
 0x1da   : > { %v894_v56 = vpack.c.bf16 %v2341_v55, %v2339_v53 }
 0x1de   : > { %1928 = vmatmul.msk.bf16.gmra.mxu2 %vm911_vm3, %v887_v57  ;;  %v2079_v57 = vld [vmem:[%s2380_s29 + $0x18] sm:$0xff] }
 0x1df   : > { %2039 = vmatmul.msk.bf16.gmra.mxu1 %vm585_vm0, %v2079_v57 }
 0x1e1   : > { %v2346_v60 = vpop.f32.mrf.mxu2 }
 0x1e9   : > { %v2348_v63 = vpop.f32.mrf.mxu2 }
 0x1ea   : > { %v895_v0 = vpack.c.bf16 %v2348_v63, %v2346_v60 }
 0x1ee   : > { %1929 = vmatmul.msk.bf16.gmra.mxu2 %vm911_vm3, %v888_v1  ;;  %v1053_v1 = vunpack.c.l.bf16 %v457_v61 }
 0x1f1   : > { %v2356_v3 = vpop.f32.mrf.mxu2 }
 0x1f9   : > { %v2361_v6 = vpop.f32.mrf.mxu2 }
 0x1fa   : > { %v896_v7 = vpack.c.bf16 %v2361_v6, %v2356_v3 }
 0x1fe   : > { %1930 = vmatmul.msk.bf16.gmra.mxu2 %vm911_vm3, %v889_v8 }
 0x201   : > { %v2366_v10 = vpop.f32.mrf.mxu2 }
 0x209   : > { %v2371_v13 = vpop.f32.mrf.mxu2 }
 0x20a   : > { %v897_v14 = vpack.c.bf16 %v2371_v13, %v2366_v10 }
 0x20e   : > { %1931 = vmatmul.msk.bf16.gmra.mxu2 %vm911_vm3, %v890_v16  ;;  %v2080_v16 = vld [vmem:[%s2380_s29 + $0x20] sm:$0xff] }
 0x20f   : > { %2040 = vmatmul.msk.bf16.gmra.mxu1 %vm585_vm0, %v2080_v16 }
 0x211   : > { %v2385_v19 = vpop.f32.mrf.mxu2 }
 0x219   : > { %v2387_v20 = vpop.f32.mrf.mxu2 }
 0x21a   : > { %v898_v21 = vpack.c.bf16 %v2387_v20, %v2385_v19 }
 0x21e   : > { %1932 = vmatmul.msk.bf16.gmra.mxu2 %vm911_vm3, %v891_v23 }
 0x221   : > { %v969_v25 = vpop.f32.mrf.mxu2 }
 0x222   : > { %v970_v29 = vadd.f32 %v2397_v26, %v969_v25  ;;  %v1056_v25 = vunpack.c.h.bf16 %v459_v22 }
 0x224   : > { %v1081_v33 = vadd.f32 %v1049_v30, %v970_v29  ;;  %v2081_v30 = vld [vmem:[%s2380_s29 + $0x28] sm:$0xff] }
 0x225   : > { %2041 = vmatmul.msk.bf16.gmra.mxu1 %vm585_vm0, %v2081_v30 }
 0x226   : > { %v1113_v37 = vmax.f32 %v1081_v33, 0.0  ;;  %v461_v33 = vld [vmem:[%s2239_s25 + $0x20] sm:$0xff]  }
 0x229   : > { %v971_v32 = vpop.f32.mrf.mxu2 }
 0x22a   : > { %v972_v34 = vadd.f32 %v2397_v26, %v971_v32 }
 0x22c   : > { %v1082_v36 = vadd.f32 %v1050_v31, %v972_v34 }
 0x22e   : > { %v1114_v38 = vmax.f32 %v1082_v36, 0.0  ;;  %1933 = vmatmul.msk.bf16.gmra.mxu2 %vm911_vm3, %v892_v35  ;;  %v1057_v35 = vunpack.c.l.bf16 %v461_v33  ;;  %v1058_v36 = vunpack.c.h.bf16 %v461_v33 }
 0x230   : > { %v1181_v41 = vpack.c.bf16 %v1114_v38, %v1113_v37 }
 0x231   : > { %v974_v42 = vpop.f32.mrf.mxu2 }
 0x232   : > { %1948 = vmatmul.msk.bf16.vlgmr.msrb.gmra.mxu3 %vm585_vm0, %v1181_v41  ;;  %v975_v44 = vadd.f32 %v2397_v26, %v974_v42 }
 0x234   : > { %v1083_v49 = vadd.f32 %v1051_v45, %v975_v44  ;;  %v1059_v45 = vunpack.c.l.bf16 %v463_v43 }
 0x235   : > { %2042 = vmatmul.msk.bf16.gmra.mxu1 %vm585_vm0, %v2082_v40 }
 0x236   : > { %v1115_v52 = vmax.f32 %v1083_v49, 0.0 }
 0x239   : > { %v976_v48 = vpop.f32.mrf.mxu2 }
 0x23a   : > { %v977_v50 = vadd.f32 %v2397_v26, %v976_v48 }
 0x23c   : > { %v1084_v51 = vadd.f32 %v1052_v46, %v977_v50  ;;  %v1060_v46 = vunpack.c.h.bf16 %v463_v43  ;;  %v2083_v50 = vld [vmem:[%s2380_s29 + $0x38] sm:$0xff] }
 0x23e   : > { %v1116_v54 = vmax.f32 %v1084_v51, 0.0  ;;  %1934 = vmatmul.msk.bf16.gmra.mxu2 %vm911_vm3, %v893_v15 }
 0x240   : > { %v1182_v58 = vpack.c.bf16 %v1116_v54, %v1115_v52  ;;  %v465_v52 = vld [vmem:[%s2239_s25 + $0x30] sm:$0xff]  }
 0x241   : > { %v979_v59 = vpop.f32.mrf.mxu2  ;;  %v1061_v57 = vunpack.c.l.bf16 %v465_v52 }
 0x242   : > { %1949 = vmatmul.msk.bf16.gmra.mxu3 %vm585_vm0, %v1182_v58  ;;  %v980_v62 = vadd.f32 %v2397_v26, %v979_v59  ;;  %v1062_v58 = vunpack.c.h.bf16 %v465_v52 }
 0x244   : > { %v1085_v5 = vadd.f32 %v1053_v1, %v980_v62 }
 0x245   : > { %2043 = vmatmul.msk.bf16.gmra.mxu1 %vm585_vm0, %v2083_v50 }
 0x246   : > { %v1117_v11 = vmax.f32 %v1085_v5, 0.0 }
 0x249   : > { %v981_v4 = vpop.f32.mrf.mxu2 }
 0x24a   : > { %v982_v8 = vadd.f32 %v2397_v26, %v981_v4 }
 0x24c   : > { %v1086_v9 = vadd.f32 %v1054_v2, %v982_v8  ;;  %v2084_v2 = vld [vmem:[%s2380_s29 + $0x40] sm:$0xff]  ;;  %v467_v8 = vld [vmem:[%s2239_s25 + $0x38] sm:$0xff]  }
 0x24d   : > { %v1064_v16 = vunpack.c.h.bf16 %v467_v8 }
 0x24e   : > { %v1118_v12 = vmax.f32 %v1086_v9, 0.0  ;;  %1935 = vmatmul.msk.bf16.gmra.mxu2 %vm911_vm3, %v894_v56 }
 0x250   : > { %v1183_v17 = vpack.c.bf16 %v1118_v12, %v1117_v11  ;;  %v1063_v12 = vunpack.c.l.bf16 %v467_v8 }
 0x251   : > { %v984_v18 = vpop.f32.mrf.mxu2 }
 0x252   : > { %1950 = vmatmul.msk.bf16.gmra.mxu3 %vm585_vm0, %v1183_v17  ;;  %v985_v23 = vadd.f32 %v2397_v26, %v984_v18 }
 0x254   : > { %v1087_v28 = vadd.f32 %v1055_v24, %v985_v23  ;;  %v2085_v24 = vld [vmem:[%s2380_s29 + $0x48] sm:$0xff] }
 0x255   : > { %2044 = vmatmul.msk.bf16.gmra.mxu1 %vm585_vm0, %v2084_v2 }
 0x256   : > { %v1119_v56 = vmax.f32 %v1087_v28, 0.0  ;;  %v469_v28 = vld [vmem:[%s2239_s25 + $0x40] sm:$0xff]  }
 0x259   : > { %v986_v27 = vpop.f32.mrf.mxu2 }
 0x25a   : > { %v987_v53 = vadd.f32 %v2397_v26, %v986_v27 }
 0x25c   : > { %v1088_v55 = vadd.f32 %v1056_v25, %v987_v53 }
 0x25e   : > { %v1120_v29 = vmax.f32 %v1088_v55, 0.0  ;;  %1936 = vmatmul.msk.bf16.gmra.mxu2 %vm911_vm3, %v895_v0 }
 0x260   : > { %v1184_v31 = vpack.c.bf16 %v1120_v29, %v1119_v56  ;;  %v1065_v56 = vunpack.c.l.bf16 %v469_v28  ;;  %v1066_v29 = vunpack.c.h.bf16 %v469_v28 }
 0x261   : > { %v989_v32 = vpop.f32.mrf.mxu2 }
 0x262   : > { %1951 = vmatmul.msk.bf16.gmra.mxu3 %vm585_vm0, %v1184_v31  ;;  %v990_v34 = vadd.f32 %v2397_v26, %v989_v32 }
 0x264   : > { %v1089_v38 = vadd.f32 %v1057_v35, %v990_v34 }
 0x265   : > { %2045 = vmatmul.msk.bf16.gmra.mxu1 %vm585_vm0, %v2085_v24 }
 0x266   : > { %v1121_v0 = vmax.f32 %v1089_v38, 0.0 }
 0x269   : > { %v991_v37 = vpop.f32.mrf.mxu2 }
 0x26a   : > { %v992_v60 = vadd.f32 %v2397_v26, %v991_v37  ;;  %v2086_v37 = vld [vmem:[%s2380_s29 + $0x50] sm:$0xff] }
 0x26c   : > { %v1090_v63 = vadd.f32 %v1058_v36, %v992_v60 }
 0x26e   : > { %v1122_v39 = vmax.f32 %v1090_v63, 0.0  ;;  %1937 = vmatmul.msk.bf16.gmra.mxu2 %vm911_vm3, %v896_v7  ;;  %v471_v63 = vld [vmem:[%s2239_s25 + $0x48] sm:$0xff]  }
 0x270   : > { %v1185_v41 = vpack.c.bf16 %v1122_v39, %v1121_v0  ;;  %v2481_v0 = vld [vmem:[%s2606_s9] ss:$0 sm:$0xff] }
 0x271   : > { %v994_v42 = vpop.f32.mrf.mxu2 }
 0x272   : > { %1952 = vmatmul.msk.bf16.gmra.mxu3 %vm585_vm0, %v1185_v41  ;;  %v995_v44 = vadd.f32 %v2397_v26, %v994_v42  ;;  %v1067_v42 = vunpack.c.l.bf16 %v471_v63 }
 0x274   : > { %v1091_v48 = vadd.f32 %v1059_v45, %v995_v44  ;;  %v1068_v44 = vunpack.c.h.bf16 %v471_v63 }
 0x275   : > { %2046 = vmatmul.msk.bf16.gmra.mxu1 %vm585_vm0, %v2086_v37 }
 0x276   : > { %v1123_v7 = vmax.f32 %v1091_v48, 0.0 }
 0x279   : > { %v996_v47 = vpop.f32.mrf.mxu2 }
 0x27a   : > { %v997_v3 = vadd.f32 %v2397_v26, %v996_v47 }
 0x27c   : > { %v1092_v6 = vadd.f32 %v1060_v46, %v997_v3 }
 0x27e   : > { %v1124_v49 = vmax.f32 %v1092_v6, 0.0  ;;  %1938 = vmatmul.msk.bf16.gmra.mxu2 %vm911_vm3, %v897_v14  ;;  %v1499_v14 = vpop.f32.mrf.mxu1 }
 0x280   : > { %v1186_v15 = vpack.c.bf16 %v1124_v49, %v1123_v7 }
 0x281   : > { %v999_v51 = vpop.f32.mrf.mxu2 }
 0x282   : > { %1953 = vmatmul.msk.bf16.gmra.mxu3 %vm585_vm0, %v1186_v15  ;;  %v1000_v54 = vadd.f32 %v2397_v26, %v999_v51  ;;  %v2087_v51 = vld [vmem:[%s2380_s29 + $0x58] sm:$0xff] }
 0x284   : > { %v1093_v61 = vadd.f32 %v1061_v57, %v1000_v54 }
 0x285   : > { %2047 = vmatmul.msk.bf16.gmra.mxu1 %vm585_vm0, %v2087_v51 }
 0x286   : > { %v1125_v62 = vmax.f32 %v1093_v61, 0.0  ;;  %v1501_v9 = vpop.f32.mrf.mxu1 }
 0x289   : > { %v1001_v59 = vpop.f32.mrf.mxu2 }
 0x28a   : > { %v1002_v10 = vadd.f32 %v2397_v26, %v1001_v59 }
 0x28c   : > { %v1094_v13 = vadd.f32 %v1062_v58, %v1002_v10  ;;  %v473_v58 = vld [vmem:[%s2239_s25 + $0x50] sm:$0xff]  }
 0x28e   : > { %v1126_v1 = vmax.f32 %v1094_v13, 0.0  ;;  %1939 = vmatmul.msk.bf16.gmra.mxu2 %vm911_vm3, %v898_v21  ;;  %v1504_v21 = vpop.f32.mrf.mxu1  ;;  %v1069_v13 = vunpack.c.l.bf16 %v473_v58 }
 0x290   : > { %v1187_v4 = vpack.c.bf16 %v1126_v1, %v1125_v62  ;;  %v1070_v62 = vunpack.c.h.bf16 %v473_v58 }
 0x291   : > { %v1004_v5 = vpop.f32.mrf.mxu2 }
 0x292   : > { %1954 = vmatmul.msk.bf16.gmra.mxu3 %vm585_vm0, %v1187_v4  ;;  %v1005_v11 = vadd.f32 %v2397_v26, %v1004_v5 }
 0x294   : > { %v1095_v18 = vadd.f32 %v1063_v12, %v1005_v11 }
 0x296   : > { %v1127_v22 = vmax.f32 %v1095_v18, 0.0  ;;  %v1506_v53 = vpop.f32.mrf.mxu1  ;;  %v2088_v18 = vld [vmem:[%s2380_s29 + $0x60] sm:$0xff] }
 0x297   : > { %2048 = vmatmul.msk.bf16.gmra.mxu1 %vm585_vm0, %v2088_v18 }
 0x299   : > { %v1006_v17 = vpop.f32.mrf.mxu2 }
 0x29a   : > { %v1007_v19 = vadd.f32 %v2397_v26, %v1006_v17 }
 0x29c   : > { %v1096_v20 = vadd.f32 %v1064_v16, %v1007_v19 }
 0x29e   : > { %v1128_v23 = vmax.f32 %v1096_v20, 0.0  ;;  %v2472_v34 = vpop.f32.mrf.mxu1 }
 0x2a0   : > { %v1188_v25 = vpack.c.bf16 %v1128_v23, %v1127_v22  ;;  %v475_v22 = vld [vmem:[%s2239_s25 + $0x58] sm:$0xff]  }
 0x2a1   : > { %v1009_v27 = vpop.f32.mrf.mxu2 }
 0x2a2   : > { %1955 = vmatmul.msk.bf16.gmra.mxu3 %vm585_vm0, %v1188_v25  ;;  %v1010_v55 = vadd.f32 %v2397_v26, %v1009_v27  ;;  %v1071_v27 = vunpack.c.l.bf16 %v475_v22 }
 0x2a4   : > { %v1097_v31 = vadd.f32 %v1065_v56, %v1010_v55 }
 0x2a6   : > { %v1129_v35 = vmax.f32 %v1097_v31, 0.0  ;;  %v2483_v40 = vpop.f32.mrf.mxu1 }
 0x2a9   : > { %v1011_v30 = vpop.f32.mrf.mxu2 }
 0x2aa   : > { %v1012_v32 = vadd.f32 %v2397_v26, %v1011_v30 }
 0x2ac   : > { %v1098_v33 = vadd.f32 %v1066_v29, %v1012_v32 }
 0x2ae   : > { %v1130_v36 = vmax.f32 %v1098_v33, 0.0  ;;  %v2488_v7 = vpop.f32.mrf.mxu1 }
 0x2b0   : > { %v1189_v38 = vpack.c.bf16 %v1130_v36, %v1129_v35 }
 0x2b1   : > { %v1014_v60 = vpop.f32.mrf.mxu2 }
 0x2b2   : > { %1956 = vmatmul.msk.bf16.gmra.mxu3 %vm585_vm0, %v1189_v38  ;;  %v1015_v41 = vadd.f32 %v2397_v26, %v1014_v60  ;;  %v2089_v38 = vld [vmem:[%s2380_s29 + $0x68] sm:$0xff] }
 0x2b3   : > { %2049 = vmatmul.msk.bf16.gmra.mxu1 %vm585_vm0, %v2089_v38 }
 0x2b4   : > { %v1099_v47 = vadd.f32 %v1067_v42, %v1015_v41 }
 0x2b5   : > { %v1270_v39 = vpop.f32.mrf.mxu3 }
 0x2b6   : > { %v1500_v43 = vadd.f32 %v1499_v14, %v1270_v39  ;;  %v1131_v49 = vmax.f32 %v1099_v47, 0.0  ;;  %v2495_v61 = vpop.f32.mrf.mxu1  ;;  %v477_v39 = vld [vmem:[%s2239_s25 + $0x60] sm:$0xff]  }
 0x2b8   : > { %v1583_v45 = vadd.f32 %v2481_v0, %v1500_v43 }
 0x2b9   : > { %v1016_v46 = vpop.f32.mrf.mxu2 }
 0x2ba   : > { %v1017_v48 = vadd.f32 %v2397_v26, %v1016_v46  ;;  %1615 = vxpose.xlu0.b32.start [1/16] (narrow) %v1583_v45, 32  ;;  %v1074_v45 = vunpack.c.h.bf16 %v477_v39 }
 0x2bc   : > { %v1100_v3 = vadd.f32 %v1068_v44, %v1017_v48  ;;  %v1073_v44 = vunpack.c.l.bf16 %v477_v39 }
 0x2bd   : > { %v1272_v6 = vpop.f32.mrf.mxu3 }
 0x2be   : > { %v1132_v50 = vmax.f32 %v1100_v3, 0.0  ;;  %v1502_v15 = vadd.f32 %v1501_v9, %v1272_v6  ;;  %v2500_v11 = vpop.f32.mrf.mxu1 }
 0x2c0   : > { %v1190_v52 = vpack.c.bf16 %v1132_v50, %v1131_v49  ;;  %v1584_v54 = vadd.f32 %v2481_v0, %v1502_v15 }
 0x2c1   : > { %v1019_v57 = vpop.f32.mrf.mxu2 }
 0x2c2   : > { %1957 = vmatmul.msk.bf16.gmra.mxu3 %vm585_vm0, %v1190_v52  ;;  %1616 = vxpose.xlu0.b32.cont [2/16] (narrow) %v1584_v54, 32  ;;  %v1020_v10 = vadd.f32 %v2397_v26, %v1019_v57  ;;  %v2090_v52 = vld [vmem:[%s2380_s29 + $0x70] sm:$0xff] }
 0x2c3   : > { %2050 = vmatmul.msk.bf16.gmra.mxu1 %vm585_vm0, %v2090_v52 }
 0x2c4   : > { %v1101_v4 = vadd.f32 %v1069_v13, %v1020_v10 }
 0x2c5   : > { %v1275_v59 = vpop.f32.mrf.mxu3 }
 0x2c6   : > { %v1505_v14 = vadd.f32 %v1504_v21, %v1275_v59  ;;  %v1133_v12 = vmax.f32 %v1101_v4, 0.0  ;;  %v2507_v24 = vpop.f32.mrf.mxu1  ;;  %v479_v59 = vld [vmem:[%s2239_s25 + $0x68] sm:$0xff]  }
 0x2c8   : > { %v1585_v1 = vadd.f32 %v2481_v0, %v1505_v14  ;;  %v1075_v14 = vunpack.c.l.bf16 %v479_v59 }
 0x2c9   : > { %v1021_v2 = vpop.f32.mrf.mxu2 }
 0x2ca   : > { %v1022_v5 = vadd.f32 %v2397_v26, %v1021_v2  ;;  %1617 = vxpose.xlu0.b32.cont [3/16] (narrow) %v1585_v1, 32 }
 0x2cc   : > { %v1102_v8 = vadd.f32 %v1070_v62, %v1022_v5 }
 0x2cd   : > { %v1277_v9 = vpop.f32.mrf.mxu3 }
 0x2ce   : > { %v1134_v16 = vmax.f32 %v1102_v8, 0.0  ;;  %v1507_v17 = vadd.f32 %v1506_v53, %v1277_v9  ;;  %v1072_v53 = vunpack.c.h.bf16 %v475_v22  ;;  %v2513_v33 = vpop.f32.mrf.mxu1  ;;  %v481_v22 = vld [vmem:[%s2239_s25 + $0x70] sm:$0xff]  }
 0x2d0   : > { %v1191_v19 = vpack.c.bf16 %v1134_v16, %v1133_v12  ;;  %v1586_v20 = vadd.f32 %v2481_v0, %v1507_v17 }
 0x2d1   : > { %v1024_v21 = vpop.f32.mrf.mxu2 }
 0x2d2   : > { %1958 = vmatmul.msk.bf16.gmra.mxu3 %vm585_vm0, %v1191_v19  ;;  %1618 = vxpose.xlu0.b32.cont [4/16] (narrow) %v1586_v20, 32  ;;  %v1025_v25 = vadd.f32 %v2397_v26, %v1024_v21  ;;  %v2091_v19 = vld [vmem:[%s2380_s29 + $0x78] sm:$0xff] }
 0x2d3   : > { %2051 = vmatmul.msk.bf16.gmra.mxu1 %vm585_vm0, %v2091_v19 }
 0x2d4   : > { %v1103_v29 = vadd.f32 %v1071_v27, %v1025_v25 }
 0x2d5   : > { %v1280_v23 = vpop.f32.mrf.mxu3 }
 0x2d6   : > { %v1510_v28 = vadd.f32 %v2472_v34, %v1280_v23  ;;  %v1135_v35 = vmax.f32 %v1103_v29, 0.0  ;;  %v2521_v42 = vpop.f32.mrf.mxu1 }
 0x2d8   : > { %v1587_v55 = vadd.f32 %v2481_v0, %v1510_v28  ;;  %v1077_v28 = vunpack.c.l.bf16 %v481_v22 }
 0x2d9   : > { %v1026_v56 = vpop.f32.mrf.mxu2 }
 0x2da   : > { %v1027_v30 = vadd.f32 %v2397_v26, %v1026_v56  ;;  %1619 = vxpose.xlu0.b32.cont [5/16] (narrow) %v1587_v55, 32  ;;  %v1078_v55 = vunpack.c.h.bf16 %v481_v22 }
 0x2dc   : > { %v1104_v31 = vadd.f32 %v1072_v53, %v1027_v30 }
 0x2dd   : > { %v1282_v32 = vpop.f32.mrf.mxu3 }
 0x2de   : > { %v1136_v36 = vmax.f32 %v1104_v31, 0.0  ;;  %v1512_v37 = vadd.f32 %v2483_v40, %v1282_v32  ;;  %v1529_v54 = vpop.f32.mrf.mxu1 }
 0x2e0   : > { %v1192_v60 = vpack.c.bf16 %v1136_v36, %v1135_v35  ;;  %v1588_v34 = vadd.f32 %v2481_v0, %v1512_v37 }
 0x2e1   : > { %v1029_v63 = vpop.f32.mrf.mxu2 }
 0x2e2   : > { %1959 = vmatmul.msk.bf16.gmra.mxu3 %vm585_vm0, %v1192_v60  ;;  %1620 = vxpose.xlu0.b32.cont [6/16] (narrow) %v1588_v34, 32  ;;  %v1030_v43 = vadd.f32 %v2397_v26, %v1029_v63  ;;  %v483_v63 = vld [vmem:[%s2239_s25 + $0x78] sm:$0xff]   ;;  %s2056_s25 = sshll.u32 %s2613_s13, 6 }
 0x2e3   : > { %s2574_s19 = scalar_lea.vmem %s2607_s10, %s2056_s25 }
 0x2e4   : > { %v1105_v48 = vadd.f32 %v1073_v44, %v1030_v43  ;;  %v1079_v43 = vunpack.c.l.bf16 %v483_v63 }
 0x2e5   : > { %v1285_v41 = vpop.f32.mrf.mxu3 }
 0x2e6   : > { %v1515_v40 = vadd.f32 %v2488_v7, %v1285_v41  ;;  %v1137_v50 = vmax.f32 %v1105_v48, 0.0  ;;  %v1531_v4 = vpop.f32.mrf.mxu1 }
 0x2e8   : > { %v1589_v46 = vadd.f32 %v2481_v0, %v1515_v40 }
 0x2e9   : > { %v1031_v47 = vpop.f32.mrf.mxu2 }
 0x2ea   : > { %v1032_v3 = vadd.f32 %v2397_v26, %v1031_v47  ;;  %1621 = vxpose.xlu0.b32.cont [7/16] (narrow) %v1589_v46, 32 }
 0x2ec   : > { %v1106_v6 = vadd.f32 %v1074_v45, %v1032_v3  ;;  %v1080_v45 = vunpack.c.h.bf16 %v483_v63 }
 0x2ed   : > { %v1287_v49 = vpop.f32.mrf.mxu3 }
 0x2ee   : > { %v1138_v15 = vmax.f32 %v1106_v6, 0.0  ;;  %v1517_v51 = vadd.f32 %v2495_v61, %v1287_v49  ;;  %v1076_v61 = vunpack.c.h.bf16 %v479_v59  ;;  %v1534_v23 = vpop.f32.mrf.mxu1 }
 0x2f0   : > { %v1193_v57 = vpack.c.bf16 %v1138_v15, %v1137_v50  ;;  %v1590_v7 = vadd.f32 %v2481_v0, %v1517_v51 }
 0x2f1   : > { %v1034_v58 = vpop.f32.mrf.mxu2 }
 0x2f2   : > { %1960 = vmatmul.msk.bf16.gmra.mxu3 %vm585_vm0, %v1193_v57  ;;  %1622 = vxpose.xlu0.b32.cont [8/16] (narrow) %v1590_v7, 32  ;;  %v1035_v13 = vadd.f32 %v2397_v26, %v1034_v58 }
 0x2f4   : > { %v1107_v5 = vadd.f32 %v1075_v14, %v1035_v13 }
 0x2f5   : > { %v1290_v10 = vpop.f32.mrf.mxu3 }
 0x2f6   : > { %v1520_v62 = vadd.f32 %v2500_v11, %v1290_v10  ;;  %v1139_v16 = vmax.f32 %v1107_v5, 0.0  ;;  %v1536_v35 = vpop.f32.mrf.mxu1 }
 0x2f8   : > { %v1591_v1 = vadd.f32 %v2481_v0, %v1520_v62 }
 0x2f9   : > { %v1036_v2 = vpop.f32.mrf.mxu2 }
 0x2fa   : > { %v1037_v8 = vadd.f32 %v2397_v26, %v1036_v2  ;;  %1623 = vxpose.xlu0.b32.cont [9/16] (narrow) %v1591_v1, 32 }
 0x2fc   : > { %v1108_v9 = vadd.f32 %v1076_v61, %v1037_v8 }
 0x2fd   : > { %v1292_v12 = vpop.f32.mrf.mxu3 }
 0x2fe   : > { %v1140_v17 = vmax.f32 %v1108_v9, 0.0  ;;  %v1522_v18 = vadd.f32 %v2507_v24, %v1292_v12  ;;  %v1539_v40 = vpop.f32.mrf.mxu1 }
 0x300   : > { %v1194_v20 = vpack.c.bf16 %v1140_v17, %v1139_v16  ;;  %v1592_v11 = vadd.f32 %v2481_v0, %v1522_v18 }
 0x301   : > { %v1039_v21 = vpop.f32.mrf.mxu2 }
 0x302   : > { %1961 = vmatmul.msk.bf16.gmra.mxu3 %vm585_vm0, %v1194_v20  ;;  %1624 = vxpose.xlu0.b32.cont [10/16] (narrow) %v1592_v11, 32  ;;  %v1040_v27 = vadd.f32 %v2397_v26, %v1039_v21 }
 0x304   : > { %v1109_v29 = vadd.f32 %v1077_v28, %v1040_v27 }
 0x305   : > { %v1295_v25 = vpop.f32.mrf.mxu3 }
 0x306   : > { %v1525_v53 = vadd.f32 %v2513_v33, %v1295_v25  ;;  %v1141_v36 = vmax.f32 %v1109_v29, 0.0  ;;  %v1541_v57 = vpop.f32.mrf.mxu1 }
 0x308   : > { %v1593_v24 = vadd.f32 %v2481_v0, %v1525_v53 }
 0x309   : > { %v1041_v56 = vpop.f32.mrf.mxu2 }
 0x30a   : > { %v1042_v30 = vadd.f32 %v2397_v26, %v1041_v56  ;;  %1625 = vxpose.xlu0.b32.cont [11/16] (narrow) %v1593_v24, 32 }
 0x30c   : > { %v1110_v31 = vadd.f32 %v1078_v55, %v1042_v30 }
 0x30d   : > { %v1297_v32 = vpop.f32.mrf.mxu3 }
 0x30e   : > { %v1142_v37 = vmax.f32 %v1110_v31, 0.0  ;;  %v1527_v38 = vadd.f32 %v2521_v42, %v1297_v32  ;;  %v1544_v59 = vpop.f32.mrf.mxu1 }
 0x310   : > { %v1195_v60 = vpack.c.bf16 %v1142_v37, %v1141_v36  ;;  %v1594_v34 = vadd.f32 %v2481_v0, %v1527_v38 }
 0x311   : > { %v1044_v33 = vpop.f32.mrf.mxu2 }
 0x312   : > { %1962 = vmatmul.msk.bf16.gmra.mxu3 %vm585_vm0, %v1195_v60  ;;  %1626 = vxpose.xlu0.b32.cont [12/16] (narrow) %v1594_v34, 32  ;;  %v1045_v41 = vadd.f32 %v2397_v26, %v1044_v33 }
 0x314   : > { %v1111_v48 = vadd.f32 %v1079_v43, %v1045_v41 }
 0x315   : > { %v1300_v39 = vpop.f32.mrf.mxu3 }
 0x316   : > { %v1530_v44 = vadd.f32 %v1529_v54, %v1300_v39  ;;  %v1143_v49 = vmax.f32 %v1111_v48, 0.0  ;;  %v1546_v62 = vpop.f32.mrf.mxu1 }
 0x318   : > { %v1595_v46 = vadd.f32 %v2481_v0, %v1530_v44 }
 0x319   : > { %v1046_v47 = vpop.f32.mrf.mxu2 }
 0x31a   : > { %v1047_v42 = vadd.f32 %v2397_v26, %v1046_v47  ;;  %1627 = vxpose.xlu0.b32.cont [13/16] (narrow) %v1595_v46, 32 }
 0x31c   : > { %v1112_v3 = vadd.f32 %v1080_v45, %v1047_v42 }
 0x31d   : > { %v1302_v6 = vpop.f32.mrf.mxu3 }
 0x31e   : > { %v1144_v50 = vmax.f32 %v1112_v3, 0.0  ;;  %v1532_v15 = vadd.f32 %v1531_v4, %v1302_v6  ;;  %v1549_v5 = vpop.f32.mrf.mxu1 }
 0x320   : > { %v1196_v51 = vpack.c.bf16 %v1144_v50, %v1143_v49  ;;  %v1596_v52 = vadd.f32 %v2481_v0, %v1532_v15 }
 0x322   : > { %1963 = vmatmul.msk.bf16.gmra.mxu3 %vm585_vm0, %v1196_v51  ;;  %1628 = vxpose.xlu0.b32.cont [14/16] (narrow) %v1596_v52, 32 }
 0x325   : > { %v1305_v54 = vpop.f32.mrf.mxu3 }
 0x326   : > { %v1535_v7 = vadd.f32 %v1534_v23, %v1305_v54  ;;  %v1551_v17 = vpop.f32.mrf.mxu1 }
 0x328   : > { %v1597_v58 = vadd.f32 %v2481_v0, %v1535_v7 }
 0x32a   : > { %1629 = vxpose.xlu0.b32.cont [15/16] (narrow) %v1597_v58, 32 }
 0x32d   : > { %v1307_v26 = vpop.f32.mrf.mxu3 }
 0x32e   : > { %v1537_v10 = vadd.f32 %v1536_v35, %v1307_v26  ;;  %v1554_v11 = vpop.f32.mrf.mxu1 }
 0x330   : > { %v1598_v13 = vadd.f32 %v2481_v0, %v1537_v10 }
 0x332   : > { %1630 = vxpose.xlu0.b32.end [16/16] (narrow) %v1598_v13, 32 }
 0x335   : > { %v1310_v14 = vpop.f32.mrf.mxu3 }
 0x336   : > { %v1540_v61 = vadd.f32 %v1539_v40, %v1310_v14  ;;  %v1556_v27 = vpop.f32.mrf.mxu1 }
 0x338   : > { %v1599_v1 = vadd.f32 %v2481_v0, %v1540_v61 }
 0x33a   : > { %1647 = vxpose.xlu1.b32.start [1/16] (narrow) %v1599_v1, 32 }
 0x33d   : > { %v1312_v2 = vpop.f32.mrf.mxu3 }
 0x33e   : > { %v1542_v4 = vadd.f32 %v1541_v57, %v1312_v2  ;;  %v1559_v56 = vpop.f32.mrf.mxu1 }
 0x340   : > { %v1600_v8 = vadd.f32 %v2481_v0, %v1542_v4 }
 0x342   : > { %1648 = vxpose.xlu1.b32.cont [2/16] (narrow) %v1600_v8, 32 }
 0x345   : > { %v1315_v9 = vpop.f32.mrf.mxu3 }
 0x346   : > { %v1545_v12 = vadd.f32 %v1544_v59, %v1315_v9  ;;  %v1561_v35 = vpop.f32.mrf.mxu1 }
 0x348   : > { %v1601_v16 = vadd.f32 %v2481_v0, %v1545_v12 }
 0x34a   : > { %1649 = vxpose.xlu1.b32.cont [3/16] (narrow) %v1601_v16, 32 }
 0x34d   : > { %v1317_v18 = vpop.f32.mrf.mxu3 }
 0x34e   : > { %v1547_v19 = vadd.f32 %v1546_v62, %v1317_v18  ;;  %v1564_v60 = vpop.f32.mrf.mxu1 }
 0x350   : > { %v1602_v20 = vadd.f32 %v2481_v0, %v1547_v19 }
 0x352   : > { %1650 = vxpose.xlu1.b32.cont [4/16] (narrow) %v1602_v20, 32 }
 0x355   : > { %v1320_v21 = vpop.f32.mrf.mxu3 }
 0x356   : > { %v1550_v22 = vadd.f32 %v1549_v5, %v1320_v21  ;;  %v1566_v41 = vpop.f32.mrf.mxu1 }
 0x358   : > { %v1603_v23 = vadd.f32 %v2481_v0, %v1550_v22 }
 0x35a   : > { %1651 = vxpose.xlu1.b32.cont [5/16] (narrow) %v1603_v23, 32 }
 0x35d   : > { %v1322_v25 = vpop.f32.mrf.mxu3 }
 0x35e   : > { %v1552_v28 = vadd.f32 %v1551_v17, %v1322_v25  ;;  %v1569_v46 = vpop.f32.mrf.mxu1  ;;  %v1631_v48 = vpop.trf.xlu0 }
 0x35f   : > { %1679 = vst [vmem:[%s2574_s19] sm:$0xff] %v1631_v48 }
 0x360   : > { %v1604_v53 = vadd.f32 %v2481_v0, %v1552_v28 }
 0x362   : > { %1652 = vxpose.xlu1.b32.cont [6/16] (narrow) %v1604_v53, 32 }
 0x365   : > { %v1325_v55 = vpop.f32.mrf.mxu3 }
 0x366   : > { %v1555_v24 = vadd.f32 %v1554_v11, %v1325_v55  ;;  %v1571_v49 = vpop.f32.mrf.mxu1  ;;  %v1632_v13 = vpop.trf.xlu0 }
 0x367   : > { %1681 = vst [vmem:[%s2574_s19 + $0x10] sm:$0xff] %v1632_v13 }
 0x368   : > { %v1605_v29 = vadd.f32 %v2481_v0, %v1555_v24 }
 0x36a   : > { %1653 = vxpose.xlu1.b32.cont [7/16] (narrow) %v1605_v29, 32 }
 0x36d   : > { %v1327_v30 = vpop.f32.mrf.mxu3 }
 0x36e   : > { %v1557_v31 = vadd.f32 %v1556_v27, %v1327_v30  ;;  %v1574_v52 = vpop.f32.mrf.mxu1  ;;  %v1633_v14 = vpop.trf.xlu0 }
 0x36f   : > { %1683 = vst [vmem:[%s2574_s19 + $0x20] sm:$0xff] %v1633_v14 }
 0x370   : > { %v1606_v32 = vadd.f32 %v2481_v0, %v1557_v31 }
 0x372   : > { %1654 = vxpose.xlu1.b32.cont [8/16] (narrow) %v1606_v32, 32 }
 0x375   : > { %v1330_v36 = vpop.f32.mrf.mxu3 }
 0x376   : > { %v1560_v37 = vadd.f32 %v1559_v56, %v1330_v36  ;;  %v1576_v58 = vpop.f32.mrf.mxu1  ;;  %v1634_v62 = vpop.trf.xlu0 }
 0x377   : > { %1685 = vst [vmem:[%s2574_s19 + $0x30] sm:$0xff] %v1634_v62 }
 0x378   : > { %v1607_v38 = vadd.f32 %v2481_v0, %v1560_v37 }
 0x37a   : > { %1655 = vxpose.xlu1.b32.cont [9/16] (narrow) %v1607_v38, 32 }
 0x37d   : > { %v1332_v34 = vpop.f32.mrf.mxu3 }
 0x37e   : > { %v1562_v33 = vadd.f32 %v1561_v35, %v1332_v34 }
 0x380   : > { %v1608_v63 = vadd.f32 %v2481_v0, %v1562_v33 }
 0x382   : > { %1656 = vxpose.xlu1.b32.cont [10/16] (narrow) %v1608_v63, 32 }
 0x385   : > { %v1335_v39 = vpop.f32.mrf.mxu3 }
 0x386   : > { %v1565_v43 = vadd.f32 %v1564_v60, %v1335_v39 }
 0x388   : > { %v1609_v44 = vadd.f32 %v2481_v0, %v1565_v43 }
 0x38a   : > { %1657 = vxpose.xlu1.b32.cont [11/16] (narrow) %v1609_v44, 32 }
 0x38d   : > { %v1337_v40 = vpop.f32.mrf.mxu3 }
 0x38e   : > { %v1567_v45 = vadd.f32 %v1566_v41, %v1337_v40 }
 0x390   : > { %v1610_v47 = vadd.f32 %v2481_v0, %v1567_v45 }
 0x392   : > { %1658 = vxpose.xlu1.b32.cont [12/16] (narrow) %v1610_v47, 32 }
 0x395   : > { %v1340_v42 = vpop.f32.mrf.mxu3 }
 0x396   : > { %v1570_v3 = vadd.f32 %v1569_v46, %v1340_v42 }
 0x398   : > { %v1611_v6 = vadd.f32 %v2481_v0, %v1570_v3 }
 0x39a   : > { %1659 = vxpose.xlu1.b32.cont [13/16] (narrow) %v1611_v6, 32 }
 0x39d   : > { %v1342_v50 = vpop.f32.mrf.mxu3 }
 0x39e   : > { %v1572_v15 = vadd.f32 %v1571_v49, %v1342_v50 }
 0x3a0   : > { %v1612_v51 = vadd.f32 %v2481_v0, %v1572_v15 }
 0x3a2   : > { %1660 = vxpose.xlu1.b32.cont [14/16] (narrow) %v1612_v51, 32 }
 0x3a5   : > { %v1345_v57 = vpop.f32.mrf.mxu3 }
 0x3a6   : > { %v1575_v54 = vadd.f32 %v1574_v52, %v1345_v57 }
 0x3a8   : > { %v1613_v7 = vadd.f32 %v2481_v0, %v1575_v54 }
 0x3aa   : > { %1661 = vxpose.xlu1.b32.cont [15/16] (narrow) %v1613_v7, 32 }
 0x3ad   : > { %v1347_v59 = vpop.f32.mrf.mxu3 }
 0x3ae   : > { %v1577_v26 = vadd.f32 %v1576_v58, %v1347_v59 }
 0x3b0   : > { %v1614_v10 = vadd.f32 %v2481_v0, %v1577_v26 }
 0x3b2   : > { %1662 = vxpose.xlu1.b32.end [16/16] (narrow) %v1614_v10, 32 }
 0x3de   : > { %v1663_v61 = vpop.trf.xlu1 }
 0x3df   : > { %1680 = vst [vmem:[%s2574_s19 + $0x8] sm:$0xff] %v1663_v61 }
 0x3e6   : > { %v1664_v1 = vpop.trf.xlu1 }
 0x3e7   : > { %1682 = vst [vmem:[%s2574_s19 + $0x18] sm:$0xff] %v1664_v1 }
 0x3ee   : > { %v1665_v2 = vpop.trf.xlu1 }
 0x3ef   : > { %1684 = vst [vmem:[%s2574_s19 + $0x28] sm:$0xff] %v1665_v2 }
 0x3f6   : > { %v1666_v4 = vpop.trf.xlu1 }
 0x3f7   : > { %1686 = vst [vmem:[%s2574_s19 + $0x38] sm:$0xff] %v1666_v4 }
 0x3f8 PF: > { %s20_s15 = sadd.s32 1, %s2149_s15   ;;  %s2608_s13 = smov %s2145_s14 }
 0x3f9   : > { %p17_p5 = scmp.ge.s32.totalorder %s20_s15, 4   ;;  %s2609_s14 = smov %s2611_s16 }
 0x3fb   :  { %19 = sbr.rel (!%p17_p5) target bundleno = 2 (0x2), region = 96 }

</bundles_post_ra>
